<compile_context>
chip_gen: v7x
topology: tpu7x:2x2x1
jax: 0.10.0
libtpu: 0.0.40
codegen_flags: <defaults>
</compile_context>

<pallas_src>
import functools

import jax
import jax.numpy as jnp
from jax.experimental import pallas as pl
from jax.experimental.pallas import tpu as pltpu

# ---- configuration consistent with Generator(z_dim=32, size=16, ...) ----
Z_DIM = 32
NLABELS = 1
SIZE = 16
EMBED = 32
NF = 16          # nfilter
NF_MAX = 64      # nfilter_max
S0 = 4
NLAYERS = 2                              # int(log2(SIZE / S0))
NF0 = min(NF_MAX, NF * 2 ** NLAYERS)     # 64
IMG_PAD_COUT = 128                       # lane-dense final conv output

_VMEM = pl.BlockSpec(memory_space=pltpu.MemorySpace.VMEM)


def _pick_tile(m):
    """Largest M-tile (multiple of 16, <=512) that divides M."""
    for t in (512, 256, 128, 64, 32, 16):
        if m % t == 0:
            return t
    return m


# ------------------------------ Pallas kernels ------------------------------

def _linear_kernel(x_ref, w_ref, b_ref, o_ref):
    o_ref[...] = (
        jnp.dot(x_ref[...], w_ref[...], preferred_element_type=jnp.float32)
        + b_ref[...]
    )


def linear(x, w, b):
    B = x.shape[0]
    N = w.shape[1]
    return pl.pallas_call(
        _linear_kernel,
        out_shape=jax.ShapeDtypeStruct((B, N), jnp.float32),
        in_specs=[_VMEM, _VMEM, _VMEM],
        out_specs=_VMEM,
    )(x.astype(jnp.bfloat16), w, b.reshape(1, N))


def _conv_kernel(*refs, res_mode, out_relu, out_tanh):
    # x: (tm, 9*Cin) bf16 folded im2col, w: (9*Cin, Cout) bf16, b: (1, Cout) f32
    # res_mode: 0 = none, 1 = identity residual (f32), 2 = learned 1x1 shortcut
    if res_mode == 0:
        x_ref, w_ref, b_ref, o_ref = refs
    elif res_mode == 1:
        x_ref, w_ref, b_ref, res_ref, o_ref = refs
    else:
        x_ref, w_ref, b_ref, xs_ref, ws_ref, o_ref = refs
    acc = jnp.dot(x_ref[...], w_ref[...], preferred_element_type=jnp.float32)
    acc = acc + b_ref[...]
    if res_mode == 1:
        acc = acc + res_ref[...]
    elif res_mode == 2:
        acc = acc + jnp.dot(xs_ref[...], ws_ref[...],
                            preferred_element_type=jnp.float32)
    if out_relu:
        acc = jnp.maximum(acc, 0.0)
    if out_tanh:
        acc = jnp.tanh(acc)
    o_ref[...] = acc.astype(o_ref.dtype)


def conv3x3(x, w_folded, b, *, pre_relu=False, out_relu=False, out_tanh=False,
            residual=None, shortcut=None, out_dtype=jnp.float32):
    """3x3 conv (stride 1, pad 1) on NHWC input as a single (M, 9*Cin) @
    (9*Cin, Cout) MXU matmul, gridded over M. Optionally fuses: input ReLU
    (applied once, before im2col), the residual add (identity `residual` or
    learned 1x1 `shortcut=(x_s_input, ws)`), an output ReLU, and tanh."""
    B, H, W, Cin = x.shape
    K, Cout = w_folded.shape
    assert K == 9 * Cin
    M = B * H * W

    xin = jnp.maximum(x, 0.0) if pre_relu else x
    xin = xin.astype(jnp.bfloat16)
    # relu(pad0(x)) == pad0(relu(x)): ReLU applied once on x, not per tap.
    xpad = jnp.pad(xin, ((0, 0), (1, 1), (1, 1), (0, 0)))
    taps = [xpad[:, dy:dy + H, dx:dx + W, :]
            for dy in range(3) for dx in range(3)]
    xcol = jnp.concatenate(taps, axis=-1).reshape(M, K)   # (M, 9*Cin)

    tm = _pick_tile(M)
    grid = (M // tm,)

    args = [xcol, w_folded, b.reshape(1, Cout)]
    in_specs = [
        pl.BlockSpec((tm, K), lambda i: (i, 0)),
        pl.BlockSpec((K, Cout), lambda i: (0, 0)),
        pl.BlockSpec((1, Cout), lambda i: (0, 0)),
    ]
    if shortcut is not None:
        res_mode = 2
        xs, ws = shortcut                       # shortcut conv uses raw x_s
        Cs = xs.shape[-1]
        args += [xs.reshape(M, Cs).astype(jnp.bfloat16), ws]
        in_specs += [
            pl.BlockSpec((tm, Cs), lambda i: (i, 0)),
            pl.BlockSpec((Cs, Cout), lambda i: (0, 0)),
        ]
    elif residual is not None:
        res_mode = 1
        args += [residual.reshape(M, Cout)]     # identity residual, kept f32
        in_specs += [pl.BlockSpec((tm, Cout), lambda i: (i, 0))]
    else:
        res_mode = 0

    kernel = functools.partial(_conv_kernel, res_mode=res_mode,
                               out_relu=out_relu, out_tanh=out_tanh)
    out = pl.pallas_call(
        kernel,
        out_shape=jax.ShapeDtypeStruct((M, Cout), out_dtype),
        grid=grid,
        in_specs=in_specs,
        out_specs=pl.BlockSpec((tm, Cout), lambda i: (i, 0)),
        compiler_params=pltpu.CompilerParams(
            dimension_semantics=("parallel",)),
    )(*args)
    return out.reshape(B, H, W, Cout)


# ------------------------------ model pieces --------------------------------

def resnet_block(x, p):
    # dx = relu(conv_0(relu(x))): the output ReLU (conv_1's input activation)
    # is fused into conv_0; dx only feeds the next matmul, so it stays bf16.
    dx = conv3x3(x, p['w0'], p['b0'], pre_relu=True, out_relu=True,
                 out_dtype=jnp.bfloat16)
    # out = shortcut(x) + conv_1(dx): shortcut (identity or learned 1x1) and
    # the residual add are fused into conv_1's kernel.
    if 'ws' in p:
        return conv3x3(dx, p['w1'], p['b1'], shortcut=(x, p['ws']))
    return conv3x3(dx, p['w1'], p['b1'], residual=x)


def upsample2x(x):
    # nn.Upsample(scale_factor=2), default mode='nearest' (NHWC glue)
    return jnp.repeat(jnp.repeat(x, 2, axis=1), 2, axis=2)


def generator_forward(params, z, y=None):
    B = z.shape[0]
    if y is None:
        y = jnp.zeros((B,), jnp.int32)
    y = jnp.minimum(y, NLABELS - 1)                    # clamp_(None, nlabels-1)
    yembed = params['embedding'][y]                    # (B, EMBED)
    yembed = yembed / jnp.linalg.norm(yembed, axis=1, keepdims=True)
    yz = jnp.concatenate([z, yembed], axis=1)          # (B, Z_DIM + EMBED)

    out = linear(yz, params['fc_w'], params['fc_b'])   # (B, NF0*S0*S0)
    # fc_w columns are pre-permuted: this reshape already yields NHWC.
    out = out.reshape(B, S0, S0, NF0)

    for i, p in enumerate(params['blocks']):
        out = resnet_block(out, p)
        if i < NLAYERS:
            out = upsample2x(out)

    # conv_img(actvn(out)) + tanh, with Cout zero-padded to 128 lanes.
    out = conv3x3(out, params['img_w'], params['img_b'],
                  pre_relu=True, out_tanh=True)        # (B, H, W, 128)
    out = out[..., :3]
    return out.transpose(0, 3, 1, 2)                   # back to NCHW


# ------------------------- parameter init / prepare -------------------------

def init_params(key):
    """Raw parameters in reference-like layout (conv weights HWIO)."""
    kit = iter(jax.random.split(key, 64))

    def rnd(shape, fan_in):
        return jax.random.normal(next(kit), shape, jnp.float32) * (fan_in ** -0.5)

    params = {
        'embedding': jax.random.normal(next(kit), (NLABELS, EMBED), jnp.float32),
        'fc_w': rnd((Z_DIM + EMBED, NF0 * S0 * S0), Z_DIM + EMBED),
        'fc_b': rnd((NF0 * S0 * S0,), Z_DIM + EMBED),
    }
    block_dims = []
    for i in range(NLAYERS):
        fin = min(NF * 2 ** (NLAYERS - i), NF_MAX)
        fout = min(NF * 2 ** (NLAYERS - i - 1), NF_MAX)
        block_dims.append((fin, fout))
    block_dims.append((NF, NF))

    blocks = []
    for fin, fout in block_dims:
        fhidden = min(fin, fout)
        p = {
            'w0': rnd((3, 3, fin, fhidden), 9 * fin),
            'b0': rnd((fhidden,), 9 * fin),
            'w1': rnd((3, 3, fhidden, fout), 9 * fhidden),
            'b1': rnd((fout,), 9 * fhidden),
        }
        if fin != fout:
            p['ws'] = rnd((fin, fout), fin)    # 1x1 shortcut conv, no bias
        blocks.append(p)
    params['blocks'] = blocks
    params['img_w'] = rnd((3, 3, NF, 3), 9 * NF)
    params['img_b'] = rnd((3,), 9 * NF)
    return params


def prepare_params(raw):
    """One-time conversion to the kernel layout:
      * fc columns permuted so reshape(B, s0, s0, nf0) equals torch's
        view(B, nf0, s0, s0) followed by NCHW->NHWC,
      * conv weights folded (3,3,Cin,Cout) -> (9*Cin, Cout), cast bf16,
      * conv_img output channels zero-padded 3 -> 128 (lane-dense store),
      * biases kept f32 (f32 accumulation in-kernel)."""
    p = {'embedding': raw['embedding']}

    j2 = jnp.arange(NF0 * S0 * S0)
    c = j2 % NF0
    hw = j2 // NF0
    h = hw // S0
    w_ = hw % S0
    src = c * (S0 * S0) + h * S0 + w_            # NCHW column feeding NHWC slot
    p['fc_w'] = raw['fc_w'][:, src].astype(jnp.bfloat16)
    p['fc_b'] = raw['fc_b'][src]

    def fold(w):                                 # (3,3,Cin,Cout) -> (9*Cin, Cout)
        kh, kw, cin, cout = w.shape
        return w.reshape(kh * kw * cin, cout).astype(jnp.bfloat16)

    blocks = []
    for bp in raw['blocks']:
        nb = {'w0': fold(bp['w0']), 'b0': bp['b0'],
              'w1': fold(bp['w1']), 'b1': bp['b1']}
        if 'ws' in bp:
            nb['ws'] = bp['ws'].astype(jnp.bfloat16)
        blocks.append(nb)
    p['blocks'] = blocks

    wimg = fold(raw['img_w'])                    # (144, 3)
    p['img_w'] = jnp.pad(wimg, ((0, 0), (0, IMG_PAD_COUT - 3)))
    p['img_b'] = jnp.pad(raw['img_b'], (0, IMG_PAD_COUT - 3))
    return p


if __name__ == "__main__":
    key = jax.random.PRNGKey(0)
    pkey, zkey = jax.random.split(key)
    params = prepare_params(init_params(pkey))
    z = jax.random.normal(zkey, (2, Z_DIM), jnp.float32)

    fwd = jax.jit(generator_forward)
    out = jax.block_until_ready(fwd(params, z))

    assert out.shape == (2, 3, SIZE, SIZE), out.shape
    assert bool(jnp.all(jnp.isfinite(out)))
    assert bool(jnp.all(jnp.abs(out) <= 1.0))   # tanh output range
    print("KERNEL_OK")
</pallas_src>

<mosaic_0001>
module attributes {stable_mosaic.version = 11 : i64} {
  func.func @_linear_kernel(%arg0: memref<2x64xbf16, #tpu.memory_space<vmem>>, %arg1: memref<64x1024xbf16, #tpu.memory_space<vmem>>, %arg2: memref<1x1024xf32, #tpu.memory_space<vmem>>, %arg3: memref<2x1024xf32, #tpu.memory_space<vmem>>) attributes {dimension_semantics = [], scalar_prefetch = 0 : i64, scratch_operands = 0 : i64, tpu.core_type = #tpu.core_type<tc>} {
    %c0 = arith.constant 0 : index
    %c0_0 = arith.constant 0 : index
    %0 = vector.load %arg0[%c0, %c0_0] : memref<2x64xbf16, #tpu.memory_space<vmem>>, vector<2x64xbf16>
    %c0_1 = arith.constant 0 : index
    %c0_2 = arith.constant 0 : index
    %1 = vector.load %arg1[%c0_1, %c0_2] : memref<64x1024xbf16, #tpu.memory_space<vmem>>, vector<64x1024xbf16>
    %cst = arith.constant dense<0.000000e+00> : vector<2x1024xf32>
    %2 = tpu.matmul %0, %1, %cst {dimension_numbers = #tpu.dot_dimension_numbers<[1], [0], [0], [1], [0, 0, 1, 1], [], []>} : vector<2x64xbf16>, vector<64x1024xbf16>, vector<2x1024xf32> -> vector<2x1024xf32>
    %c0_3 = arith.constant 0 : index
    %c0_4 = arith.constant 0 : index
    %3 = vector.load %arg2[%c0_3, %c0_4] : memref<1x1024xf32, #tpu.memory_space<vmem>>, vector<1x1024xf32>
    %4 = vector.broadcast %3 : vector<1x1024xf32> to vector<2x1024xf32>
    %5 = arith.addf %2, %4 : vector<2x1024xf32>
    %c0_5 = arith.constant 0 : index
    %c0_6 = arith.constant 0 : index
    %6 = vector.load %arg3[%c0_5, %c0_6] : memref<2x1024xf32, #tpu.memory_space<vmem>>, vector<2x1024xf32>
    tpu.vector_store %arg3[%c0_5, %c0_6], %5 {strides = array<i32>} : memref<2x1024xf32, #tpu.memory_space<vmem>>, vector<2x1024xf32>,
    return
  }
}

module attributes {stable_mosaic.version = 11 : i64} {
  func.func @_conv_kernel(%arg0: i32, %arg1: memref<32x576xbf16, #tpu.memory_space<vmem>>, %arg2: memref<576x32xbf16, #tpu.memory_space<vmem>>, %arg3: memref<1x32xf32, #tpu.memory_space<vmem>>, %arg4: memref<32x32xbf16, #tpu.memory_space<vmem>>) attributes {dimension_semantics = [#tpu.dimension_semantics<parallel>], iteration_bounds = array<i64: 1>, scalar_prefetch = 0 : i64, scratch_operands = 0 : i64, tpu.core_type = #tpu.core_type<tc>, window_params = [{transform_indices = @transform_0, window_bounds = array<i64: 32, 576>}, {pipeline_mode = #tpu.pipeline_mode<synchronous>, transform_indices = @transform_1, window_bounds = array<i64: 576, 32>}, {pipeline_mode = #tpu.pipeline_mode<synchronous>, transform_indices = @transform_2, window_bounds = array<i64: 1, 32>}, {transform_indices = @transform_3, window_bounds = array<i64: 32, 32>}]} {
    %c0 = arith.constant 0 : index
    %c0_0 = arith.constant 0 : index
    %0 = vector.load %arg1[%c0, %c0_0] : memref<32x576xbf16, #tpu.memory_space<vmem>>, vector<32x576xbf16>
    %c0_1 = arith.constant 0 : index
    %c0_2 = arith.constant 0 : index
    %1 = vector.load %arg2[%c0_1, %c0_2] : memref<576x32xbf16, #tpu.memory_space<vmem>>, vector<576x32xbf16>
    %cst = arith.constant dense<0.000000e+00> : vector<32x32xf32>
    %2 = tpu.matmul %0, %1, %cst {dimension_numbers = #tpu.dot_dimension_numbers<[1], [0], [0], [1], [0, 0, 1, 1], [], []>} : vector<32x576xbf16>, vector<576x32xbf16>, vector<32x32xf32> -> vector<32x32xf32>
    %c0_3 = arith.constant 0 : index
    %c0_4 = arith.constant 0 : index
    %3 = vector.load %arg3[%c0_3, %c0_4] : memref<1x32xf32, #tpu.memory_space<vmem>>, vector<1x32xf32>
    %4 = vector.broadcast %3 : vector<1x32xf32> to vector<32x32xf32>
    %5 = arith.addf %2, %4 : vector<32x32xf32>
    %cst_5 = arith.constant 0.000000e+00 : f32
    %6 = vector.broadcast %cst_5 : f32 to vector<32x32xf32>
    %7 = arith.maximumf %5, %6 : vector<32x32xf32>
    %8 = arith.truncf %7 : vector<32x32xf32> to vector<32x32xbf16>
    %c0_6 = arith.constant 0 : index
    %c0_7 = arith.constant 0 : index
    %9 = vector.load %arg4[%c0_6, %c0_7] : memref<32x32xbf16, #tpu.memory_space<vmem>>, vector<32x32xbf16>
    tpu.vector_store %arg4[%c0_6, %c0_7], %8 {strides = array<i32>} : memref<32x32xbf16, #tpu.memory_space<vmem>>, vector<32x32xbf16>,
    return
  }
  func.func @transform_0(%arg0: i32) -> (i32, i32) {
    %c0_i32 = arith.constant 0 : i32
    %c0_i32_0 = arith.constant 0 : i32
    return %arg0, %c0_i32 : i32, i32
  }
  func.func @transform_1(%arg0: i32) -> (i32, i32) {
    %c0_i32 = arith.constant 0 : i32
    %c0_i32_0 = arith.constant 0 : i32
    %c0_i32_1 = arith.constant 0 : i32
    return %c0_i32, %c0_i32_0 : i32, i32
  }
  func.func @transform_2(%arg0: i32) -> (i32, i32) {
    %c0_i32 = arith.constant 0 : i32
    %c0_i32_0 = arith.constant 0 : i32
    %c0_i32_1 = arith.constant 0 : i32
    return %c0_i32, %c0_i32_0 : i32, i32
  }
  func.func @transform_3(%arg0: i32) -> (i32, i32) {
    %c0_i32 = arith.constant 0 : i32
    %c0_i32_0 = arith.constant 0 : i32
    return %arg0, %c0_i32 : i32, i32
  }
}

module attributes {stable_mosaic.version = 11 : i64} {
  func.func @_conv_kernel(%arg0: i32, %arg1: memref<32x288xbf16, #tpu.memory_space<vmem>>, %arg2: memref<288x32xbf16, #tpu.memory_space<vmem>>, %arg3: memref<1x32xf32, #tpu.memory_space<vmem>>, %arg4: memref<32x64xbf16, #tpu.memory_space<vmem>>, %arg5: memref<64x32xbf16, #tpu.memory_space<vmem>>, %arg6: memref<32x32xf32, #tpu.memory_space<vmem>>) attributes {dimension_semantics = [#tpu.dimension_semantics<parallel>], iteration_bounds = array<i64: 1>, scalar_prefetch = 0 : i64, scratch_operands = 0 : i64, tpu.core_type = #tpu.core_type<tc>, window_params = [{transform_indices = @transform_0, window_bounds = array<i64: 32, 288>}, {pipeline_mode = #tpu.pipeline_mode<synchronous>, transform_indices = @transform_1, window_bounds = array<i64: 288, 32>}, {pipeline_mode = #tpu.pipeline_mode<synchronous>, transform_indices = @transform_2, window_bounds = array<i64: 1, 32>}, {transform_indices = @transform_3, window_bounds = array<i64: 32, 64>}, {pipeline_mode = #tpu.pipeline_mode<synchronous>, transform_indices = @transform_4, window_bounds = array<i64: 64, 32>}, {transform_indices = @transform_5, window_bounds = array<i64: 32, 32>}]} {
    %c0 = arith.constant 0 : index
    %c0_0 = arith.constant 0 : index
    %0 = vector.load %arg1[%c0, %c0_0] : memref<32x288xbf16, #tpu.memory_space<vmem>>, vector<32x288xbf16>
    %c0_1 = arith.constant 0 : index
    %c0_2 = arith.constant 0 : index
    %1 = vector.load %arg2[%c0_1, %c0_2] : memref<288x32xbf16, #tpu.memory_space<vmem>>, vector<288x32xbf16>
    %cst = arith.constant dense<0.000000e+00> : vector<32x32xf32>
    %2 = tpu.matmul %0, %1, %cst {dimension_numbers = #tpu.dot_dimension_numbers<[1], [0], [0], [1], [0, 0, 1, 1], [], []>} : vector<32x288xbf16>, vector<288x32xbf16>, vector<32x32xf32> -> vector<32x32xf32>
    %c0_3 = arith.constant 0 : index
    %c0_4 = arith.constant 0 : index
    %3 = vector.load %arg3[%c0_3, %c0_4] : memref<1x32xf32, #tpu.memory_space<vmem>>, vector<1x32xf32>
    %4 = vector.broadcast %3 : vector<1x32xf32> to vector<32x32xf32>
    %5 = arith.addf %2, %4 : vector<32x32xf32>
    %c0_5 = arith.constant 0 : index
    %c0_6 = arith.constant 0 : index
    %6 = vector.load %arg4[%c0_5, %c0_6] : memref<32x64xbf16, #tpu.memory_space<vmem>>, vector<32x64xbf16>
    %c0_7 = arith.constant 0 : index
    %c0_8 = arith.constant 0 : index
    %7 = vector.load %arg5[%c0_7, %c0_8] : memref<64x32xbf16, #tpu.memory_space<vmem>>, vector<64x32xbf16>
    %cst_9 = arith.constant dense<0.000000e+00> : vector<32x32xf32>
    %8 = tpu.matmul %6, %7, %cst_9 {dimension_numbers = #tpu.dot_dimension_numbers<[1], [0], [0], [1], [0, 0, 1, 1], [], []>} : vector<32x64xbf16>, vector<64x32xbf16>, vector<32x32xf32> -> vector<32x32xf32>
    %9 = arith.addf %5, %8 : vector<32x32xf32>
    %c0_10 = arith.constant 0 : index
    %c0_11 = arith.constant 0 : index
    %10 = vector.load %arg6[%c0_10, %c0_11] : memref<32x32xf32, #tpu.memory_space<vmem>>, vector<32x32xf32>
    tpu.vector_store %arg6[%c0_10, %c0_11], %9 {strides = array<i32>} : memref<32x32xf32, #tpu.memory_space<vmem>>, vector<32x32xf32>,
    return
  }
  func.func @transform_0(%arg0: i32) -> (i32, i32) {
    %c0_i32 = arith.constant 0 : i32
    %c0_i32_0 = arith.constant 0 : i32
    return %arg0, %c0_i32 : i32, i32
  }
  func.func @transform_1(%arg0: i32) -> (i32, i32) {
    %c0_i32 = arith.constant 0 : i32
    %c0_i32_0 = arith.constant 0 : i32
    %c0_i32_1 = arith.constant 0 : i32
    return %c0_i32, %c0_i32_0 : i32, i32
  }
  func.func @transform_2(%arg0: i32) -> (i32, i32) {
    %c0_i32 = arith.constant 0 : i32
    %c0_i32_0 = arith.constant 0 : i32
    %c0_i32_1 = arith.constant 0 : i32
    return %c0_i32, %c0_i32_0 : i32, i32
  }
  func.func @transform_3(%arg0: i32) -> (i32, i32) {
    %c0_i32 = arith.constant 0 : i32
    %c0_i32_0 = arith.constant 0 : i32
    return %arg0, %c0_i32 : i32, i32
  }
  func.func @transform_4(%arg0: i32) -> (i32, i32) {
    %c0_i32 = arith.constant 0 : i32
    %c0_i32_0 = arith.constant 0 : i32
    %c0_i32_1 = arith.constant 0 : i32
    return %c0_i32, %c0_i32_0 : i32, i32
  }
  func.func @transform_5(%arg0: i32) -> (i32, i32) {
    %c0_i32 = arith.constant 0 : i32
    %c0_i32_0 = arith.constant 0 : i32
    return %arg0, %c0_i32 : i32, i32
  }
}

module attributes {stable_mosaic.version = 11 : i64} {
  func.func @_conv_kernel(%arg0: i32, %arg1: memref<128x288xbf16, #tpu.memory_space<vmem>>, %arg2: memref<288x16xbf16, #tpu.memory_space<vmem>>, %arg3: memref<1x16xf32, #tpu.memory_space<vmem>>, %arg4: memref<128x16xbf16, #tpu.memory_space<vmem>>) attributes {dimension_semantics = [#tpu.dimension_semantics<parallel>], iteration_bounds = array<i64: 1>, scalar_prefetch = 0 : i64, scratch_operands = 0 : i64, tpu.core_type = #tpu.core_type<tc>, window_params = [{transform_indices = @transform_0, window_bounds = array<i64: 128, 288>}, {pipeline_mode = #tpu.pipeline_mode<synchronous>, transform_indices = @transform_1, window_bounds = array<i64: 288, 16>}, {pipeline_mode = #tpu.pipeline_mode<synchronous>, transform_indices = @transform_2, window_bounds = array<i64: 1, 16>}, {transform_indices = @transform_3, window_bounds = array<i64: 128, 16>}]} {
    %c0 = arith.constant 0 : index
    %c0_0 = arith.constant 0 : index
    %0 = vector.load %arg1[%c0, %c0_0] : memref<128x288xbf16, #tpu.memory_space<vmem>>, vector<128x288xbf16>
    %c0_1 = arith.constant 0 : index
    %c0_2 = arith.constant 0 : index
    %1 = vector.load %arg2[%c0_1, %c0_2] : memref<288x16xbf16, #tpu.memory_space<vmem>>, vector<288x16xbf16>
    %cst = arith.constant dense<0.000000e+00> : vector<128x16xf32>
    %2 = tpu.matmul %0, %1, %cst {dimension_numbers = #tpu.dot_dimension_numbers<[1], [0], [0], [1], [0, 0, 1, 1], [], []>} : vector<128x288xbf16>, vector<288x16xbf16>, vector<128x16xf32> -> vector<128x16xf32>
    %c0_3 = arith.constant 0 : index
    %c0_4 = arith.constant 0 : index
    %3 = vector.load %arg3[%c0_3, %c0_4] : memref<1x16xf32, #tpu.memory_space<vmem>>, vector<1x16xf32>
    %4 = vector.broadcast %3 : vector<1x16xf32> to vector<128x16xf32>
    %5 = arith.addf %2, %4 : vector<128x16xf32>
    %cst_5 = arith.constant 0.000000e+00 : f32
    %6 = vector.broadcast %cst_5 : f32 to vector<128x16xf32>
    %7 = arith.maximumf %5, %6 : vector<128x16xf32>
    %8 = arith.truncf %7 : vector<128x16xf32> to vector<128x16xbf16>
    %c0_6 = arith.constant 0 : index
    %c0_7 = arith.constant 0 : index
    %9 = vector.load %arg4[%c0_6, %c0_7] : memref<128x16xbf16, #tpu.memory_space<vmem>>, vector<128x16xbf16>
    tpu.vector_store %arg4[%c0_6, %c0_7], %8 {strides = array<i32>} : memref<128x16xbf16, #tpu.memory_space<vmem>>, vector<128x16xbf16>,
    return
  }
  func.func @transform_0(%arg0: i32) -> (i32, i32) {
    %c0_i32 = arith.constant 0 : i32
    %c0_i32_0 = arith.constant 0 : i32
    return %arg0, %c0_i32 : i32, i32
  }
  func.func @transform_1(%arg0: i32) -> (i32, i32) {
    %c0_i32 = arith.constant 0 : i32
    %c0_i32_0 = arith.constant 0 : i32
    %c0_i32_1 = arith.constant 0 : i32
    return %c0_i32, %c0_i32_0 : i32, i32
  }
  func.func @transform_2(%arg0: i32) -> (i32, i32) {
    %c0_i32 = arith.constant 0 : i32
    %c0_i32_0 = arith.constant 0 : i32
    %c0_i32_1 = arith.constant 0 : i32
    return %c0_i32, %c0_i32_0 : i32, i32
  }
  func.func @transform_3(%arg0: i32) -> (i32, i32) {
    %c0_i32 = arith.constant 0 : i32
    %c0_i32_0 = arith.constant 0 : i32
    return %arg0, %c0_i32 : i32, i32
  }
}

module attributes {stable_mosaic.version = 11 : i64} {
  func.func @_conv_kernel(%arg0: i32, %arg1: memref<128x144xbf16, #tpu.memory_space<vmem>>, %arg2: memref<144x16xbf16, #tpu.memory_space<vmem>>, %arg3: memref<1x16xf32, #tpu.memory_space<vmem>>, %arg4: memref<128x32xbf16, #tpu.memory_space<vmem>>, %arg5: memref<32x16xbf16, #tpu.memory_space<vmem>>, %arg6: memref<128x16xf32, #tpu.memory_space<vmem>>) attributes {dimension_semantics = [#tpu.dimension_semantics<parallel>], iteration_bounds = array<i64: 1>, scalar_prefetch = 0 : i64, scratch_operands = 0 : i64, tpu.core_type = #tpu.core_type<tc>, window_params = [{transform_indices = @transform_0, window_bounds = array<i64: 128, 144>}, {pipeline_mode = #tpu.pipeline_mode<synchronous>, transform_indices = @transform_1, window_bounds = array<i64: 144, 16>}, {pipeline_mode = #tpu.pipeline_mode<synchronous>, transform_indices = @transform_2, window_bounds = array<i64: 1, 16>}, {transform_indices = @transform_3, window_bounds = array<i64: 128, 32>}, {pipeline_mode = #tpu.pipeline_mode<synchronous>, transform_indices = @transform_4, window_bounds = array<i64: 32, 16>}, {transform_indices = @transform_5, window_bounds = array<i64: 128, 16>}]} {
    %c0 = arith.constant 0 : index
    %c0_0 = arith.constant 0 : index
    %0 = vector.load %arg1[%c0, %c0_0] : memref<128x144xbf16, #tpu.memory_space<vmem>>, vector<128x144xbf16>
    %c0_1 = arith.constant 0 : index
    %c0_2 = arith.constant 0 : index
    %1 = vector.load %arg2[%c0_1, %c0_2] : memref<144x16xbf16, #tpu.memory_space<vmem>>, vector<144x16xbf16>
    %cst = arith.constant dense<0.000000e+00> : vector<128x16xf32>
    %2 = tpu.matmul %0, %1, %cst {dimension_numbers = #tpu.dot_dimension_numbers<[1], [0], [0], [1], [0, 0, 1, 1], [], []>} : vector<128x144xbf16>, vector<144x16xbf16>, vector<128x16xf32> -> vector<128x16xf32>
    %c0_3 = arith.constant 0 : index
    %c0_4 = arith.constant 0 : index
    %3 = vector.load %arg3[%c0_3, %c0_4] : memref<1x16xf32, #tpu.memory_space<vmem>>, vector<1x16xf32>
    %4 = vector.broadcast %3 : vector<1x16xf32> to vector<128x16xf32>
    %5 = arith.addf %2, %4 : vector<128x16xf32>
    %c0_5 = arith.constant 0 : index
    %c0_6 = arith.constant 0 : index
    %6 = vector.load %arg4[%c0_5, %c0_6] : memref<128x32xbf16, #tpu.memory_space<vmem>>, vector<128x32xbf16>
    %c0_7 = arith.constant 0 : index
    %c0_8 = arith.constant 0 : index
    %7 = vector.load %arg5[%c0_7, %c0_8] : memref<32x16xbf16, #tpu.memory_space<vmem>>, vector<32x16xbf16>
    %cst_9 = arith.constant dense<0.000000e+00> : vector<128x16xf32>
    %8 = tpu.matmul %6, %7, %cst_9 {dimension_numbers = #tpu.dot_dimension_numbers<[1], [0], [0], [1], [0, 0, 1, 1], [], []>} : vector<128x32xbf16>, vector<32x16xbf16>, vector<128x16xf32> -> vector<128x16xf32>
    %9 = arith.addf %5, %8 : vector<128x16xf32>
    %c0_10 = arith.constant 0 : index
    %c0_11 = arith.constant 0 : index
    %10 = vector.load %arg6[%c0_10, %c0_11] : memref<128x16xf32, #tpu.memory_space<vmem>>, vector<128x16xf32>
    tpu.vector_store %arg6[%c0_10, %c0_11], %9 {strides = array<i32>} : memref<128x16xf32, #tpu.memory_space<vmem>>, vector<128x16xf32>,
    return
  }
  func.func @transform_0(%arg0: i32) -> (i32, i32) {
    %c0_i32 = arith.constant 0 : i32
    %c0_i32_0 = arith.constant 0 : i32
    return %arg0, %c0_i32 : i32, i32
  }
  func.func @transform_1(%arg0: i32) -> (i32, i32) {
    %c0_i32 = arith.constant 0 : i32
    %c0_i32_0 = arith.constant 0 : i32
    %c0_i32_1 = arith.constant 0 : i32
    return %c0_i32, %c0_i32_0 : i32, i32
  }
  func.func @transform_2(%arg0: i32) -> (i32, i32) {
    %c0_i32 = arith.constant 0 : i32
    %c0_i32_0 = arith.constant 0 : i32
    %c0_i32_1 = arith.constant 0 : i32
    return %c0_i32, %c0_i32_0 : i32, i32
  }
  func.func @transform_3(%arg0: i32) -> (i32, i32) {
    %c0_i32 = arith.constant 0 : i32
    %c0_i32_0 = arith.constant 0 : i32
    return %arg0, %c0_i32 : i32, i32
  }
  func.func @transform_4(%arg0: i32) -> (i32, i32) {
    %c0_i32 = arith.constant 0 : i32
    %c0_i32_0 = arith.constant 0 : i32
    %c0_i32_1 = arith.constant 0 : i32
    return %c0_i32, %c0_i32_0 : i32, i32
  }
  func.func @transform_5(%arg0: i32) -> (i32, i32) {
    %c0_i32 = arith.constant 0 : i32
    %c0_i32_0 = arith.constant 0 : i32
    return %arg0, %c0_i32 : i32, i32
  }
}

module attributes {stable_mosaic.version = 11 : i64} {
  func.func @_conv_kernel(%arg0: i32, %arg1: memref<512x144xbf16, #tpu.memory_space<vmem>>, %arg2: memref<144x16xbf16, #tpu.memory_space<vmem>>, %arg3: memref<1x16xf32, #tpu.memory_space<vmem>>, %arg4: memref<512x16xbf16, #tpu.memory_space<vmem>>) attributes {dimension_semantics = [#tpu.dimension_semantics<parallel>], iteration_bounds = array<i64: 1>, scalar_prefetch = 0 : i64, scratch_operands = 0 : i64, tpu.core_type = #tpu.core_type<tc>, window_params = [{transform_indices = @transform_0, window_bounds = array<i64: 512, 144>}, {pipeline_mode = #tpu.pipeline_mode<synchronous>, transform_indices = @transform_1, window_bounds = array<i64: 144, 16>}, {pipeline_mode = #tpu.pipeline_mode<synchronous>, transform_indices = @transform_2, window_bounds = array<i64: 1, 16>}, {transform_indices = @transform_3, window_bounds = array<i64: 512, 16>}]} {
    %c0 = arith.constant 0 : index
    %c0_0 = arith.constant 0 : index
    %0 = vector.load %arg1[%c0, %c0_0] : memref<512x144xbf16, #tpu.memory_space<vmem>>, vector<512x144xbf16>
    %c0_1 = arith.constant 0 : index
    %c0_2 = arith.constant 0 : index
    %1 = vector.load %arg2[%c0_1, %c0_2] : memref<144x16xbf16, #tpu.memory_space<vmem>>, vector<144x16xbf16>
    %cst = arith.constant dense<0.000000e+00> : vector<512x16xf32>
    %2 = tpu.matmul %0, %1, %cst {dimension_numbers = #tpu.dot_dimension_numbers<[1], [0], [0], [1], [0, 0, 1, 1], [], []>} : vector<512x144xbf16>, vector<144x16xbf16>, vector<512x16xf32> -> vector<512x16xf32>
    %c0_3 = arith.constant 0 : index
    %c0_4 = arith.constant 0 : index
    %3 = vector.load %arg3[%c0_3, %c0_4] : memref<1x16xf32, #tpu.memory_space<vmem>>, vector<1x16xf32>
    %4 = vector.broadcast %3 : vector<1x16xf32> to vector<512x16xf32>
    %5 = arith.addf %2, %4 : vector<512x16xf32>
    %cst_5 = arith.constant 0.000000e+00 : f32
    %6 = vector.broadcast %cst_5 : f32 to vector<512x16xf32>
    %7 = arith.maximumf %5, %6 : vector<512x16xf32>
    %8 = arith.truncf %7 : vector<512x16xf32> to vector<512x16xbf16>
    %c0_6 = arith.constant 0 : index
    %c0_7 = arith.constant 0 : index
    %9 = vector.load %arg4[%c0_6, %c0_7] : memref<512x16xbf16, #tpu.memory_space<vmem>>, vector<512x16xbf16>
    tpu.vector_store %arg4[%c0_6, %c0_7], %8 {strides = array<i32>} : memref<512x16xbf16, #tpu.memory_space<vmem>>, vector<512x16xbf16>,
    return
  }
  func.func @transform_0(%arg0: i32) -> (i32, i32) {
    %c0_i32 = arith.constant 0 : i32
    %c0_i32_0 = arith.constant 0 : i32
    return %arg0, %c0_i32 : i32, i32
  }
  func.func @transform_1(%arg0: i32) -> (i32, i32) {
    %c0_i32 = arith.constant 0 : i32
    %c0_i32_0 = arith.constant 0 : i32
    %c0_i32_1 = arith.constant 0 : i32
    return %c0_i32, %c0_i32_0 : i32, i32
  }
  func.func @transform_2(%arg0: i32) -> (i32, i32) {
    %c0_i32 = arith.constant 0 : i32
    %c0_i32_0 = arith.constant 0 : i32
    %c0_i32_1 = arith.constant 0 : i32
    return %c0_i32, %c0_i32_0 : i32, i32
  }
  func.func @transform_3(%arg0: i32) -> (i32, i32) {
    %c0_i32 = arith.constant 0 : i32
    %c0_i32_0 = arith.constant 0 : i32
    return %arg0, %c0_i32 : i32, i32
  }
}

module attributes {stable_mosaic.version = 11 : i64} {
  func.func @_conv_kernel(%arg0: i32, %arg1: memref<512x144xbf16, #tpu.memory_space<vmem>>, %arg2: memref<144x16xbf16, #tpu.memory_space<vmem>>, %arg3: memref<1x16xf32, #tpu.memory_space<vmem>>, %arg4: memref<512x16xf32, #tpu.memory_space<vmem>>, %arg5: memref<512x16xf32, #tpu.memory_space<vmem>>) attributes {dimension_semantics = [#tpu.dimension_semantics<parallel>], iteration_bounds = array<i64: 1>, scalar_prefetch = 0 : i64, scratch_operands = 0 : i64, tpu.core_type = #tpu.core_type<tc>, window_params = [{transform_indices = @transform_0, window_bounds = array<i64: 512, 144>}, {pipeline_mode = #tpu.pipeline_mode<synchronous>, transform_indices = @transform_1, window_bounds = array<i64: 144, 16>}, {pipeline_mode = #tpu.pipeline_mode<synchronous>, transform_indices = @transform_2, window_bounds = array<i64: 1, 16>}, {transform_indices = @transform_3, window_bounds = array<i64: 512, 16>}, {transform_indices = @transform_4, window_bounds = array<i64: 512, 16>}]} {
    %c0 = arith.constant 0 : index
    %c0_0 = arith.constant 0 : index
    %0 = vector.load %arg1[%c0, %c0_0] : memref<512x144xbf16, #tpu.memory_space<vmem>>, vector<512x144xbf16>
    %c0_1 = arith.constant 0 : index
    %c0_2 = arith.constant 0 : index
    %1 = vector.load %arg2[%c0_1, %c0_2] : memref<144x16xbf16, #tpu.memory_space<vmem>>, vector<144x16xbf16>
    %cst = arith.constant dense<0.000000e+00> : vector<512x16xf32>
    %2 = tpu.matmul %0, %1, %cst {dimension_numbers = #tpu.dot_dimension_numbers<[1], [0], [0], [1], [0, 0, 1, 1], [], []>} : vector<512x144xbf16>, vector<144x16xbf16>, vector<512x16xf32> -> vector<512x16xf32>
    %c0_3 = arith.constant 0 : index
    %c0_4 = arith.constant 0 : index
    %3 = vector.load %arg3[%c0_3, %c0_4] : memref<1x16xf32, #tpu.memory_space<vmem>>, vector<1x16xf32>
    %4 = vector.broadcast %3 : vector<1x16xf32> to vector<512x16xf32>
    %5 = arith.addf %2, %4 : vector<512x16xf32>
    %c0_5 = arith.constant 0 : index
    %c0_6 = arith.constant 0 : index
    %6 = vector.load %arg4[%c0_5, %c0_6] : memref<512x16xf32, #tpu.memory_space<vmem>>, vector<512x16xf32>
    %7 = arith.addf %5, %6 : vector<512x16xf32>
    %c0_7 = arith.constant 0 : index
    %c0_8 = arith.constant 0 : index
    %8 = vector.load %arg5[%c0_7, %c0_8] : memref<512x16xf32, #tpu.memory_space<vmem>>, vector<512x16xf32>
    tpu.vector_store %arg5[%c0_7, %c0_8], %7 {strides = array<i32>} : memref<512x16xf32, #tpu.memory_space<vmem>>, vector<512x16xf32>,
    return
  }
  func.func @transform_0(%arg0: i32) -> (i32, i32) {
    %c0_i32 = arith.constant 0 : i32
    %c0_i32_0 = arith.constant 0 : i32
    return %arg0, %c0_i32 : i32, i32
  }
  func.func @transform_1(%arg0: i32) -> (i32, i32) {
    %c0_i32 = arith.constant 0 : i32
    %c0_i32_0 = arith.constant 0 : i32
    %c0_i32_1 = arith.constant 0 : i32
    return %c0_i32, %c0_i32_0 : i32, i32
  }
  func.func @transform_2(%arg0: i32) -> (i32, i32) {
    %c0_i32 = arith.constant 0 : i32
    %c0_i32_0 = arith.constant 0 : i32
    %c0_i32_1 = arith.constant 0 : i32
    return %c0_i32, %c0_i32_0 : i32, i32
  }
  func.func @transform_3(%arg0: i32) -> (i32, i32) {
    %c0_i32 = arith.constant 0 : i32
    %c0_i32_0 = arith.constant 0 : i32
    return %arg0, %c0_i32 : i32, i32
  }
  func.func @transform_4(%arg0: i32) -> (i32, i32) {
    %c0_i32 = arith.constant 0 : i32
    %c0_i32_0 = arith.constant 0 : i32
    return %arg0, %c0_i32 : i32, i32
  }
}

module attributes {stable_mosaic.version = 11 : i64} {
  func.func @_conv_kernel(%arg0: i32, %arg1: memref<512x144xbf16, #tpu.memory_space<vmem>>, %arg2: memref<144x128xbf16, #tpu.memory_space<vmem>>, %arg3: memref<1x128xf32, #tpu.memory_space<vmem>>, %arg4: memref<512x128xf32, #tpu.memory_space<vmem>>) attributes {dimension_semantics = [#tpu.dimension_semantics<parallel>], iteration_bounds = array<i64: 1>, scalar_prefetch = 0 : i64, scratch_operands = 0 : i64, tpu.core_type = #tpu.core_type<tc>, window_params = [{transform_indices = @transform_0, window_bounds = array<i64: 512, 144>}, {pipeline_mode = #tpu.pipeline_mode<synchronous>, transform_indices = @transform_1, window_bounds = array<i64: 144, 128>}, {pipeline_mode = #tpu.pipeline_mode<synchronous>, transform_indices = @transform_2, window_bounds = array<i64: 1, 128>}, {transform_indices = @transform_3, window_bounds = array<i64: 512, 128>}]} {
    %c0 = arith.constant 0 : index
    %c0_0 = arith.constant 0 : index
    %0 = vector.load %arg1[%c0, %c0_0] : memref<512x144xbf16, #tpu.memory_space<vmem>>, vector<512x144xbf16>
    %c0_1 = arith.constant 0 : index
    %c0_2 = arith.constant 0 : index
    %1 = vector.load %arg2[%c0_1, %c0_2] : memref<144x128xbf16, #tpu.memory_space<vmem>>, vector<144x128xbf16>
    %cst = arith.constant dense<0.000000e+00> : vector<512x128xf32>
    %2 = tpu.matmul %0, %1, %cst {dimension_numbers = #tpu.dot_dimension_numbers<[1], [0], [0], [1], [0, 0, 1, 1], [], []>} : vector<512x144xbf16>, vector<144x128xbf16>, vector<512x128xf32> -> vector<512x128xf32>
    %c0_3 = arith.constant 0 : index
    %c0_4 = arith.constant 0 : index
    %3 = vector.load %arg3[%c0_3, %c0_4] : memref<1x128xf32, #tpu.memory_space<vmem>>, vector<1x128xf32>
    %4 = vector.broadcast %3 : vector<1x128xf32> to vector<512x128xf32>
    %5 = arith.addf %2, %4 : vector<512x128xf32>
    %6 = math.tanh %5 : vector<512x128xf32>
    %c0_5 = arith.constant 0 : index
    %c0_6 = arith.constant 0 : index
    %7 = vector.load %arg4[%c0_5, %c0_6] : memref<512x128xf32, #tpu.memory_space<vmem>>, vector<512x128xf32>
    tpu.vector_store %arg4[%c0_5, %c0_6], %6 {strides = array<i32>} : memref<512x128xf32, #tpu.memory_space<vmem>>, vector<512x128xf32>,
    return
  }
  func.func @transform_0(%arg0: i32) -> (i32, i32) {
    %c0_i32 = arith.constant 0 : i32
    %c0_i32_0 = arith.constant 0 : i32
    return %arg0, %c0_i32 : i32, i32
  }
  func.func @transform_1(%arg0: i32) -> (i32, i32) {
    %c0_i32 = arith.constant 0 : i32
    %c0_i32_0 = arith.constant 0 : i32
    %c0_i32_1 = arith.constant 0 : i32
    return %c0_i32, %c0_i32_0 : i32, i32
  }
  func.func @transform_2(%arg0: i32) -> (i32, i32) {
    %c0_i32 = arith.constant 0 : i32
    %c0_i32_0 = arith.constant 0 : i32
    %c0_i32_1 = arith.constant 0 : i32
    return %c0_i32, %c0_i32_0 : i32, i32
  }
  func.func @transform_3(%arg0: i32) -> (i32, i32) {
    %c0_i32 = arith.constant 0 : i32
    %c0_i32_0 = arith.constant 0 : i32
    return %arg0, %c0_i32 : i32, i32
  }
}

</mosaic_0001>

<bundles_post_ra>
// kernel: generator_forward.8
= control target key start
LH: loop header
LB: loop body
LE: loop exit
PB: predicated region body
PF: predicated region fallthrough
CT: control target
= control target key end

     0   :  { %8 = vsyncpa [#allocation3], 0  ;;  %s548_s12 = smov [#allocation2]   ;;  %s605_s0 = inlined_call_operand.vmem [shape: bf16[2,64], index: 0, kind: input, shape index: {}]   ;;  %s606_s1 = inlined_call_operand.hbm [shape: bf16[64,1024], index: 1, kind: input, shape index: {}]   ;;  %s607_s2 = inlined_call_operand.vmem [shape: f32[1,1024], index: 2, kind: input, shape index: {}]   ;;  %s608_s3 = inlined_call_operand.vmem [shape: f32[2,1024], index: 3, kind: output, shape index: {}]  }
   0x1   :  { %s16_s13 = sshll.u32 %s548_s12, 4  ;;  %s524_s16 = scalar_lea.hbm %s606_s1, 4096  ;;  %s17_s13 = int_to_ptr.vmem [resolvable:$true] %s16_s13 }
   0x2   :  { %p525_p0 = scmp.ne.s32.totalorder %s606_s1, %s524_s16  ;;  %p528_p1 = scmp.lt.u32.totalorder %s524_s16, %s606_s1 }
   0x4   :  { %p530_p2 = pnand %p528_p1, %p525_p0 }
   0x6   :  { %533 = shalt.err (!%p530_p2)
}
   0x7   :  { %s534_s21 = scalar_lea.vmem %s17_s13, 4096  ;;  %p539_p4 = scmp.lt.s32.totalorder %s17_s13, %s17_s13 }
   0x8   :  { %p535_p3 = scmp.ne.s32.totalorder %s17_s13, %s534_s21  ;;  %p540_p5 = scmp.lt.s32.totalorder %s534_s21, %s534_s21 }
   0xa   :  { %p541_p6 = por %p540_p5, %p539_p4 }
   0xc   :  { %p542_p7 = pnand %p541_p6, %p535_p3 }
   0xe   :  { %545 = shalt.err (!%p542_p7)
}
   0xf   :  { %s549_s22 = smov 512   ;;  %s550_s23 = smov 32  }
  0x10   :  { %22 = dma.hbm_to_vmem [thread:$0]  %s606_s1, 4096, %s17_s13, [#allocation3], %s549_s22, %s549_s22, %s550_s23  }
  0x11   :  { %546 = dma.done.wait [#allocation3], 4096  }
  0x12   :  { %547 = vsyncadd [#allocation3], 4294963200  ;;  %v551_v0 = vmov 0   ;;  %v30_v1 = vld [vmem:[#allocation2] sm:$0xff]  ;;  %v31_v3 = vld [vmem:[#allocation2 + $0x8] sm:$0xff]  ;;  %vm264_vm0 = vcmask 523264  }
  0x13   :  { %300 = vmatprep.mubr.bf16.mxu0 %v551_v0  ;;  %341 = vmatprep.mubr.bf16.mxu1 %v551_v0  ;;  %v34_v2 = vld [vmem:[#allocation2 + $0x20] sm:$0xff]  ;;  %v35_v5 = vld [vmem:[#allocation2 + $0x28] sm:$0xff]  ;;  %v32_v31 = vld [vmem:[#allocation2 + $0x10] sm:$0xff] }
  0x14   :  { %v484_v4 = vcombine.high %v30_v1, %v34_v2  ;;  %v483_v6 = vcombine.low %v30_v1, %v34_v2  ;;  %v38_v7 = vld [vmem:[#allocation2 + $0x40] sm:$0xff]  ;;  %v486_v9 = vcombine.high %v31_v3, %v35_v5  ;;  %v485_v10 = vcombine.low %v31_v3, %v35_v5  ;;  %v39_v12 = vld [vmem:[#allocation2 + $0x48] sm:$0xff]  ;;  %v36_v32 = vld [vmem:[#allocation2 + $0x30] sm:$0xff] }
  0x15   :  { %v42_v8 = vld [vmem:[#allocation2 + $0x60] sm:$0xff]  ;;  %v43_v13 = vld [vmem:[#allocation2 + $0x68] sm:$0xff]  ;;  %v33_v33 = vld [vmem:[#allocation2 + $0x18] sm:$0xff]  ;;  %v488_v37 = vcombine.high %v32_v31, %v36_v32  ;;  %v487_v44 = vcombine.low %v32_v31, %v36_v32 }
  0x16   :  { %v492_v11 = vcombine.high %v38_v7, %v42_v8  ;;  %v46_v14 = vld [vmem:[#allocation2 + $0x80] sm:$0xff]  ;;  %268 = vmatprep.subr.bf16.mxu0 %v484_v4  ;;  %v494_v15 = vcombine.high %v39_v12, %v43_v13  ;;  %v47_v17 = vld [vmem:[#allocation2 + $0x88] sm:$0xff]  ;;  %309 = vmatprep.subr.bf16.mxu1 %v486_v9  ;;  %v491_v19 = vcombine.low %v38_v7, %v42_v8  ;;  %v37_v34 = vld [vmem:[#allocation2 + $0x38] sm:$0xff]  ;;  %v552_v8 = vmov 1983009808  }
  0x17   :  { %v50_v16 = vld [vmem:[#allocation2 + $0xa0] sm:$0xff]  ;;  %v51_v18 = vld [vmem:[#allocation2 + $0xa8] sm:$0xff]  ;;  %269 = vmatpush1.bf16.msra.mxu0 %v483_v6  ;;  %310 = vmatpush1.bf16.msra.mxu1 %v485_v10  ;;  %v493_v20 = vcombine.low %v39_v12, %v43_v13  ;;  %v490_v38 = vcombine.high %v33_v33, %v37_v34  ;;  %v40_v39 = vld [vmem:[#allocation2 + $0x50] sm:$0xff]  ;;  %v489_v45 = vcombine.low %v33_v33, %v37_v34  ;;  %v443_v9 = vunpack.c.l.s4 %v552_v8 }
  0x18   :  { %270 = vmatprep.subr.bf16.mxu0 %v492_v11  ;;  %v500_v21 = vcombine.high %v46_v14, %v50_v16  ;;  %311 = vmatprep.subr.bf16.mxu1 %v494_v15  ;;  %v502_v22 = vcombine.high %v47_v17, %v51_v18  ;;  %v54_v23 = vld [vmem:[#allocation2 + $0xc0] sm:$0xff]  ;;  %v55_v25 = vld [vmem:[#allocation2 + $0xc8] sm:$0xff]  ;;  %v499_v27 = vcombine.low %v46_v14, %v50_v16  ;;  %v44_v40 = vld [vmem:[#allocation2 + $0x70] sm:$0xff] }
  0x19   :  { %v58_v24 = vld [vmem:[#allocation2 + $0xe0] sm:$0xff]  ;;  %v59_v26 = vld [vmem:[#allocation2 + $0xe8] sm:$0xff]  ;;  %v501_v28 = vcombine.low %v47_v17, %v51_v18  ;;  %v41_v41 = vld [vmem:[#allocation2 + $0x58] sm:$0xff]  ;;  %v496_v46 = vcombine.high %v40_v39, %v44_v40  ;;  %v495_v52 = vcombine.low %v40_v39, %v44_v40  ;;  %v444_v14 = vunpack.c.0.s8 %v443_v9 }
  0x1a   :  { %v508_v29 = vcombine.high %v54_v23, %v58_v24  ;;  %v510_v30 = vcombine.high %v55_v25, %v59_v26  ;;  %v507_v35 = vcombine.low %v54_v23, %v58_v24  ;;  %v509_v36 = vcombine.low %v55_v25, %v59_v26  ;;  %v45_v42 = vld [vmem:[#allocation2 + $0x78] sm:$0xff]  ;;  %v29_v43 = vld [vmem:[%s605_s0] sm:$0x1]  ;;  %v48_v48 = vld [vmem:[#allocation2 + $0x90] sm:$0xff] }
  0x1b   :  { %271 = vmatpush1.bf16.msra.mxu0 %v491_v19  ;;  %312 = vmatpush1.bf16.msra.mxu1 %v493_v20  ;;  %v498_v47 = vcombine.high %v41_v41, %v45_v42  ;;  %v52_v49 = vld [vmem:[#allocation2 + $0xb0] sm:$0xff]  ;;  %v49_v50 = vld [vmem:[#allocation2 + $0x98] sm:$0xff]  ;;  %v497_v53 = vcombine.low %v41_v41, %v45_v42  ;;  %v62_v5 = vld [vmem:[%s607_s2] sm:$0xff] }
  0x1c   :  { %272 = vmatprep.subr.bf16.mxu0 %v500_v21  ;;  %313 = vmatprep.subr.bf16.mxu1 %v502_v22  ;;  %v53_v51 = vld [vmem:[#allocation2 + $0xb8] sm:$0xff]  ;;  %v504_v54 = vcombine.high %v48_v48, %v52_v49  ;;  %v56_v56 = vld [vmem:[#allocation2 + $0xd0] sm:$0xff]  ;;  %v503_v60 = vcombine.low %v48_v48, %v52_v49 }
  0x1d   :  { %v506_v55 = vcombine.high %v49_v50, %v53_v51  ;;  %v60_v57 = vld [vmem:[#allocation2 + $0xf0] sm:$0xff]  ;;  %v57_v58 = vld [vmem:[#allocation2 + $0xd8] sm:$0xff]  ;;  %v505_v61 = vcombine.low %v49_v50, %v53_v51 }
  0x1e   :  { %v61_v59 = vld [vmem:[#allocation2 + $0xf8] sm:$0xff]  ;;  %v512_v62 = vcombine.high %v56_v56, %v60_v57  ;;  %v511_v1 = vcombine.low %v56_v56, %v60_v57 }
  0x1f   :  { %273 = vmatpush1.bf16.msra.mxu0 %v499_v27  ;;  %314 = vmatpush1.bf16.msra.mxu1 %v501_v28  ;;  %v514_v63 = vcombine.high %v57_v58, %v61_v59  ;;  %v513_v2 = vcombine.low %v57_v58, %v61_v59 }
  0x20   :  { %274 = vmatprep.subr.bf16.mxu0 %v508_v29  ;;  %315 = vmatprep.subr.bf16.mxu1 %v510_v30 }
  0x23   :  { %275 = vmatpush1.bf16.msra.mxu0 %v507_v35  ;;  %316 = vmatpush1.bf16.msra.mxu1 %v509_v36 }
  0x24   :  { %350 = vmatprep.subr.bf16.mxu0 %v488_v37  ;;  %391 = vmatprep.subr.bf16.mxu1 %v490_v38 }
  0x26   :  { %515 = vmatmul.mubr.msk.bf16.vlgmr.msra.gmra.mrb[0].mxu0 %vm264_vm0, %v29_v43  ;;  %516 = vmatmul.mubr.msk.bf16.vlgmr.msra.gmra.mrb[0].mxu1 %vm264_vm0, %v29_v43 }
  0x27   :  { %351 = vmatpush1.bf16.msra.mxu0 %v487_v44  ;;  %392 = vmatpush1.bf16.msra.mxu1 %v489_v45 }
  0x28   :  { %352 = vmatprep.subr.bf16.mxu0 %v496_v46  ;;  %393 = vmatprep.subr.bf16.mxu1 %v498_v47 }
  0x29   :  { %382 = vmatprep.mubr.bf16.mxu0 %v551_v0  ;;  %423 = vmatprep.mubr.bf16.mxu1 %v551_v0  ;;  %v64_v0 = vlaneseq }
  0x2b   :  { %353 = vmatpush1.bf16.msra.mxu0 %v495_v52  ;;  %394 = vmatpush1.bf16.msra.mxu1 %v497_v53  ;;  %v65_v3 = vshrl.u32 %v64_v0, 7 }
  0x2c   :  { %354 = vmatprep.subr.bf16.mxu0 %v504_v54  ;;  %395 = vmatprep.subr.bf16.mxu1 %v506_v55 }
  0x2d   :  { %v66_v4 = vsub.s32 0, %v65_v3  ;;  %v74_v6 = vsub.s32 2, %v65_v3  ;;  %v70_v7 = vsub.s32 1, %v65_v3  ;;  %v78_v10 = vsub.s32 3, %v65_v3 }
  0x2e   :  { %v447_v22 = vsub.s32 %v444_v14, %v65_v3  ;;  %v82_v34 = vsub.s32 4, %v65_v3  ;;  %v90_v35 = vsub.s32 6, %v65_v3  ;;  %v86_v36 = vsub.s32 5, %v65_v3 }
  0x2f   :  { %355 = vmatpush1.bf16.msra.mxu0 %v503_v60  ;;  %396 = vmatpush1.bf16.msra.mxu1 %v505_v61  ;;  %v67_v11 = vrot.slane %v62_v5, %v66_v4  ;;  %v75_v12 = vrot.slane %v62_v5, %v74_v6  ;;  %v71_v13 = vrot.slane %v62_v5, %v70_v7  ;;  %v94_v37 = vsub.s32 7, %v65_v3 }
  0x30   :  { %356 = vmatprep.subr.bf16.mxu0 %v512_v62  ;;  %397 = vmatprep.subr.bf16.mxu1 %v514_v63  ;;  %v79_v15 = vrot.slane %v62_v5, %v78_v10  ;;  %v83_v38 = vrot.slane %v62_v5, %v82_v34  ;;  %v91_v39 = vrot.slane %v62_v5, %v90_v35 }
  0x31   :  { %v87_v40 = vrot.slane %v62_v5, %v86_v36  ;;  %v95_v41 = vrot.slane %v62_v5, %v94_v37 }
  0x33   :  { %357 = vmatpush1.bf16.msra.mxu0 %v511_v1  ;;  %398 = vmatpush1.bf16.msra.mxu1 %v513_v2 }
  0x36   :  { %517 = vmatmul.mubr.msk.bf16.vlgmr.msra.gmra.mrb[4].mxu0 %vm264_vm0, %v29_v43  ;;  %518 = vmatmul.mubr.msk.bf16.vlgmr.msra.gmra.mrb[4].mxu1 %vm264_vm0, %v29_v43 }
  0xf9   :  { %v302_v16 = vpop.f32.mrb[0].mxu0  ;;  %v343_v18 = vpop.f32.mrb[0].mxu1 }
  0xfa   :  { %v303_v17 = vadd.f32 %v302_v16, %v67_v11  ;;  %v304_v19 = vpop.f32.mrb[1].mxu0  ;;  %v344_v20 = vadd.f32 %v343_v18, %v75_v12  ;;  %v345_v23 = vpop.f32.mrb[1].mxu1 }
  0xfb   :  { %v305_v21 = vadd.f32 %v304_v19, %v71_v13  ;;  %v306_v24 = vpop.f32.mrb[2].mxu0  ;;  %v346_v25 = vadd.f32 %v345_v23, %v79_v15  ;;  %v347_v26 = vpop.f32.mrb[2].mxu1 }
  0xfc   :  { %v307_v27 = vpop.f32.mrb[3].mxu0  ;;  %v348_v29 = vpop.f32.mrb[3].mxu1 }
  0xfd   :  { %v440_v28 = vcombine.low %v303_v17, %v305_v21  ;;  %v441_v30 = vcombine.low %v344_v20, %v346_v25 }
  0xff   :  { %v448_v31 = vrot.slane %v440_v28, %v447_v22  ;;  %v455_v32 = vrot.slane %v441_v30, %v447_v22 }
 0x101   :  { %v456_v33 = vcombine.low %v448_v31, %v455_v32 }
 0x103   :  { %476 = vst [vmem:[%s608_s3] sm:$0xff] %v456_v33 }
 0x109   :  { %v384_v42 = vpop.f32.mrb[4].mxu0  ;;  %v425_v44 = vpop.f32.mrb[4].mxu1 }
 0x10a   :  { %v385_v43 = vadd.f32 %v384_v42, %v83_v38  ;;  %v386_v45 = vpop.f32.mrb[5].mxu0  ;;  %v426_v46 = vadd.f32 %v425_v44, %v91_v39  ;;  %v427_v48 = vpop.f32.mrb[5].mxu1 }
 0x10b   :  { %v387_v47 = vadd.f32 %v386_v45, %v87_v40  ;;  %v388_v49 = vpop.f32.mrb[6].mxu0  ;;  %v428_v50 = vadd.f32 %v427_v48, %v95_v41  ;;  %v429_v51 = vpop.f32.mrb[6].mxu1 }
 0x10c   :  { %v389_v52 = vpop.f32.mrb[7].mxu0  ;;  %v430_v54 = vpop.f32.mrb[7].mxu1 }
 0x10d   :  { %v457_v53 = vcombine.low %v385_v43, %v387_v47  ;;  %v458_v55 = vcombine.low %v426_v46, %v428_v50 }
 0x10f   :  { %v465_v56 = vrot.slane %v457_v53, %v447_v22  ;;  %v472_v57 = vrot.slane %v458_v55, %v447_v22 }
 0x111   :  { %v473_v58 = vcombine.low %v465_v56, %v472_v57 }
 0x113   :  { %477 = vst [vmem:[%s608_s3 + $0x8] sm:$0xff] %v473_v58 }
 0x114   :  { %482 = vsyncpa [#allocation3], 1 }

// kernel: generator_forward.9
= control target key start
LH: loop header
LB: loop body
LE: loop exit
PB: predicated region body
PF: predicated region fallthrough
CT: control target
= control target key end

     0   :  { %vm372_vm0 = vcmask 523264   ;;  %vm546_vm1 = vcmask 257024   ;;  %s909_s1 = inlined_call_operand.vmem [shape: bf16[576,32], index: 1, kind: input, shape index: {}]   ;;  %s910_s0 = inlined_call_operand.vmem [shape: bf16[32,576], index: 0, kind: input, shape index: {}]   ;;  %s911_s2 = inlined_call_operand.vmem [shape: f32[1,32], index: 2, kind: input, shape index: {}]   ;;  %s912_s3 = inlined_call_operand.vmem [shape: bf16[32,32], index: 3, kind: output, shape index: {}]  }
   0x1   :  { %v686_v0 = vld [vmem:[%s909_s1 + $0x40] sm:$0xff]   ;;  %v690_v4 = vld [vmem:[%s909_s1 + $0x48] sm:$0xff]   ;;  %v694_v8 = vld [vmem:[%s909_s1 + $0x50] sm:$0xff]  }
   0x2   :  { %v687_v1 = vld [vmem:[%s909_s1] sm:$0xff]   ;;  %612 = vmatprep.subr.bf16.mxu0 %v686_v0  ;;  %v691_v5 = vld [vmem:[%s909_s1 + $0x8] sm:$0xff]   ;;  %v695_v9 = vld [vmem:[%s909_s1 + $0x10] sm:$0xff]  }
   0x3   :  { %v688_v2 = vld [vmem:[%s909_s1 + $0xc0] sm:$0xff]   ;;  %613 = vmatpush3.bf16.msra.mxu0 %v687_v1  ;;  %v692_v6 = vld [vmem:[%s909_s1 + $0xc8] sm:$0xff]   ;;  %v696_v10 = vld [vmem:[%s909_s1 + $0xd0] sm:$0xff]  }
   0x4   :  { %v689_v3 = vld [vmem:[%s909_s1 + $0x80] sm:$0xff]   ;;  %640 = vmatprep.subr.bf16.mxu1 %v688_v2  ;;  %614 = vmatprep.subr.bf16.mxu0 %v690_v4  ;;  %v693_v7 = vld [vmem:[%s909_s1 + $0x88] sm:$0xff]   ;;  %v697_v11 = vld [vmem:[%s909_s1 + $0x90] sm:$0xff]  }
   0x5   :  { %641 = vmatpush3.bf16.msra.mxu1 %v689_v3  ;;  %v698_v12 = vld [vmem:[%s909_s1 + $0x58] sm:$0xff]   ;;  %v702_v16 = vld [vmem:[%s909_s1 + $0x60] sm:$0xff]   ;;  %v706_v20 = vld [vmem:[%s909_s1 + $0x68] sm:$0xff]  }
   0x6   :  { %642 = vmatprep.subr.bf16.mxu1 %v692_v6  ;;  %v699_v13 = vld [vmem:[%s909_s1 + $0x18] sm:$0xff]   ;;  %v703_v17 = vld [vmem:[%s909_s1 + $0x20] sm:$0xff]   ;;  %v707_v21 = vld [vmem:[%s909_s1 + $0x28] sm:$0xff]  }
   0x7   :  { %615 = vmatpush3.bf16.msra.mxu0 %v691_v5  ;;  %v700_v14 = vld [vmem:[%s909_s1 + $0xd8] sm:$0xff]   ;;  %v704_v18 = vld [vmem:[%s909_s1 + $0xe0] sm:$0xff]   ;;  %v708_v22 = vld [vmem:[%s909_s1 + $0xe8] sm:$0xff]  }
   0x8   :  { %616 = vmatprep.subr.bf16.mxu0 %v694_v8  ;;  %v701_v15 = vld [vmem:[%s909_s1 + $0x98] sm:$0xff]   ;;  %v705_v19 = vld [vmem:[%s909_s1 + $0xa0] sm:$0xff]   ;;  %v709_v23 = vld [vmem:[%s909_s1 + $0xa8] sm:$0xff]  }
   0x9   :  { %643 = vmatpush3.bf16.msra.mxu1 %v693_v7  ;;  %v710_v24 = vld [vmem:[%s909_s1 + $0x70] sm:$0xff]   ;;  %v714_v28 = vld [vmem:[%s909_s1 + $0x78] sm:$0xff]   ;;  %v721_v34 = vld [vmem:[%s909_s1 + $0x100] sm:$0xff]  }
   0xa   :  { %644 = vmatprep.subr.bf16.mxu1 %v696_v10  ;;  %v711_v25 = vld [vmem:[%s909_s1 + $0x30] sm:$0xff]   ;;  %v715_v29 = vld [vmem:[%s909_s1 + $0x38] sm:$0xff]   ;;  %v724_v36 = vld [vmem:[%s910_s0 + $0xc] ss:$20 sps:$4 sm:$0xff]  }
   0xb   :  { %617 = vmatpush3.bf16.msra.mxu0 %v695_v9  ;;  %v712_v26 = vld [vmem:[%s909_s1 + $0xf0] sm:$0xff]   ;;  %v716_v30 = vld [vmem:[%s909_s1 + $0xf8] sm:$0xff]   ;;  %v725_v37 = vld [vmem:[%s909_s1 + $0x108] sm:$0xff]   ;;  %460 = vmatprep.mubr.bf16.mxu1 %v724_v36 }
   0xc   :  { %618 = vmatprep.subr.bf16.mxu0 %v698_v12  ;;  %v713_v27 = vld [vmem:[%s909_s1 + $0xb0] sm:$0xff]   ;;  %v719_v32 = vld [vmem:[%s910_s0 + $0x4] ss:$20 sps:$4 sm:$0xff]   ;;  %v722_v35 = vld [vmem:[%s910_s0 + $0x8] ss:$20 sps:$4 sm:$0xff]  }
   0xd   :  { %645 = vmatpush3.bf16.msra.mxu1 %v697_v11  ;;  %v717_v31 = vld [vmem:[%s910_s0] ss:$20 sps:$4 sm:$0xff]   ;;  %v720_v33 = vld [vmem:[%s909_s1 + $0xb8] sm:$0xff]   ;;  %411 = vmatprep.mubr.bf16.mxu0 %v719_v32  ;;  %v732_v42 = vld [vmem:[%s910_s0 + $0x30] ss:$20 sps:$4 sm:$0xff]  }
   0xe   :  { %646 = vmatprep.subr.bf16.mxu1 %v700_v14  ;;  %v726_v38 = vld [vmem:[%s910_s0 + $0x2c] ss:$20 sps:$4 sm:$0xff]   ;;  %v728_v39 = vld [vmem:[%s910_s0 + $0x28] ss:$20 sps:$4 sm:$0xff]   ;;  %v729_v40 = vld [vmem:[%s909_s1 + $0x110] sm:$0xff]  }
   0xf   :  { %619 = vmatpush3.bf16.msra.mxu0 %v699_v13  ;;  %v730_v41 = vld [vmem:[%s910_s0 + $0x34] ss:$20 sps:$4 sm:$0xff]   ;;  %v733_v43 = vld [vmem:[%s909_s1 + $0x118] sm:$0xff]   ;;  %v734_v44 = vld [vmem:[%s910_s0 + $0x10] ss:$20 sps:$4 sm:$0xff]  }
  0x10   :  { %620 = vmatprep.subr.bf16.mxu0 %v702_v16  ;;  %v735_v45 = vld [vmem:[%s910_s0 + $0x38] ss:$20 sps:$4 sm:$0xff]   ;;  %v555_v47 = vld [vmem:[%s911_s2] ss:$0 sm:$0xff] }
  0x11   :  { %647 = vmatpush3.bf16.msra.mxu1 %v701_v15 }
  0x12   :  { %648 = vmatprep.subr.bf16.mxu1 %v704_v18 }
  0x13   :  { %621 = vmatpush3.bf16.msra.mxu0 %v703_v17 }
  0x14   :  { %622 = vmatprep.subr.bf16.mxu0 %v706_v20 }
  0x15   :  { %649 = vmatpush3.bf16.msra.mxu1 %v705_v19 }
  0x16   :  { %650 = vmatprep.subr.bf16.mxu1 %v708_v22 }
  0x17   :  { %623 = vmatpush3.bf16.msra.mxu0 %v707_v21 }
  0x18   :  { %624 = vmatprep.subr.bf16.mxu0 %v710_v24 }
  0x19   :  { %651 = vmatpush3.bf16.msra.mxu1 %v709_v23 }
  0x1a   :  { %652 = vmatprep.subr.bf16.mxu1 %v712_v26 }
  0x1b   :  { %625 = vmatpush3.bf16.msra.mxu0 %v711_v25 }
  0x1c   :  { %626 = vmatprep.subr.bf16.mxu0 %v714_v28 }
  0x1d   :  { %653 = vmatpush3.bf16.msra.mxu1 %v713_v27 }
  0x1e   :  { %654 = vmatprep.subr.bf16.mxu1 %v716_v30 }
  0x1f   :  { %627 = vmatpush3.bf16.msra.mxu0 %v715_v29 }
  0x20   :  { %674 = vmatprep.subr.bf16.mxu0 %v721_v34 }
  0x21   :  { %655 = vmatpush3.bf16.msra.mxu1 %v720_v33 }
  0x22   :  { %412 = vmatmul.mubr.bf16.vlgmr.msra.gmra.mrb[0].mxu0 %v717_v31 }
  0x23   :  { %675 = vmatpush3.bf16.msra.mxu0 %v721_v34  ;;  %419 = vmatprep.mubr.bf16.mxu0 %v726_v38 }
  0x24   :  { %461 = vmatmul.mubr.bf16.vlgmr.msra.gmra.mrb[0].mxu1 %v722_v35  ;;  %676 = vmatprep.subr.bf16.mxu0 %v725_v37 }
  0x25   :  { %468 = vmatprep.mubr.bf16.mxu1 %v730_v41 }
  0x27   :  { %677 = vmatpush3.bf16.msra.mxu0 %v725_v37 }
  0x28   :  { %678 = vmatprep.subr.bf16.mxu0 %v729_v40 }
  0x2a   :  { %420 = vmatmul.mubr.bf16.gmra.mrb[4].mxu0 %v728_v39 }
  0x2b   :  { %682 = vmatprep.mubr.msk.bf16.mxu0 %vm372_vm0, %v734_v44  ;;  %679 = vmatpush3.bf16.msra.mxu0 %v729_v40 }
  0x2c   :  { %469 = vmatmul.mubr.bf16.gmra.mrb[4].mxu1 %v732_v42  ;;  %680 = vmatprep.subr.bf16.mxu0 %v733_v43 }
  0x2f   :  { %681 = vmatpush3.bf16.msra.mxu0 %v733_v43 }
  0x32   :  { %683 = vmatmul.mubr.msk.bf16.vlgmr.msra.gmra.mrb[8].mxu0 %vm372_vm0, %v735_v45 }
  0xf5   :  { %v628_v46 = vpop.f32.mrb[0].mxu0 }
  0xf6   :  { %v629_v48 = vpop.f32.mrb[1].mxu0 }
  0xf7   :  { %v630_v49 = vadd.f32 %v629_v48, %v628_v46  ;;  %v631_v50 = vpop.f32.mrb[2].mxu0  ;;  %v656_v51 = vpop.f32.mrb[0].mxu1 }
  0xf8   :  { %v632_v52 = vpop.f32.mrb[3].mxu0  ;;  %v657_v55 = vpop.f32.mrb[1].mxu1 }
  0xf9   :  { %v414_v53 = vadd.f32 %v630_v49, %v555_v47  ;;  %v633_v54 = vadd.f32 %v632_v52, %v631_v50  ;;  %v658_v56 = vadd.f32 %v657_v55, %v656_v51  ;;  %v659_v57 = vpop.f32.mrb[2].mxu1 }
  0xfa   :  { %v660_v59 = vpop.f32.mrb[3].mxu1 }
  0xfb   :  { %v417_v58 = vadd.f32 %v633_v54, %v555_v47  ;;  %v661_v60 = vadd.f32 %v660_v59, %v659_v57  ;;  %v463_v61 = vadd.f32 %v658_v56, %v414_v53 }
  0xfd   :  { %v634_v62 = vpop.f32.mrb[4].mxu0  ;;  %v466_v0 = vadd.f32 %v661_v60, %v417_v58 }
  0xfe   :  { %v635_v63 = vpop.f32.mrb[5].mxu0 }
  0xff   :  { %v636_v1 = vadd.f32 %v635_v63, %v634_v62  ;;  %v637_v2 = vpop.f32.mrb[6].mxu0  ;;  %v662_v3 = vpop.f32.mrb[4].mxu1 }
 0x100   :  { %v638_v4 = vpop.f32.mrb[7].mxu0  ;;  %v663_v7 = vpop.f32.mrb[5].mxu1 }
 0x101   :  { %v422_v5 = vadd.f32 %v636_v1, %v555_v47  ;;  %v639_v6 = vadd.f32 %v638_v4, %v637_v2  ;;  %v664_v8 = vadd.f32 %v663_v7, %v662_v3  ;;  %v665_v9 = vpop.f32.mrb[6].mxu1 }
 0x102   :  { %v666_v11 = vpop.f32.mrb[7].mxu1 }
 0x103   :  { %v425_v10 = vadd.f32 %v639_v6, %v555_v47  ;;  %v667_v12 = vadd.f32 %v666_v11, %v665_v9  ;;  %v471_v13 = vadd.f32 %v664_v8, %v422_v5 }
 0x105   :  { %v684_v14 = vpop.f32.mrb[8].mxu0  ;;  %v474_v15 = vadd.f32 %v667_v12, %v425_v10 }
 0x106   :  { %v520_v16 = vadd.f32 %v684_v14, %v471_v13  ;;  %v511_v17 = vpop.f32.mrb[9].mxu0 }
 0x107   :  { %v512_v18 = vadd.f32 %v511_v17, %v463_v61  ;;  %v685_v19 = vpop.f32.mrb[10].mxu0 }
 0x108   :  { %v528_v20 = vmax.f32 %v520_v16, 0.0  ;;  %v523_v21 = vadd.f32 %v685_v19, %v474_v15  ;;  %v514_v22 = vpop.f32.mrb[11].mxu0 }
 0x109   :  { %v526_v23 = vmax.f32 %v512_v18, 0.0  ;;  %v515_v24 = vadd.f32 %v514_v22, %v466_v0 }
 0x10a   :  { %v610_v25 = vpack.c.bf16 %v528_v20, %v528_v20  ;;  %v529_v26 = vmax.f32 %v523_v21, 0.0 }
 0x10b   :  { %v608_v27 = vpack.c.bf16 %v526_v23, %v526_v23  ;;  %v527_v28 = vmax.f32 %v515_v24, 0.0 }
 0x10c   :  { %549 = vst.msk [vmem:[%s912_s3 + $0x8] sm:$0xf] %vm546_vm1, %v610_v25  ;;  %v611_v29 = vpack.c.bf16 %v529_v26, %v529_v26 }
 0x10d   :  { %547 = vst.msk [vmem:[%s912_s3] sm:$0xf] %vm546_vm1, %v608_v27  ;;  %v609_v30 = vpack.c.bf16 %v527_v28, %v527_v28 }
 0x10e   :  { %550 = vst.msk [vmem:[%s912_s3 + $0xc] sm:$0xf] %vm546_vm1, %v611_v29 }
 0x10f   :  { %548 = vst.msk [vmem:[%s912_s3 + $0x4] sm:$0xf] %vm546_vm1, %v609_v30 }

// kernel: generator_forward.10
= control target key start
LH: loop header
LB: loop body
LE: loop exit
PB: predicated region body
PF: predicated region fallthrough
CT: control target
= control target key end

     0   :  { %vm210_vm0 = vcmask 261120   ;;  %vm361_vm1 = vcmask 523264   ;;  %s703_s1 = inlined_call_operand.vmem [shape: bf16[288,32], index: 1, kind: input, shape index: {}]   ;;  %s704_s0 = inlined_call_operand.vmem [shape: bf16[32,288], index: 0, kind: input, shape index: {}]   ;;  %s705_s4 = inlined_call_operand.vmem [shape: bf16[64,32], index: 4, kind: input, shape index: {}]   ;;  %s706_s3 = inlined_call_operand.vmem [shape: bf16[32,64], index: 3, kind: input, shape index: {}]   ;;  %s707_s2 = inlined_call_operand.vmem [shape: f32[1,32], index: 2, kind: input, shape index: {}]   ;;  %s708_s5 = inlined_call_operand.vmem [shape: f32[32,32], index: 5, kind: output, shape index: {}]  }
   0x1   :  { %v530_v0 = vld [vmem:[%s703_s1 + $0x40] sm:$0xff]   ;;  %v533_v3 = vld [vmem:[%s703_s1 + $0x48] sm:$0xff]   ;;  %v536_v6 = vld [vmem:[%s703_s1 + $0x50] sm:$0xff]  }
   0x2   :  { %v531_v1 = vld [vmem:[%s703_s1] sm:$0xff]   ;;  %464 = vmatprep.subr.bf16.mxu0 %v530_v0  ;;  %v534_v4 = vld [vmem:[%s703_s1 + $0x8] sm:$0xff]   ;;  %v537_v7 = vld [vmem:[%s703_s1 + $0x10] sm:$0xff]  }
   0x3   :  { %v532_v2 = vld [vmem:[%s703_s1 + $0x80] sm:$0xff]   ;;  %465 = vmatpush3.bf16.msra.mxu0 %v531_v1  ;;  %v535_v5 = vld [vmem:[%s703_s1 + $0x88] sm:$0xff]   ;;  %v541_v11 = vld [vmem:[%s703_s1 + $0x58] sm:$0xff]  }
   0x4   :  { %502 = vmatprep.subr.bf16.mxu1 %v532_v2  ;;  %466 = vmatprep.subr.bf16.mxu0 %v533_v3  ;;  %v538_v8 = vld [vmem:[%s704_s0 + $0x8] ss:$12 sps:$4 sm:$0xff]   ;;  %v539_v9 = vld [vmem:[%s705_s4] sm:$0xff]   ;;  %v542_v12 = vld [vmem:[%s703_s1 + $0x18] sm:$0xff]  }
   0x5   :  { %503 = vmatpush3.bf16.msra.mxu1 %v532_v2  ;;  %506 = vmatprep.mubr.msk.bf16.mxu1 %vm210_vm0, %v538_v8  ;;  %v540_v10 = vld [vmem:[%s704_s0 + $0x20] ss:$12 sps:$4 sm:$0xff]   ;;  %v546_v16 = vld [vmem:[%s705_s4 + $0x10] sm:$0xff]   ;;  %v549_v19 = vld [vmem:[%s705_s4 + $0x18] sm:$0xff]  }
   0x6   :  { %504 = vmatprep.subr.bf16.mxu1 %v535_v5  ;;  %v543_v13 = vld [vmem:[%s705_s4 + $0x8] sm:$0xff]   ;;  %v544_v14 = vld [vmem:[%s703_s1 + $0x60] sm:$0xff]   ;;  %v550_v20 = vld [vmem:[%s703_s1 + $0x70] sm:$0xff]  }
   0x7   :  { %467 = vmatpush3.bf16.msra.mxu0 %v534_v4  ;;  %v545_v15 = vld [vmem:[%s703_s1 + $0x20] sm:$0xff]   ;;  %v547_v17 = vld [vmem:[%s703_s1 + $0x68] sm:$0xff]   ;;  %v551_v21 = vld [vmem:[%s703_s1 + $0x30] sm:$0xff]  }
   0x8   :  { %468 = vmatprep.subr.bf16.mxu0 %v536_v6  ;;  %v548_v18 = vld [vmem:[%s703_s1 + $0x28] sm:$0xff]   ;;  %v552_v22 = vld [vmem:[%s706_s3] sm:$0xff]   ;;  %v554_v24 = vld [vmem:[%s703_s1 + $0x78] sm:$0xff]  }
   0x9   :  { %505 = vmatpush3.bf16.msra.mxu1 %v535_v5  ;;  %v553_v23 = vld [vmem:[%s706_s3 + $0x8] sm:$0xff]   ;;  %v555_v25 = vld [vmem:[%s703_s1 + $0x38] sm:$0xff]   ;;  %v558_v26 = vld [vmem:[%s704_s0 + $0x4] ss:$12 sps:$4 sm:$0xff]  }
   0xa   :  { %510 = vmatprep.subr.bf16.mxu1 %v539_v9  ;;  %249 = vmatprep.mubr.bf16.mxu0 %v558_v26  ;;  %v556_v27 = vld [vmem:[%s704_s0] ss:$12 sps:$4 sm:$0xff]   ;;  %v559_v28 = vld [vmem:[%s704_s0 + $0x1c] ss:$12 sps:$4 sm:$0xff]   ;;  %v561_v29 = vld [vmem:[%s704_s0 + $0x18] ss:$12 sps:$4 sm:$0xff]  }
   0xb   :  { %469 = vmatpush3.bf16.msra.mxu0 %v537_v7  ;;  %v429_v35 = vld [vmem:[%s707_s2] ss:$0 sm:$0xff] }
   0xc   :  { %507 = vmatmul.mubr.msk.bf16.vlgmr.msra.gmra.mrb[0].mxu1 %vm210_vm0, %v540_v10  ;;  %470 = vmatprep.subr.bf16.mxu0 %v541_v11 }
   0xd   :  { %511 = vmatpush3.bf16.msra.mxu1 %v539_v9  ;;  %518 = vmatprep.mubr.msk.bf16.mxu1 %vm361_vm1, %v552_v22 }
   0xe   :  { %512 = vmatprep.subr.bf16.mxu1 %v543_v13 }
   0xf   :  { %471 = vmatpush3.bf16.msra.mxu0 %v542_v12 }
  0x10   :  { %472 = vmatprep.subr.bf16.mxu0 %v544_v14 }
  0x11   :  { %513 = vmatpush3.bf16.msra.mxu1 %v543_v13 }
  0x12   :  { %514 = vmatprep.subr.bf16.mxu1 %v546_v16 }
  0x13   :  { %473 = vmatpush3.bf16.msra.mxu0 %v545_v15 }
  0x14   :  { %474 = vmatprep.subr.bf16.mxu0 %v547_v17 }
  0x15   :  { %515 = vmatpush3.bf16.msra.mxu1 %v546_v16 }
  0x16   :  { %516 = vmatprep.subr.bf16.mxu1 %v549_v19 }
  0x17   :  { %475 = vmatpush3.bf16.msra.mxu0 %v548_v18 }
  0x18   :  { %476 = vmatprep.subr.bf16.mxu0 %v550_v20 }
  0x19   :  { %517 = vmatpush3.bf16.msra.mxu1 %v549_v19 }
  0x1b   :  { %477 = vmatpush3.bf16.msra.mxu0 %v551_v21 }
  0x1c   :  { %519 = vmatmul.mubr.msk.bf16.vlgmr.msra.gmra.mrb[0].mxu1 %vm361_vm1, %v553_v23  ;;  %478 = vmatprep.subr.bf16.mxu0 %v554_v24 }
  0x1f   :  { %479 = vmatpush3.bf16.msra.mxu0 %v555_v25 }
  0x22   :  { %250 = vmatmul.mubr.bf16.vlgmr.msra.gmra.mrb[0].mxu0 %v556_v27 }
  0x23   :  { %257 = vmatprep.mubr.bf16.mxu0 %v559_v28 }
  0x2a   :  { %258 = vmatmul.mubr.bf16.gmra.mrb[4].mxu0 %v561_v29 }
  0xef   :  { %v520_v30 = vpop.f32.mrb[0].mxu1 }
  0xf0   :  { %v402_v31 = vpop.f32.mrb[1].mxu1 }
  0xf1   :  { %v521_v32 = vpop.f32.mrb[2].mxu1 }
  0xf2   :  { %v405_v33 = vpop.f32.mrb[3].mxu1 }
  0xf5   :  { %v480_v34 = vpop.f32.mrb[0].mxu0 }
  0xf6   :  { %v481_v36 = vpop.f32.mrb[1].mxu0 }
  0xf7   :  { %v482_v37 = vadd.f32 %v481_v36, %v480_v34  ;;  %v483_v38 = vpop.f32.mrb[2].mxu0 }
  0xf8   :  { %v484_v39 = vpop.f32.mrb[3].mxu0 }
  0xf9   :  { %v252_v40 = vadd.f32 %v482_v37, %v429_v35  ;;  %v485_v41 = vadd.f32 %v484_v39, %v483_v38 }
  0xfb   :  { %v523_v42 = vadd.f32 %v402_v31, %v252_v40  ;;  %v255_v43 = vadd.f32 %v485_v41, %v429_v35 }
  0xfd   :  { %421 = vst.msk [vmem:[%s708_s5] sm:$0xff] %vm210_vm0, %v523_v42  ;;  %v525_v44 = vadd.f32 %v405_v33, %v255_v43  ;;  %v486_v45 = vpop.f32.mrb[4].mxu0 }
  0xfe   :  { %v487_v46 = vpop.f32.mrb[5].mxu0 }
  0xff   :  { %422 = vst.msk [vmem:[%s708_s5 + $0x8] sm:$0xff] %vm210_vm0, %v525_v44  ;;  %v488_v47 = vadd.f32 %v487_v46, %v486_v45  ;;  %v489_v48 = vpop.f32.mrb[6].mxu0 }
 0x100   :  { %v490_v49 = vpop.f32.mrb[7].mxu0 }
 0x101   :  { %v260_v50 = vadd.f32 %v488_v47, %v429_v35  ;;  %v491_v51 = vadd.f32 %v490_v49, %v489_v48 }
 0x103   :  { %v522_v52 = vadd.f32 %v520_v30, %v260_v50  ;;  %v263_v53 = vadd.f32 %v491_v51, %v429_v35 }
 0x105   :  { %423 = vst.msk [vmem:[%s708_s5 + $0x10] sm:$0xff] %vm210_vm0, %v522_v52  ;;  %v524_v54 = vadd.f32 %v521_v32, %v263_v53 }
 0x107   :  { %424 = vst.msk [vmem:[%s708_s5 + $0x18] sm:$0xff] %vm210_vm0, %v524_v54 }

// kernel: generator_forward.11
= control target key start
LH: loop header
LB: loop body
LE: loop exit
PB: predicated region body
PF: predicated region fallthrough
CT: control target
= control target key end

     0   :  { %vm318_vm0 = vcmask 261120   ;;  %vm617_vm1 = vcmask 125952   ;;  %s1132_s1 = inlined_call_operand.vmem [shape: bf16[288,16], index: 1, kind: input, shape index: {}]   ;;  %s1133_s0 = inlined_call_operand.vmem [shape: bf16[128,288], index: 0, kind: input, shape index: {}]   ;;  %s1134_s2 = inlined_call_operand.vmem [shape: f32[1,16], index: 2, kind: input, shape index: {}]   ;;  %s1135_s3 = inlined_call_operand.vmem [shape: bf16[128,16], index: 3, kind: output, shape index: {}]  }
   0x1   :  { %v831_v0 = vld [vmem:[%s1132_s1 + $0x40] sm:$0xff]   ;;  %v833_v2 = vld [vmem:[%s1132_s1 + $0x48] sm:$0xff]   ;;  %v835_v4 = vld [vmem:[%s1132_s1 + $0x50] sm:$0xff]  }
   0x2   :  { %v832_v1 = vld [vmem:[%s1132_s1] sm:$0xff]   ;;  %721 = vmatprep.subr.bf16.mxu0 %v831_v0  ;;  %815 = vmatprep.subr.bf16.mxu1 %v831_v0  ;;  %v834_v3 = vld [vmem:[%s1132_s1 + $0x8] sm:$0xff]   ;;  %v836_v5 = vld [vmem:[%s1132_s1 + $0x10] sm:$0xff]  }
   0x3   :  { %722 = vmatpush3.bf16.msra.mxu0 %v832_v1  ;;  %823 = vmatpush3.bf16.msra.mxu1 %v832_v1  ;;  %v837_v6 = vld [vmem:[%s1132_s1 + $0x58] sm:$0xff]   ;;  %v839_v8 = vld [vmem:[%s1132_s1 + $0x60] sm:$0xff]   ;;  %v841_v10 = vld [vmem:[%s1132_s1 + $0x68] sm:$0xff]  }
   0x4   :  { %723 = vmatprep.subr.bf16.mxu0 %v833_v2  ;;  %816 = vmatprep.subr.bf16.mxu1 %v833_v2  ;;  %v838_v7 = vld [vmem:[%s1132_s1 + $0x18] sm:$0xff]   ;;  %v840_v9 = vld [vmem:[%s1132_s1 + $0x20] sm:$0xff]   ;;  %v842_v13 = vld [vmem:[%s1132_s1 + $0x28] sm:$0xff]  }
   0x5   :  { %v849_v11 = vld [vmem:[%s1133_s0 + $0x4] ss:$12 sps:$4 sm:$0xff]   ;;  %v852_v12 = vld [vmem:[%s1133_s0 + $0x94] ss:$12 sps:$4 sm:$0xff]   ;;  %v845_v16 = vld [vmem:[%s1132_s1 + $0x78] sm:$0xff]  }
   0x6   :  { %v843_v14 = vld [vmem:[%s1132_s1 + $0x70] sm:$0xff]   ;;  %375 = vmatprep.mubr.bf16.mxu0 %v849_v11  ;;  %423 = vmatprep.mubr.bf16.mxu1 %v852_v12  ;;  %v846_v17 = vld [vmem:[%s1132_s1 + $0x38] sm:$0xff]   ;;  %v847_v18 = vld [vmem:[%s1133_s0] ss:$12 sps:$4 sm:$0xff]  }
   0x7   :  { %724 = vmatpush3.bf16.msra.mxu0 %v834_v3  ;;  %824 = vmatpush3.bf16.msra.mxu1 %v834_v3  ;;  %v844_v15 = vld [vmem:[%s1132_s1 + $0x30] sm:$0xff]   ;;  %v853_v19 = vld [vmem:[%s1132_s1 + $0x80] sm:$0xff]   ;;  %v854_v21 = vld [vmem:[%s1133_s0 + $0x1c] ss:$12 sps:$4 sm:$0xff]  }
   0x8   :  { %725 = vmatprep.subr.bf16.mxu0 %v835_v4  ;;  %817 = vmatprep.subr.bf16.mxu1 %v835_v4  ;;  %v850_v20 = vld [vmem:[%s1133_s0 + $0x90] ss:$12 sps:$4 sm:$0xff]   ;;  %v856_v22 = vld [vmem:[%s1133_s0 + $0xac] ss:$12 sps:$4 sm:$0xff]   ;;  %v859_v25 = vld [vmem:[%s1133_s0 + $0xa8] ss:$12 sps:$4 sm:$0xff]  }
   0x9   :  { %v860_v23 = vld [vmem:[%s1132_s1 + $0x88] sm:$0xff]   ;;  %v858_v24 = vld [vmem:[%s1133_s0 + $0x18] ss:$12 sps:$4 sm:$0xff]   ;;  %v861_v26 = vld [vmem:[%s1133_s0 + $0x34] ss:$12 sps:$4 sm:$0xff]  }
   0xa   :  { %v863_v27 = vld [vmem:[%s1133_s0 + $0x8] ss:$12 sps:$4 sm:$0xff]   ;;  %v864_v28 = vld [vmem:[%s1133_s0 + $0x30] ss:$12 sps:$4 sm:$0xff]   ;;  %v865_v29 = vld [vmem:[%s1133_s0 + $0x20] ss:$12 sps:$4 sm:$0xff]  }
   0xb   :  { %726 = vmatpush3.bf16.msra.mxu0 %v836_v5  ;;  %825 = vmatpush3.bf16.msra.mxu1 %v836_v5  ;;  %v866_v30 = vld [vmem:[%s1133_s0 + $0x4c] ss:$12 sps:$4 sm:$0xff]   ;;  %v869_v32 = vld [vmem:[%s1133_s0 + $0x48] ss:$12 sps:$4 sm:$0xff]   ;;  %v870_v33 = vld [vmem:[%s1133_s0 + $0x50] ss:$12 sps:$4 sm:$0xff]  }
   0xc   :  { %727 = vmatprep.subr.bf16.mxu0 %v837_v6  ;;  %818 = vmatprep.subr.bf16.mxu1 %v837_v6  ;;  %v868_v31 = vld [vmem:[%s1133_s0 + $0x38] ss:$12 sps:$4 sm:$0xff]   ;;  %v873_v35 = vld [vmem:[%s1133_s0 + $0x68] ss:$12 sps:$4 sm:$0xff]   ;;  %v874_v36 = vld [vmem:[%s1133_s0 + $0x60] ss:$12 sps:$4 sm:$0xff]  }
   0xd   :  { %v871_v34 = vld [vmem:[%s1133_s0 + $0x64] ss:$12 sps:$4 sm:$0xff]   ;;  %v875_v37 = vld [vmem:[%s1133_s0 + $0x80] ss:$12 sps:$4 sm:$0xff]   ;;  %v876_v38 = vld [vmem:[%s1133_s0 + $0x7c] ss:$12 sps:$4 sm:$0xff]  }
   0xe   :  { %v878_v39 = vld [vmem:[%s1133_s0 + $0x98] ss:$12 sps:$4 sm:$0xff]   ;;  %v880_v41 = vld [vmem:[%s1133_s0 + $0xb0] ss:$12 sps:$4 sm:$0xff]   ;;  %v1046_v2 = vld [vmem:[%s1134_s2] ss:$0 sm:$0xff] }
   0xf   :  { %728 = vmatpush3.bf16.msra.mxu0 %v838_v7  ;;  %826 = vmatpush3.bf16.msra.mxu1 %v838_v7  ;;  %v879_v40 = vld [vmem:[%s1133_s0 + $0x78] ss:$12 sps:$4 sm:$0xff]  }
  0x10   :  { %729 = vmatprep.subr.bf16.mxu0 %v839_v8  ;;  %819 = vmatprep.subr.bf16.mxu1 %v839_v8 }
  0x13   :  { %730 = vmatpush3.bf16.msra.mxu0 %v840_v9  ;;  %827 = vmatpush3.bf16.msra.mxu1 %v840_v9 }
  0x14   :  { %731 = vmatprep.subr.bf16.mxu0 %v841_v10  ;;  %820 = vmatprep.subr.bf16.mxu1 %v841_v10 }
  0x17   :  { %732 = vmatpush3.bf16.msra.mxu0 %v842_v13  ;;  %828 = vmatpush3.bf16.msra.mxu1 %v842_v13 }
  0x18   :  { %733 = vmatprep.subr.bf16.mxu0 %v843_v14  ;;  %821 = vmatprep.subr.bf16.mxu1 %v843_v14 }
  0x1b   :  { %734 = vmatpush3.bf16.msra.mxu0 %v844_v15  ;;  %829 = vmatpush3.bf16.msra.mxu1 %v844_v15 }
  0x1c   :  { %735 = vmatprep.subr.bf16.mxu0 %v845_v16  ;;  %822 = vmatprep.subr.bf16.mxu1 %v845_v16 }
  0x1f   :  { %736 = vmatpush3.bf16.msra.mxu0 %v846_v17  ;;  %830 = vmatpush3.bf16.msra.mxu1 %v846_v17 }
  0x20   :  { %795 = vmatprep.subr.bf16.mxu1 %v853_v19 }
  0x22   :  { %376 = vmatmul.mubr.bf16.vlgmr.msra.gmra.mrb[0].mxu0 %v847_v18  ;;  %424 = vmatmul.mubr.bf16.vlgmr.msra.gmra.mrb[0].mxu1 %v850_v20 }
  0x23   :  { %796 = vmatpush3.bf16.msra.mxu1 %v853_v19  ;;  %383 = vmatprep.mubr.bf16.mxu0 %v854_v21 }
  0x24   :  { %431 = vmatprep.mubr.bf16.mxu1 %v856_v22  ;;  %797 = vmatprep.subr.bf16.mxu1 %v860_v23 }
  0x27   :  { %798 = vmatpush3.bf16.msra.mxu1 %v860_v23 }
  0x2a   :  { %384 = vmatmul.mubr.bf16.gmra.mrb[4].mxu0 %v858_v24  ;;  %432 = vmatmul.mubr.bf16.gmra.mrb[4].mxu1 %v859_v25 }
  0x2b   :  { %391 = vmatprep.mubr.bf16.mxu0 %v861_v26  ;;  %799 = vmatprep.mubr.msk.bf16.mxu1 %vm318_vm0, %v863_v27 }
  0x32   :  { %392 = vmatmul.mubr.bf16.gmra.mrb[8].mxu0 %v864_v28  ;;  %800 = vmatmul.mubr.msk.bf16.vlgmr.msra.gmra.mrb[8].mxu1 %vm318_vm0, %v865_v29 }
  0x33   :  { %399 = vmatprep.mubr.bf16.mxu0 %v866_v30  ;;  %803 = vmatprep.mubr.msk.bf16.mxu1 %vm318_vm0, %v868_v31 }
  0x3a   :  { %400 = vmatmul.mubr.bf16.gmra.mrb[12].mxu0 %v869_v32  ;;  %804 = vmatmul.mubr.msk.bf16.gmra.mrb[12].mxu1 %vm318_vm0, %v870_v33 }
  0x3b   :  { %407 = vmatprep.mubr.bf16.mxu0 %v871_v34  ;;  %807 = vmatprep.mubr.msk.bf16.mxu1 %vm318_vm0, %v873_v35 }
  0x42   :  { %408 = vmatmul.mubr.bf16.gmra.mrb[16].mxu0 %v874_v36  ;;  %808 = vmatmul.mubr.msk.bf16.gmra.mrb[16].mxu1 %vm318_vm0, %v875_v37 }
  0x43   :  { %415 = vmatprep.mubr.bf16.mxu0 %v876_v38  ;;  %811 = vmatprep.mubr.msk.bf16.mxu1 %vm318_vm0, %v878_v39 }
  0x4a   :  { %416 = vmatmul.mubr.bf16.gmra.mrb[20].mxu0 %v879_v40  ;;  %812 = vmatmul.mubr.msk.bf16.gmra.mrb[20].mxu1 %vm318_vm0, %v880_v41 }
  0xf5   :  { %v737_v42 = vpop.f32.mrb[0].mxu0  ;;  %v773_v43 = vpop.f32.mrb[0].mxu1 }
  0xf6   :  { %v738_v44 = vpop.f32.mrb[1].mxu0  ;;  %v774_v45 = vpop.f32.mrb[1].mxu1 }
  0xf7   :  { %v739_v46 = vadd.f32 %v738_v44, %v737_v42  ;;  %v740_v47 = vpop.f32.mrb[2].mxu0  ;;  %v1035_v48 = vadd.f32 %v774_v45, %v773_v43  ;;  %v776_v49 = vpop.f32.mrb[2].mxu1 }
  0xf8   :  { %v741_v50 = vpop.f32.mrb[3].mxu0  ;;  %v777_v51 = vpop.f32.mrb[3].mxu1 }
  0xf9   :  { %v742_v52 = vadd.f32 %v741_v50, %v740_v47  ;;  %v1037_v53 = vadd.f32 %v777_v51, %v776_v49  ;;  %v378_v6 = vadd.f32 %v739_v46, %v1046_v2 }
  0xfb   :  { %v381_v15 = vadd.f32 %v742_v52, %v1046_v2 }
  0xfd   :  { %v743_v54 = vpop.f32.mrb[4].mxu0  ;;  %v779_v55 = vpop.f32.mrb[4].mxu1 }
  0xfe   :  { %v744_v56 = vpop.f32.mrb[5].mxu0  ;;  %v780_v57 = vpop.f32.mrb[5].mxu1 }
  0xff   :  { %v745_v58 = vadd.f32 %v744_v56, %v743_v54  ;;  %v746_v59 = vpop.f32.mrb[6].mxu0  ;;  %v1039_v60 = vadd.f32 %v780_v57, %v779_v55  ;;  %v782_v61 = vpop.f32.mrb[6].mxu1 }
 0x100   :  { %v747_v62 = vpop.f32.mrb[7].mxu0  ;;  %v783_v63 = vpop.f32.mrb[7].mxu1 }
 0x101   :  { %v748_v0 = vadd.f32 %v747_v62, %v746_v59  ;;  %v1041_v1 = vadd.f32 %v783_v63, %v782_v61  ;;  %v386_v3 = vadd.f32 %v745_v58, %v1046_v2 }
 0x103   :  { %v389_v10 = vadd.f32 %v748_v0, %v1046_v2 }
 0x105   :  { %v749_v4 = vpop.f32.mrb[8].mxu0  ;;  %v801_v5 = vpop.f32.mrb[8].mxu1 }
 0x106   :  { %v483_v7 = vadd.f32 %v801_v5, %v386_v3  ;;  %v750_v8 = vpop.f32.mrb[9].mxu0  ;;  %v474_v9 = vpop.f32.mrb[9].mxu1 }
 0x107   :  { %v751_v11 = vadd.f32 %v750_v8, %v749_v4  ;;  %v475_v12 = vadd.f32 %v474_v9, %v378_v6  ;;  %v752_v13 = vpop.f32.mrb[10].mxu0  ;;  %v802_v14 = vpop.f32.mrb[10].mxu1  ;;  %v434_v9 = vadd.f32 %v1039_v60, %v1046_v2 }
 0x108   :  { %v539_v16 = vmax.f32 %v483_v7, 0.0  ;;  %v486_v17 = vadd.f32 %v802_v14, %v389_v10  ;;  %v753_v18 = vpop.f32.mrb[11].mxu0  ;;  %v477_v19 = vpop.f32.mrb[11].mxu1  ;;  %v426_v14 = vadd.f32 %v1035_v48, %v1046_v2 }
 0x109   :  { %v537_v20 = vmax.f32 %v475_v12, 0.0  ;;  %v754_v21 = vadd.f32 %v753_v18, %v752_v13  ;;  %v478_v22 = vadd.f32 %v477_v19, %v381_v15  ;;  %v394_v31 = vadd.f32 %v751_v11, %v1046_v2 }
 0x10a   :  { %v707_v23 = vpack.c.bf16 %v539_v16, %v539_v16  ;;  %v540_v24 = vmax.f32 %v486_v17, 0.0  ;;  %v437_v18 = vadd.f32 %v1041_v1, %v1046_v2 }
 0x10b   :  { %v705_v25 = vpack.c.bf16 %v537_v20, %v537_v20  ;;  %v538_v26 = vmax.f32 %v478_v22, 0.0  ;;  %v397_v38 = vadd.f32 %v754_v21, %v1046_v2 }
 0x10c   :  { %620 = vst.msk [vmem:[%s1135_s3 + $0x8] sm:$0xf] %vm617_vm1, %v707_v23  ;;  %v708_v27 = vpack.c.bf16 %v540_v24, %v540_v24 }
 0x10d   :  { %618 = vst.msk [vmem:[%s1135_s3] sm:$0xf] %vm617_vm1, %v705_v25  ;;  %v706_v28 = vpack.c.bf16 %v538_v26, %v538_v26  ;;  %v755_v29 = vpop.f32.mrb[12].mxu0  ;;  %v805_v30 = vpop.f32.mrb[12].mxu1 }
 0x10e   :  { %621 = vst.msk [vmem:[%s1135_s3 + $0xc] sm:$0xf] %vm617_vm1, %v708_v27  ;;  %v756_v32 = vpop.f32.mrb[13].mxu0  ;;  %v490_v33 = vpop.f32.mrb[13].mxu1  ;;  %v429_v27 = vadd.f32 %v1037_v53, %v1046_v2 }
 0x10f   :  { %619 = vst.msk [vmem:[%s1135_s3 + $0x4] sm:$0xf] %vm617_vm1, %v706_v28  ;;  %v757_v34 = vadd.f32 %v756_v32, %v755_v29  ;;  %v491_v35 = vadd.f32 %v490_v33, %v394_v31  ;;  %v758_v36 = vpop.f32.mrb[14].mxu0  ;;  %v806_v37 = vpop.f32.mrb[14].mxu1 }
 0x110   :  { %v759_v39 = vpop.f32.mrb[15].mxu0  ;;  %v493_v40 = vpop.f32.mrb[15].mxu1 }
 0x111   :  { %v402_v41 = vadd.f32 %v757_v34, %v1046_v2  ;;  %v541_v42 = vmax.f32 %v491_v35, 0.0  ;;  %v760_v43 = vadd.f32 %v759_v39, %v758_v36  ;;  %v494_v44 = vadd.f32 %v493_v40, %v397_v38 }
 0x113   :  { %v499_v45 = vadd.f32 %v805_v30, %v402_v41  ;;  %v709_v46 = vpack.c.bf16 %v541_v42, %v541_v42  ;;  %v405_v47 = vadd.f32 %v760_v43, %v1046_v2  ;;  %v542_v49 = vmax.f32 %v494_v44, 0.0 }
 0x115   :  { %v543_v50 = vmax.f32 %v499_v45, 0.0  ;;  %622 = vst.msk [vmem:[%s1135_s3 + $0x10] sm:$0xf] %vm617_vm1, %v709_v46  ;;  %v502_v51 = vadd.f32 %v806_v37, %v405_v47  ;;  %v710_v52 = vpack.c.bf16 %v542_v49, %v542_v49  ;;  %v761_v54 = vpop.f32.mrb[16].mxu0  ;;  %v809_v55 = vpop.f32.mrb[16].mxu1 }
 0x116   :  { %v762_v56 = vpop.f32.mrb[17].mxu0  ;;  %v506_v57 = vpop.f32.mrb[17].mxu1 }
 0x117   :  { %v711_v58 = vpack.c.bf16 %v543_v50, %v543_v50  ;;  %v544_v59 = vmax.f32 %v502_v51, 0.0  ;;  %623 = vst.msk [vmem:[%s1135_s3 + $0x14] sm:$0xf] %vm617_vm1, %v710_v52  ;;  %v763_v61 = vadd.f32 %v762_v56, %v761_v54  ;;  %v764_v62 = vpop.f32.mrb[18].mxu0  ;;  %v810_v63 = vpop.f32.mrb[18].mxu1 }
 0x118   :  { %v765_v0 = vpop.f32.mrb[19].mxu0  ;;  %v509_v3 = vpop.f32.mrb[19].mxu1 }
 0x119   :  { %624 = vst.msk [vmem:[%s1135_s3 + $0x18] sm:$0xf] %vm617_vm1, %v711_v58  ;;  %v712_v4 = vpack.c.bf16 %v544_v59, %v544_v59  ;;  %v410_v5 = vadd.f32 %v763_v61, %v1046_v2  ;;  %v766_v6 = vadd.f32 %v765_v0, %v764_v62 }
 0x11b   :  { %625 = vst.msk [vmem:[%s1135_s3 + $0x1c] sm:$0xf] %vm617_vm1, %v712_v4  ;;  %v507_v7 = vadd.f32 %v506_v57, %v410_v5  ;;  %v413_v8 = vadd.f32 %v766_v6, %v1046_v2 }
 0x11d   :  { %v545_v10 = vmax.f32 %v507_v7, 0.0  ;;  %v510_v11 = vadd.f32 %v509_v3, %v413_v8  ;;  %v767_v12 = vpop.f32.mrb[20].mxu0  ;;  %v813_v13 = vpop.f32.mrb[20].mxu1 }
 0x11e   :  { %v531_v15 = vadd.f32 %v813_v13, %v434_v9  ;;  %v768_v16 = vpop.f32.mrb[21].mxu0  ;;  %v522_v17 = vpop.f32.mrb[21].mxu1 }
 0x11f   :  { %v713_v19 = vpack.c.bf16 %v545_v10, %v545_v10  ;;  %v546_v20 = vmax.f32 %v510_v11, 0.0  ;;  %v769_v21 = vadd.f32 %v768_v16, %v767_v12  ;;  %v523_v22 = vadd.f32 %v522_v17, %v426_v14  ;;  %v770_v23 = vpop.f32.mrb[22].mxu0  ;;  %v814_v24 = vpop.f32.mrb[22].mxu1 }
 0x120   :  { %v551_v60 = vmax.f32 %v531_v15, 0.0  ;;  %v534_v25 = vadd.f32 %v814_v24, %v437_v18  ;;  %v771_v26 = vpop.f32.mrb[23].mxu0  ;;  %v525_v28 = vpop.f32.mrb[23].mxu1 }
 0x121   :  { %626 = vst.msk [vmem:[%s1135_s3 + $0x20] sm:$0xf] %vm617_vm1, %v713_v19  ;;  %v714_v48 = vpack.c.bf16 %v546_v20, %v546_v20  ;;  %v418_v1 = vadd.f32 %v769_v21, %v1046_v2  ;;  %v549_v29 = vmax.f32 %v523_v22, 0.0  ;;  %v772_v30 = vadd.f32 %v771_v26, %v770_v23 }
 0x122   :  { %v719_v31 = vpack.c.bf16 %v551_v60, %v551_v60  ;;  %v552_v32 = vmax.f32 %v534_v25, 0.0  ;;  %v526_v33 = vadd.f32 %v525_v28, %v429_v27 }
 0x123   :  { %627 = vst.msk [vmem:[%s1135_s3 + $0x24] sm:$0xf] %vm617_vm1, %v714_v48  ;;  %v515_v53 = vadd.f32 %v809_v55, %v418_v1  ;;  %v717_v34 = vpack.c.bf16 %v549_v29, %v549_v29  ;;  %v421_v35 = vadd.f32 %v772_v30, %v1046_v2 }
 0x124   :  { %632 = vst.msk [vmem:[%s1135_s3 + $0x38] sm:$0xf] %vm617_vm1, %v719_v31  ;;  %v720_v36 = vpack.c.bf16 %v552_v32, %v552_v32  ;;  %v550_v37 = vmax.f32 %v526_v33, 0.0 }
 0x125   :  { %v547_v38 = vmax.f32 %v515_v53, 0.0  ;;  %630 = vst.msk [vmem:[%s1135_s3 + $0x30] sm:$0xf] %vm617_vm1, %v717_v34  ;;  %v518_v39 = vadd.f32 %v810_v63, %v421_v35 }
 0x126   :  { %633 = vst.msk [vmem:[%s1135_s3 + $0x3c] sm:$0xf] %vm617_vm1, %v720_v36  ;;  %v718_v2 = vpack.c.bf16 %v550_v37, %v550_v37 }
 0x127   :  { %v715_v40 = vpack.c.bf16 %v547_v38, %v547_v38  ;;  %v548_v41 = vmax.f32 %v518_v39, 0.0 }
 0x128   :  { %631 = vst.msk [vmem:[%s1135_s3 + $0x34] sm:$0xf] %vm617_vm1, %v718_v2 }
 0x129   :  { %628 = vst.msk [vmem:[%s1135_s3 + $0x28] sm:$0xf] %vm617_vm1, %v715_v40  ;;  %v716_v42 = vpack.c.bf16 %v548_v41, %v548_v41 }
 0x12b   :  { %629 = vst.msk [vmem:[%s1135_s3 + $0x2c] sm:$0xf] %vm617_vm1, %v716_v42 }

// kernel: generator_forward.12
= control target key start
LH: loop header
LB: loop body
LE: loop exit
PB: predicated region body
PF: predicated region fallthrough
CT: control target
= control target key end

     0   :  { %v684_v0 = vmov 0   ;;  %vm188_vm0 = vcmask 130048   ;;  %vm382_vm1 = vcmask 261120   ;;  %s933_s1 = inlined_call_operand.vmem [shape: bf16[144,16], index: 1, kind: input, shape index: {}]   ;;  %s934_s0 = inlined_call_operand.vmem [shape: bf16[128,144], index: 0, kind: input, shape index: {}]   ;;  %s935_s4 = inlined_call_operand.vmem [shape: bf16[32,16], index: 4, kind: input, shape index: {}]   ;;  %s936_s3 = inlined_call_operand.vmem [shape: bf16[128,32], index: 3, kind: input, shape index: {}]   ;;  %s937_s2 = inlined_call_operand.vmem [shape: f32[1,16], index: 2, kind: input, shape index: {}]   ;;  %s938_s5 = inlined_call_operand.vmem [shape: f32[128,16], index: 5, kind: output, shape index: {}]  }
   0x1   :  { %213 = vmatprep.subr.bf16.mxu0 %v684_v0  ;;  %622 = vmatprep.subr.bf16.mxu1 %v684_v0  ;;  %v641_v1 = vld [vmem:[%s933_s1] sm:$0xff]   ;;  %v642_v2 = vld [vmem:[%s933_s1 + $0x8] sm:$0xff]   ;;  %v643_v3 = vld [vmem:[%s933_s1 + $0x10] sm:$0xff]  }
   0x2   :  { %214 = vmatpush1.bf16.msra.mxu0 %v641_v1  ;;  %631 = vmatpush1.bf16.msra.mxu1 %v641_v1  ;;  %v644_v4 = vld [vmem:[%s933_s1 + $0x18] sm:$0xff]   ;;  %v652_v5 = vld [vmem:[%s934_s0 + $0x4] ss:$8 sps:$4 sm:$0xff]   ;;  %v647_v9 = vld [vmem:[%s933_s1 + $0x30] sm:$0xff]  }
   0x3   :  { %215 = vmatprep.subr.bf16.mxu0 %v684_v0  ;;  %623 = vmatprep.subr.bf16.mxu1 %v684_v0  ;;  %v655_v6 = vld [vmem:[%s934_s0 + $0x64] ss:$8 sps:$4 sm:$0xff]   ;;  %v648_v10 = vld [vmem:[%s933_s1 + $0x38] sm:$0xff]   ;;  %v650_v13 = vld [vmem:[%s934_s0] ss:$8 sps:$4 sm:$0xff]  }
   0x4   :  { %566 = vmatprep.mubr.msk.bf16.mxu0 %vm188_vm0, %v652_v5  ;;  %572 = vmatprep.mubr.msk.bf16.mxu1 %vm188_vm0, %v655_v6  ;;  %v645_v7 = vld [vmem:[%s933_s1 + $0x20] sm:$0xff]   ;;  %v646_v8 = vld [vmem:[%s933_s1 + $0x28] sm:$0xff]   ;;  %v657_v15 = vld [vmem:[%s934_s0 + $0x14] ss:$8 sps:$4 sm:$0xff]  }
   0x5   :  { %v649_v11 = vld [vmem:[%s933_s1 + $0x40] sm:$0xff]   ;;  %v659_v16 = vld [vmem:[%s934_s0 + $0x74] ss:$8 sps:$4 sm:$0xff]   ;;  %v663_v17 = vld [vmem:[%s935_s4 + $0x8] sm:$0xff]  }
   0x6   :  { %216 = vmatpush1.bf16.msra.mxu0 %v642_v2  ;;  %632 = vmatpush1.bf16.msra.mxu1 %v642_v2  ;;  %v656_v12 = vld [vmem:[%s935_s4] sm:$0xff]   ;;  %v661_v18 = vld [vmem:[%s934_s0 + $0x10] ss:$8 sps:$4 sm:$0xff]   ;;  %v668_v23 = vld [vmem:[%s936_s3 + $0x8] sm:$0xff]  }
   0x7   :  { %217 = vmatprep.subr.bf16.mxu0 %v684_v0  ;;  %624 = vmatprep.subr.bf16.mxu1 %v684_v0  ;;  %v653_v14 = vld [vmem:[%s934_s0 + $0x60] ss:$8 sps:$4 sm:$0xff]   ;;  %v662_v19 = vld [vmem:[%s934_s0 + $0x70] ss:$8 sps:$4 sm:$0xff]   ;;  %v664_v20 = vld [vmem:[%s934_s0 + $0x24] ss:$8 sps:$4 sm:$0xff]  }
   0x8   :  { %v666_v21 = vld [vmem:[%s936_s3] sm:$0xff]   ;;  %v669_v24 = vld [vmem:[%s934_s0 + $0x34] ss:$8 sps:$4 sm:$0xff]   ;;  %v672_v26 = vld [vmem:[%s934_s0 + $0x30] ss:$8 sps:$4 sm:$0xff]  }
   0x9   :  { %v667_v22 = vld [vmem:[%s934_s0 + $0x20] ss:$8 sps:$4 sm:$0xff]   ;;  %v671_v25 = vld [vmem:[%s936_s3 + $0x10] sm:$0xff]   ;;  %v673_v27 = vld [vmem:[%s936_s3 + $0x18] sm:$0xff]  }
   0xa   :  { %218 = vmatpush1.bf16.msra.mxu0 %v643_v3  ;;  %633 = vmatpush1.bf16.msra.mxu1 %v643_v3  ;;  %v674_v28 = vld [vmem:[%s934_s0 + $0x44] ss:$8 sps:$4 sm:$0xff]   ;;  %v677_v30 = vld [vmem:[%s934_s0 + $0x40] ss:$8 sps:$4 sm:$0xff]   ;;  %v679_v32 = vld [vmem:[%s934_s0 + $0x54] ss:$8 sps:$4 sm:$0xff]  }
   0xb   :  { %219 = vmatprep.subr.bf16.mxu0 %v684_v0  ;;  %625 = vmatprep.subr.bf16.mxu1 %v684_v0  ;;  %v676_v29 = vld [vmem:[%s936_s3 + $0x20] sm:$0xff]   ;;  %v678_v31 = vld [vmem:[%s936_s3 + $0x28] sm:$0xff]   ;;  %v681_v33 = vld [vmem:[%s936_s3 + $0x30] sm:$0xff]  }
   0xc   :  { %v682_v34 = vld [vmem:[%s934_s0 + $0x50] ss:$8 sps:$4 sm:$0xff]   ;;  %v847_v52 = vld [vmem:[%s937_s2] ss:$0 sm:$0xff] }
   0xd   :  { %v683_v35 = vld [vmem:[%s936_s3 + $0x38] sm:$0xff]  }
   0xe   :  { %220 = vmatpush1.bf16.msra.mxu0 %v644_v4  ;;  %634 = vmatpush1.bf16.msra.mxu1 %v644_v4 }
   0xf   :  { %221 = vmatprep.subr.bf16.mxu0 %v684_v0  ;;  %626 = vmatprep.subr.bf16.mxu1 %v684_v0 }
  0x12   :  { %222 = vmatpush1.bf16.msra.mxu0 %v645_v7  ;;  %635 = vmatpush1.bf16.msra.mxu1 %v645_v7 }
  0x13   :  { %223 = vmatprep.subr.bf16.mxu0 %v684_v0  ;;  %627 = vmatprep.subr.bf16.mxu1 %v684_v0 }
  0x16   :  { %224 = vmatpush1.bf16.msra.mxu0 %v646_v8  ;;  %636 = vmatpush1.bf16.msra.mxu1 %v646_v8 }
  0x17   :  { %225 = vmatprep.subr.bf16.mxu0 %v684_v0  ;;  %628 = vmatprep.subr.bf16.mxu1 %v684_v0 }
  0x1a   :  { %226 = vmatpush1.bf16.msra.mxu0 %v647_v9  ;;  %637 = vmatpush1.bf16.msra.mxu1 %v647_v9 }
  0x1b   :  { %227 = vmatprep.subr.bf16.mxu0 %v684_v0  ;;  %629 = vmatprep.subr.bf16.mxu1 %v684_v0 }
  0x1e   :  { %228 = vmatpush1.bf16.msra.mxu0 %v648_v10  ;;  %638 = vmatpush1.bf16.msra.mxu1 %v648_v10 }
  0x1f   :  { %229 = vmatprep.subr.bf16.mxu0 %v684_v0  ;;  %630 = vmatprep.subr.bf16.mxu1 %v684_v0 }
  0x22   :  { %230 = vmatpush1.bf16.msra.mxu0 %v649_v11  ;;  %639 = vmatpush1.bf16.msra.mxu1 %v649_v11 }
  0x23   :  { %602 = vmatprep.subr.bf16.mxu1 %v656_v12 }
  0x25   :  { %246 = vmatmul.mubr.bf16.vlgmr.msra.gmra.mrb[0].mxu0 %v650_v13  ;;  %294 = vmatmul.mubr.bf16.vlgmr.msra.gmra.mrb[0].mxu1 %v653_v14 }
  0x26   :  { %603 = vmatpush3.bf16.msra.mxu1 %v656_v12  ;;  %567 = vmatprep.mubr.msk.bf16.mxu0 %vm188_vm0, %v657_v15 }
  0x27   :  { %573 = vmatprep.mubr.msk.bf16.mxu1 %vm188_vm0, %v659_v16  ;;  %604 = vmatprep.subr.bf16.mxu1 %v663_v17 }
  0x2a   :  { %605 = vmatpush3.bf16.msra.mxu1 %v663_v17 }
  0x2d   :  { %254 = vmatmul.mubr.bf16.gmra.mrb[4].mxu0 %v661_v18  ;;  %302 = vmatmul.mubr.bf16.gmra.mrb[4].mxu1 %v662_v19 }
  0x2e   :  { %568 = vmatprep.mubr.msk.bf16.mxu0 %vm188_vm0, %v664_v20  ;;  %606 = vmatprep.mubr.msk.bf16.mxu1 %vm382_vm1, %v666_v21 }
  0x35   :  { %262 = vmatmul.mubr.bf16.gmra.mrb[8].mxu0 %v667_v22  ;;  %607 = vmatmul.mubr.msk.bf16.vlgmr.msra.gmra.mrb[8].mxu1 %vm382_vm1, %v668_v23 }
  0x36   :  { %569 = vmatprep.mubr.msk.bf16.mxu0 %vm188_vm0, %v669_v24  ;;  %610 = vmatprep.mubr.msk.bf16.mxu1 %vm382_vm1, %v671_v25 }
  0x3d   :  { %270 = vmatmul.mubr.bf16.gmra.mrb[12].mxu0 %v672_v26  ;;  %611 = vmatmul.mubr.msk.bf16.gmra.mrb[12].mxu1 %vm382_vm1, %v673_v27 }
  0x3e   :  { %570 = vmatprep.mubr.msk.bf16.mxu0 %vm188_vm0, %v674_v28  ;;  %614 = vmatprep.mubr.msk.bf16.mxu1 %vm382_vm1, %v676_v29 }
  0x45   :  { %278 = vmatmul.mubr.bf16.gmra.mrb[16].mxu0 %v677_v30  ;;  %615 = vmatmul.mubr.msk.bf16.gmra.mrb[16].mxu1 %vm382_vm1, %v678_v31 }
  0x46   :  { %571 = vmatprep.mubr.msk.bf16.mxu0 %vm188_vm0, %v679_v32  ;;  %618 = vmatprep.mubr.msk.bf16.mxu1 %vm382_vm1, %v681_v33 }
  0x4d   :  { %286 = vmatmul.mubr.bf16.gmra.mrb[20].mxu0 %v682_v34  ;;  %619 = vmatmul.mubr.msk.bf16.gmra.mrb[20].mxu1 %vm382_vm1, %v683_v35 }
  0xf8   :  { %v247_v36 = vpop.f32.mrb[0].mxu0  ;;  %v836_v37 = vpop.f32.mrb[0].mxu1 }
  0xf9   :  { %v249_v38 = vpop.f32.mrb[1].mxu0  ;;  %v297_v39 = vpop.f32.mrb[1].mxu1  ;;  %v248_v54 = vadd.f32 %v847_v52, %v247_v36  ;;  %v296_v34 = vadd.f32 %v847_v52, %v836_v37 }
  0xfa   :  { %v250_v40 = vpop.f32.mrb[2].mxu0  ;;  %v838_v41 = vpop.f32.mrb[2].mxu1 }
  0xfb   :  { %v252_v42 = vpop.f32.mrb[3].mxu0  ;;  %v300_v43 = vpop.f32.mrb[3].mxu1  ;;  %v251_v61 = vadd.f32 %v847_v52, %v250_v40 }
 0x100   :  { %v255_v44 = vpop.f32.mrb[4].mxu0  ;;  %v840_v45 = vpop.f32.mrb[4].mxu1 }
 0x101   :  { %v257_v46 = vpop.f32.mrb[5].mxu0  ;;  %v305_v47 = vpop.f32.mrb[5].mxu1  ;;  %v256_v53 = vadd.f32 %v847_v52, %v255_v44  ;;  %v304_v33 = vadd.f32 %v847_v52, %v840_v45  ;;  %v299_v44 = vadd.f32 %v847_v52, %v838_v41 }
 0x102   :  { %v258_v48 = vpop.f32.mrb[6].mxu0  ;;  %v842_v49 = vpop.f32.mrb[6].mxu1 }
 0x103   :  { %v260_v50 = vpop.f32.mrb[7].mxu0  ;;  %v308_v51 = vpop.f32.mrb[7].mxu1  ;;  %v259_v57 = vadd.f32 %v847_v52, %v258_v48  ;;  %v307_v38 = vadd.f32 %v847_v52, %v842_v49 }
 0x108   :  { %v263_v55 = vpop.f32.mrb[8].mxu0  ;;  %v608_v56 = vpop.f32.mrb[8].mxu1 }
 0x109   :  { %v506_v58 = vadd.f32 %v608_v56, %v256_v53  ;;  %v265_v59 = vpop.f32.mrb[9].mxu0  ;;  %v441_v60 = vpop.f32.mrb[9].mxu1  ;;  %v264_v5 = vadd.f32 %v847_v52, %v263_v55 }
 0x10a   :  { %v504_v62 = vadd.f32 %v441_v60, %v248_v54  ;;  %v266_v63 = vpop.f32.mrb[10].mxu0  ;;  %v609_v0 = vpop.f32.mrb[10].mxu1 }
 0x10b   :  { %522 = vst.msk [vmem:[%s938_s5 + $0x10] sm:$0xff] %vm188_vm0, %v506_v58  ;;  %v507_v1 = vadd.f32 %v609_v0, %v259_v57  ;;  %v268_v2 = vpop.f32.mrb[11].mxu0  ;;  %v444_v3 = vpop.f32.mrb[11].mxu1  ;;  %v267_v11 = vadd.f32 %v847_v52, %v266_v63 }
 0x10c   :  { %520 = vst.msk [vmem:[%s938_s5] sm:$0xff] %vm188_vm0, %v504_v62  ;;  %v505_v4 = vadd.f32 %v444_v3, %v251_v61 }
 0x10d   :  { %523 = vst.msk [vmem:[%s938_s5 + $0x18] sm:$0xff] %vm188_vm0, %v507_v1 }
 0x10e   :  { %521 = vst.msk [vmem:[%s938_s5 + $0x8] sm:$0xff] %vm188_vm0, %v505_v4 }
 0x110   :  { %v271_v6 = vpop.f32.mrb[12].mxu0  ;;  %v612_v7 = vpop.f32.mrb[12].mxu1 }
 0x111   :  { %v272_v8 = vadd.f32 %v847_v52, %v271_v6  ;;  %v273_v9 = vpop.f32.mrb[13].mxu0  ;;  %v457_v10 = vpop.f32.mrb[13].mxu1 }
 0x112   :  { %v508_v12 = vadd.f32 %v457_v10, %v264_v5  ;;  %v274_v13 = vpop.f32.mrb[14].mxu0  ;;  %v613_v14 = vpop.f32.mrb[14].mxu1 }
 0x113   :  { %v510_v15 = vadd.f32 %v612_v7, %v272_v8  ;;  %v275_v16 = vadd.f32 %v847_v52, %v274_v13  ;;  %v276_v17 = vpop.f32.mrb[15].mxu0  ;;  %v460_v18 = vpop.f32.mrb[15].mxu1 }
 0x114   :  { %524 = vst.msk [vmem:[%s938_s5 + $0x20] sm:$0xff] %vm188_vm0, %v508_v12  ;;  %v509_v19 = vadd.f32 %v460_v18, %v267_v11 }
 0x115   :  { %526 = vst.msk [vmem:[%s938_s5 + $0x30] sm:$0xff] %vm188_vm0, %v510_v15  ;;  %v511_v20 = vadd.f32 %v613_v14, %v275_v16 }
 0x116   :  { %525 = vst.msk [vmem:[%s938_s5 + $0x28] sm:$0xff] %vm188_vm0, %v509_v19 }
 0x117   :  { %527 = vst.msk [vmem:[%s938_s5 + $0x38] sm:$0xff] %vm188_vm0, %v511_v20 }
 0x118   :  { %v279_v21 = vpop.f32.mrb[16].mxu0  ;;  %v616_v22 = vpop.f32.mrb[16].mxu1 }
 0x119   :  { %v280_v23 = vadd.f32 %v847_v52, %v279_v21  ;;  %v281_v24 = vpop.f32.mrb[17].mxu0  ;;  %v473_v25 = vpop.f32.mrb[17].mxu1 }
 0x11a   :  { %v282_v26 = vpop.f32.mrb[18].mxu0  ;;  %v617_v27 = vpop.f32.mrb[18].mxu1 }
 0x11b   :  { %v512_v28 = vadd.f32 %v473_v25, %v280_v23  ;;  %v283_v29 = vadd.f32 %v847_v52, %v282_v26  ;;  %v284_v30 = vpop.f32.mrb[19].mxu0  ;;  %v476_v31 = vpop.f32.mrb[19].mxu1 }
 0x11d   :  { %528 = vst.msk [vmem:[%s938_s5 + $0x40] sm:$0xff] %vm188_vm0, %v512_v28  ;;  %v513_v32 = vadd.f32 %v476_v31, %v283_v29 }
 0x11f   :  { %529 = vst.msk [vmem:[%s938_s5 + $0x48] sm:$0xff] %vm188_vm0, %v513_v32 }
 0x120   :  { %v287_v35 = vpop.f32.mrb[20].mxu0  ;;  %v620_v36 = vpop.f32.mrb[20].mxu1 }
 0x121   :  { %v288_v39 = vadd.f32 %v847_v52, %v287_v35  ;;  %v518_v40 = vadd.f32 %v620_v36, %v304_v33  ;;  %v289_v42 = vpop.f32.mrb[21].mxu0  ;;  %v489_v43 = vpop.f32.mrb[21].mxu1 }
 0x122   :  { %v516_v45 = vadd.f32 %v489_v43, %v296_v34  ;;  %v290_v46 = vpop.f32.mrb[22].mxu0  ;;  %v621_v47 = vpop.f32.mrb[22].mxu1 }
 0x123   :  { %v514_v48 = vadd.f32 %v616_v22, %v288_v39  ;;  %534 = vst.msk [vmem:[%s938_s5 + $0x70] sm:$0xff] %vm188_vm0, %v518_v40  ;;  %v291_v37 = vadd.f32 %v847_v52, %v290_v46  ;;  %v519_v49 = vadd.f32 %v621_v47, %v307_v38  ;;  %v292_v50 = vpop.f32.mrb[23].mxu0  ;;  %v492_v51 = vpop.f32.mrb[23].mxu1 }
 0x124   :  { %532 = vst.msk [vmem:[%s938_s5 + $0x60] sm:$0xff] %vm188_vm0, %v516_v45  ;;  %v517_v41 = vadd.f32 %v492_v51, %v299_v44 }
 0x125   :  { %530 = vst.msk [vmem:[%s938_s5 + $0x50] sm:$0xff] %vm188_vm0, %v514_v48  ;;  %v515_v53 = vadd.f32 %v617_v27, %v291_v37  ;;  %535 = vst.msk [vmem:[%s938_s5 + $0x78] sm:$0xff] %vm188_vm0, %v519_v49 }
 0x126   :  { %533 = vst.msk [vmem:[%s938_s5 + $0x68] sm:$0xff] %vm188_vm0, %v517_v41 }
 0x127   :  { %531 = vst.msk [vmem:[%s938_s5 + $0x58] sm:$0xff] %vm188_vm0, %v515_v53 }

// kernel: generator_forward.13
= control target key start
LH: loop header
LB: loop body
LE: loop exit
PB: predicated region body
PF: predicated region fallthrough
CT: control target
= control target key end

     0   :  { %v1579_v0 = vmov 0   ;;  %vm446_vm0 = vcmask 130048   ;;  %vm1152_vm1 = vcmask 125952   ;;  %s2176_s1 = inlined_call_operand.vmem [shape: bf16[144,16], index: 1, kind: input, shape index: {}]   ;;  %s2177_s0 = inlined_call_operand.vmem [shape: bf16[512,144], index: 0, kind: input, shape index: {}]   ;;  %s2178_s2 = inlined_call_operand.vmem [shape: f32[1,16], index: 2, kind: input, shape index: {}]   ;;  %s2179_s3 = inlined_call_operand.vmem [shape: bf16[512,16], index: 3, kind: output, shape index: {}]  }
   0x1   :  { %543 = vmatprep.subr.bf16.mxu0 %v1579_v0  ;;  %1455 = vmatprep.subr.bf16.mxu1 %v1579_v0  ;;  %v1474_v1 = vld [vmem:[%s2176_s1] sm:$0xff]   ;;  %v1475_v2 = vld [vmem:[%s2176_s1 + $0x8] sm:$0xff]   ;;  %v1476_v3 = vld [vmem:[%s2176_s1 + $0x10] sm:$0xff]  }
   0x2   :  { %544 = vmatpush1.bf16.msra.mxu0 %v1474_v1  ;;  %1464 = vmatpush1.bf16.msra.mxu1 %v1474_v1  ;;  %v1477_v4 = vld [vmem:[%s2176_s1 + $0x18] sm:$0xff]   ;;  %v1485_v5 = vld [vmem:[%s2177_s0 + $0x4] ss:$8 sps:$4 sm:$0xff]   ;;  %v1480_v9 = vld [vmem:[%s2176_s1 + $0x30] sm:$0xff]  }
   0x3   :  { %545 = vmatprep.subr.bf16.mxu0 %v1579_v0  ;;  %1456 = vmatprep.subr.bf16.mxu1 %v1579_v0  ;;  %v1488_v6 = vld [vmem:[%s2177_s0 + $0x104] ss:$8 sps:$4 sm:$0xff]   ;;  %v1481_v10 = vld [vmem:[%s2176_s1 + $0x38] sm:$0xff]   ;;  %v1483_v12 = vld [vmem:[%s2177_s0] ss:$8 sps:$4 sm:$0xff]  }
   0x4   :  { %1295 = vmatprep.mubr.msk.bf16.mxu0 %vm446_vm0, %v1485_v5  ;;  %1311 = vmatprep.mubr.msk.bf16.mxu1 %vm446_vm0, %v1488_v6  ;;  %v1478_v7 = vld [vmem:[%s2176_s1 + $0x20] sm:$0xff]   ;;  %v1479_v8 = vld [vmem:[%s2176_s1 + $0x28] sm:$0xff]   ;;  %v1489_v14 = vld [vmem:[%s2177_s0 + $0x14] ss:$8 sps:$4 sm:$0xff]  }
   0x5   :  { %v1482_v11 = vld [vmem:[%s2176_s1 + $0x40] sm:$0xff]   ;;  %v1491_v15 = vld [vmem:[%s2177_s0 + $0x114] ss:$8 sps:$4 sm:$0xff]   ;;  %v1493_v16 = vld [vmem:[%s2177_s0 + $0x10] ss:$8 sps:$4 sm:$0xff]  }
   0x6   :  { %546 = vmatpush1.bf16.msra.mxu0 %v1475_v2  ;;  %1465 = vmatpush1.bf16.msra.mxu1 %v1475_v2  ;;  %v1486_v13 = vld [vmem:[%s2177_s0 + $0x100] ss:$8 sps:$4 sm:$0xff]   ;;  %v1494_v17 = vld [vmem:[%s2177_s0 + $0x110] ss:$8 sps:$4 sm:$0xff]   ;;  %v1495_v18 = vld [vmem:[%s2177_s0 + $0x24] ss:$8 sps:$4 sm:$0xff]  }
   0x7   :  { %547 = vmatprep.subr.bf16.mxu0 %v1579_v0  ;;  %1457 = vmatprep.subr.bf16.mxu1 %v1579_v0  ;;  %v1497_v19 = vld [vmem:[%s2177_s0 + $0x124] ss:$8 sps:$4 sm:$0xff]   ;;  %v1499_v20 = vld [vmem:[%s2177_s0 + $0x20] ss:$8 sps:$4 sm:$0xff]   ;;  %v1501_v22 = vld [vmem:[%s2177_s0 + $0x34] ss:$8 sps:$4 sm:$0xff]  }
   0x8   :  { %v1500_v21 = vld [vmem:[%s2177_s0 + $0x120] ss:$8 sps:$4 sm:$0xff]   ;;  %v1503_v23 = vld [vmem:[%s2177_s0 + $0x134] ss:$8 sps:$4 sm:$0xff]   ;;  %v1505_v24 = vld [vmem:[%s2177_s0 + $0x30] ss:$8 sps:$4 sm:$0xff]  }
   0x9   :  { %v1506_v25 = vld [vmem:[%s2177_s0 + $0x130] ss:$8 sps:$4 sm:$0xff]   ;;  %v1507_v26 = vld [vmem:[%s2177_s0 + $0x44] ss:$8 sps:$4 sm:$0xff]   ;;  %v1511_v28 = vld [vmem:[%s2177_s0 + $0x40] ss:$8 sps:$4 sm:$0xff]  }
   0xa   :  { %548 = vmatpush1.bf16.msra.mxu0 %v1476_v3  ;;  %1466 = vmatpush1.bf16.msra.mxu1 %v1476_v3  ;;  %v1509_v27 = vld [vmem:[%s2177_s0 + $0x144] ss:$8 sps:$4 sm:$0xff]   ;;  %v1512_v29 = vld [vmem:[%s2177_s0 + $0x140] ss:$8 sps:$4 sm:$0xff]   ;;  %v1513_v30 = vld [vmem:[%s2177_s0 + $0x54] ss:$8 sps:$4 sm:$0xff]  }
   0xb   :  { %549 = vmatprep.subr.bf16.mxu0 %v1579_v0  ;;  %1458 = vmatprep.subr.bf16.mxu1 %v1579_v0  ;;  %v1515_v31 = vld [vmem:[%s2177_s0 + $0x154] ss:$8 sps:$4 sm:$0xff]   ;;  %v1517_v32 = vld [vmem:[%s2177_s0 + $0x50] ss:$8 sps:$4 sm:$0xff]   ;;  %v1519_v34 = vld [vmem:[%s2177_s0 + $0x64] ss:$8 sps:$4 sm:$0xff]  }
   0xc   :  { %v1518_v33 = vld [vmem:[%s2177_s0 + $0x150] ss:$8 sps:$4 sm:$0xff]   ;;  %v1521_v35 = vld [vmem:[%s2177_s0 + $0x164] ss:$8 sps:$4 sm:$0xff]   ;;  %v1523_v36 = vld [vmem:[%s2177_s0 + $0x60] ss:$8 sps:$4 sm:$0xff]  }
   0xd   :  { %v1524_v37 = vld [vmem:[%s2177_s0 + $0x160] ss:$8 sps:$4 sm:$0xff]   ;;  %v1525_v38 = vld [vmem:[%s2177_s0 + $0x74] ss:$8 sps:$4 sm:$0xff]   ;;  %v1529_v40 = vld [vmem:[%s2177_s0 + $0x70] ss:$8 sps:$4 sm:$0xff]  }
   0xe   :  { %550 = vmatpush1.bf16.msra.mxu0 %v1477_v4  ;;  %1467 = vmatpush1.bf16.msra.mxu1 %v1477_v4  ;;  %v1527_v39 = vld [vmem:[%s2177_s0 + $0x174] ss:$8 sps:$4 sm:$0xff]   ;;  %v1530_v41 = vld [vmem:[%s2177_s0 + $0x170] ss:$8 sps:$4 sm:$0xff]   ;;  %v1531_v42 = vld [vmem:[%s2177_s0 + $0x84] ss:$8 sps:$4 sm:$0xff]  }
   0xf   :  { %551 = vmatprep.subr.bf16.mxu0 %v1579_v0  ;;  %1459 = vmatprep.subr.bf16.mxu1 %v1579_v0  ;;  %v1533_v43 = vld [vmem:[%s2177_s0 + $0x184] ss:$8 sps:$4 sm:$0xff]   ;;  %v1535_v44 = vld [vmem:[%s2177_s0 + $0x80] ss:$8 sps:$4 sm:$0xff]   ;;  %v1537_v46 = vld [vmem:[%s2177_s0 + $0x94] ss:$8 sps:$4 sm:$0xff]  }
  0x10   :  { %v1536_v45 = vld [vmem:[%s2177_s0 + $0x180] ss:$8 sps:$4 sm:$0xff]   ;;  %v1539_v47 = vld [vmem:[%s2177_s0 + $0x194] ss:$8 sps:$4 sm:$0xff]   ;;  %v1541_v48 = vld [vmem:[%s2177_s0 + $0x90] ss:$8 sps:$4 sm:$0xff]  }
  0x11   :  { %v1542_v49 = vld [vmem:[%s2177_s0 + $0x190] ss:$8 sps:$4 sm:$0xff]   ;;  %v1543_v50 = vld [vmem:[%s2177_s0 + $0xa4] ss:$8 sps:$4 sm:$0xff]   ;;  %v1547_v52 = vld [vmem:[%s2177_s0 + $0xa0] ss:$8 sps:$4 sm:$0xff]  }
  0x12   :  { %552 = vmatpush1.bf16.msra.mxu0 %v1478_v7  ;;  %1468 = vmatpush1.bf16.msra.mxu1 %v1478_v7  ;;  %v1545_v51 = vld [vmem:[%s2177_s0 + $0x1a4] ss:$8 sps:$4 sm:$0xff]   ;;  %v1548_v53 = vld [vmem:[%s2177_s0 + $0x1a0] ss:$8 sps:$4 sm:$0xff]   ;;  %v1549_v54 = vld [vmem:[%s2177_s0 + $0xb4] ss:$8 sps:$4 sm:$0xff]  }
  0x13   :  { %553 = vmatprep.subr.bf16.mxu0 %v1579_v0  ;;  %1460 = vmatprep.subr.bf16.mxu1 %v1579_v0  ;;  %v1551_v55 = vld [vmem:[%s2177_s0 + $0x1b4] ss:$8 sps:$4 sm:$0xff]   ;;  %v1553_v56 = vld [vmem:[%s2177_s0 + $0xb0] ss:$8 sps:$4 sm:$0xff]   ;;  %v1555_v58 = vld [vmem:[%s2177_s0 + $0xc4] ss:$8 sps:$4 sm:$0xff]  }
  0x14   :  { %v1554_v57 = vld [vmem:[%s2177_s0 + $0x1b0] ss:$8 sps:$4 sm:$0xff]   ;;  %v1557_v59 = vld [vmem:[%s2177_s0 + $0x1c4] ss:$8 sps:$4 sm:$0xff]   ;;  %v1559_v60 = vld [vmem:[%s2177_s0 + $0xc0] ss:$8 sps:$4 sm:$0xff]  }
  0x15   :  { %v1560_v61 = vld [vmem:[%s2177_s0 + $0x1c0] ss:$8 sps:$4 sm:$0xff]   ;;  %v1561_v62 = vld [vmem:[%s2177_s0 + $0xd4] ss:$8 sps:$4 sm:$0xff]   ;;  %v1566_v1 = vld [vmem:[%s2177_s0 + $0x1d0] ss:$8 sps:$4 sm:$0xff]  }
  0x16   :  { %554 = vmatpush1.bf16.msra.mxu0 %v1479_v8  ;;  %1469 = vmatpush1.bf16.msra.mxu1 %v1479_v8  ;;  %v1563_v63 = vld [vmem:[%s2177_s0 + $0x1d4] ss:$8 sps:$4 sm:$0xff]   ;;  %v1567_v2 = vld [vmem:[%s2177_s0 + $0xe4] ss:$8 sps:$4 sm:$0xff]   ;;  %v1571_v4 = vld [vmem:[%s2177_s0 + $0xe0] ss:$8 sps:$4 sm:$0xff]  }
  0x17   :  { %555 = vmatprep.subr.bf16.mxu0 %v1579_v0  ;;  %1461 = vmatprep.subr.bf16.mxu1 %v1579_v0  ;;  %v1569_v3 = vld [vmem:[%s2177_s0 + $0x1e4] ss:$8 sps:$4 sm:$0xff]   ;;  %v1572_v5 = vld [vmem:[%s2177_s0 + $0x1e0] ss:$8 sps:$4 sm:$0xff]   ;;  %v1573_v6 = vld [vmem:[%s2177_s0 + $0xf4] ss:$8 sps:$4 sm:$0xff]  }
  0x18   :  { %v1575_v7 = vld [vmem:[%s2177_s0 + $0x1f4] ss:$8 sps:$4 sm:$0xff]   ;;  %v1577_v8 = vld [vmem:[%s2177_s0 + $0xf0] ss:$8 sps:$4 sm:$0xff]  }
  0x1a   :  { %556 = vmatpush1.bf16.msra.mxu0 %v1480_v9  ;;  %1470 = vmatpush1.bf16.msra.mxu1 %v1480_v9  ;;  %v1578_v9 = vld [vmem:[%s2177_s0 + $0x1f0] ss:$8 sps:$4 sm:$0xff]  }
  0x1b   :  { %557 = vmatprep.subr.bf16.mxu0 %v1579_v0  ;;  %1462 = vmatprep.subr.bf16.mxu1 %v1579_v0 }
  0x1e   :  { %558 = vmatpush1.bf16.msra.mxu0 %v1481_v10  ;;  %1471 = vmatpush1.bf16.msra.mxu1 %v1481_v10  ;;  %v1854_v10 = vld [vmem:[%s2178_s2] ss:$0 sm:$0xff] }
  0x1f   :  { %559 = vmatprep.subr.bf16.mxu0 %v1579_v0  ;;  %1463 = vmatprep.subr.bf16.mxu1 %v1579_v0  ;;  %v1565_v0 = vld [vmem:[%s2177_s0 + $0xd0] ss:$8 sps:$4 sm:$0xff]  }
  0x22   :  { %560 = vmatpush1.bf16.msra.mxu0 %v1482_v11  ;;  %1472 = vmatpush1.bf16.msra.mxu1 %v1482_v11 }
  0x25   :  { %576 = vmatmul.mubr.bf16.vlgmr.msra.gmra.mrb[0].mxu0 %v1483_v12  ;;  %704 = vmatmul.mubr.bf16.vlgmr.msra.gmra.mrb[0].mxu1 %v1486_v13 }
  0x26   :  { %1296 = vmatprep.mubr.msk.bf16.mxu0 %vm446_vm0, %v1489_v14  ;;  %1312 = vmatprep.mubr.msk.bf16.mxu1 %vm446_vm0, %v1491_v15 }
  0x2d   :  { %584 = vmatmul.mubr.bf16.gmra.mrb[4].mxu0 %v1493_v16  ;;  %712 = vmatmul.mubr.bf16.gmra.mrb[4].mxu1 %v1494_v17 }
  0x2e   :  { %1297 = vmatprep.mubr.msk.bf16.mxu0 %vm446_vm0, %v1495_v18  ;;  %1313 = vmatprep.mubr.msk.bf16.mxu1 %vm446_vm0, %v1497_v19 }
  0x35   :  { %592 = vmatmul.mubr.bf16.gmra.mrb[8].mxu0 %v1499_v20  ;;  %720 = vmatmul.mubr.bf16.gmra.mrb[8].mxu1 %v1500_v21 }
  0x36   :  { %1298 = vmatprep.mubr.msk.bf16.mxu0 %vm446_vm0, %v1501_v22  ;;  %1314 = vmatprep.mubr.msk.bf16.mxu1 %vm446_vm0, %v1503_v23 }
  0x3d   :  { %600 = vmatmul.mubr.bf16.gmra.mrb[12].mxu0 %v1505_v24  ;;  %728 = vmatmul.mubr.bf16.gmra.mrb[12].mxu1 %v1506_v25 }
  0x3e   :  { %1299 = vmatprep.mubr.msk.bf16.mxu0 %vm446_vm0, %v1507_v26  ;;  %1315 = vmatprep.mubr.msk.bf16.mxu1 %vm446_vm0, %v1509_v27 }
  0x45   :  { %608 = vmatmul.mubr.bf16.gmra.mrb[16].mxu0 %v1511_v28  ;;  %736 = vmatmul.mubr.bf16.gmra.mrb[16].mxu1 %v1512_v29 }
  0x46   :  { %1300 = vmatprep.mubr.msk.bf16.mxu0 %vm446_vm0, %v1513_v30  ;;  %1316 = vmatprep.mubr.msk.bf16.mxu1 %vm446_vm0, %v1515_v31 }
  0x4d   :  { %616 = vmatmul.mubr.bf16.gmra.mrb[20].mxu0 %v1517_v32  ;;  %744 = vmatmul.mubr.bf16.gmra.mrb[20].mxu1 %v1518_v33 }
  0x4e   :  { %1301 = vmatprep.mubr.msk.bf16.mxu0 %vm446_vm0, %v1519_v34  ;;  %1317 = vmatprep.mubr.msk.bf16.mxu1 %vm446_vm0, %v1521_v35 }
  0x55   :  { %624 = vmatmul.mubr.bf16.gmra.mrb[24].mxu0 %v1523_v36  ;;  %752 = vmatmul.mubr.bf16.gmra.mrb[24].mxu1 %v1524_v37 }
  0x56   :  { %1302 = vmatprep.mubr.msk.bf16.mxu0 %vm446_vm0, %v1525_v38  ;;  %1318 = vmatprep.mubr.msk.bf16.mxu1 %vm446_vm0, %v1527_v39 }
  0x5d   :  { %632 = vmatmul.mubr.bf16.gmra.mrb[28].mxu0 %v1529_v40  ;;  %760 = vmatmul.mubr.bf16.gmra.mrb[28].mxu1 %v1530_v41 }
  0x5e   :  { %1303 = vmatprep.mubr.msk.bf16.mxu0 %vm446_vm0, %v1531_v42  ;;  %1319 = vmatprep.mubr.msk.bf16.mxu1 %vm446_vm0, %v1533_v43 }
  0x65   :  { %640 = vmatmul.mubr.bf16.gmra.mrb[32].mxu0 %v1535_v44  ;;  %768 = vmatmul.mubr.bf16.gmra.mrb[32].mxu1 %v1536_v45 }
  0x66   :  { %1304 = vmatprep.mubr.msk.bf16.mxu0 %vm446_vm0, %v1537_v46  ;;  %1320 = vmatprep.mubr.msk.bf16.mxu1 %vm446_vm0, %v1539_v47 }
  0x6d   :  { %648 = vmatmul.mubr.bf16.gmra.mrb[36].mxu0 %v1541_v48  ;;  %776 = vmatmul.mubr.bf16.gmra.mrb[36].mxu1 %v1542_v49 }
  0x6e   :  { %1305 = vmatprep.mubr.msk.bf16.mxu0 %vm446_vm0, %v1543_v50  ;;  %1321 = vmatprep.mubr.msk.bf16.mxu1 %vm446_vm0, %v1545_v51 }
  0x75   :  { %656 = vmatmul.mubr.bf16.gmra.mrb[40].mxu0 %v1547_v52  ;;  %784 = vmatmul.mubr.bf16.gmra.mrb[40].mxu1 %v1548_v53 }
  0x76   :  { %1306 = vmatprep.mubr.msk.bf16.mxu0 %vm446_vm0, %v1549_v54  ;;  %1322 = vmatprep.mubr.msk.bf16.mxu1 %vm446_vm0, %v1551_v55 }
  0x7d   :  { %664 = vmatmul.mubr.bf16.gmra.mrb[44].mxu0 %v1553_v56  ;;  %792 = vmatmul.mubr.bf16.gmra.mrb[44].mxu1 %v1554_v57 }
  0x7e   :  { %1307 = vmatprep.mubr.msk.bf16.mxu0 %vm446_vm0, %v1555_v58  ;;  %1323 = vmatprep.mubr.msk.bf16.mxu1 %vm446_vm0, %v1557_v59 }
  0x85   :  { %672 = vmatmul.mubr.bf16.gmra.mrb[48].mxu0 %v1559_v60  ;;  %800 = vmatmul.mubr.bf16.gmra.mrb[48].mxu1 %v1560_v61 }
  0x86   :  { %1308 = vmatprep.mubr.msk.bf16.mxu0 %vm446_vm0, %v1561_v62  ;;  %1324 = vmatprep.mubr.msk.bf16.mxu1 %vm446_vm0, %v1563_v63 }
  0x8d   :  { %680 = vmatmul.mubr.bf16.gmra.mrb[52].mxu0 %v1565_v0  ;;  %808 = vmatmul.mubr.bf16.gmra.mrb[52].mxu1 %v1566_v1 }
  0x8e   :  { %1309 = vmatprep.mubr.msk.bf16.mxu0 %vm446_vm0, %v1567_v2  ;;  %1325 = vmatprep.mubr.msk.bf16.mxu1 %vm446_vm0, %v1569_v3 }
  0x95   :  { %688 = vmatmul.mubr.bf16.gmra.mrb[56].mxu0 %v1571_v4  ;;  %816 = vmatmul.mubr.bf16.gmra.mrb[56].mxu1 %v1572_v5 }
  0x96   :  { %1310 = vmatprep.mubr.msk.bf16.mxu0 %vm446_vm0, %v1573_v6  ;;  %1326 = vmatprep.mubr.msk.bf16.mxu1 %vm446_vm0, %v1575_v7 }
  0x9d   :  { %696 = vmatmul.mubr.bf16.gmra.mrb[60].mxu0 %v1577_v8  ;;  %824 = vmatmul.mubr.bf16.gmra.mrb[60].mxu1 %v1578_v9 }
  0xf8   :  { %v577_v11 = vpop.f32.mrb[0].mxu0  ;;  %v705_v12 = vpop.f32.mrb[0].mxu1 }
  0xf9   :  { %v578_v13 = vadd.f32 %v1854_v10, %v577_v11  ;;  %v706_v14 = vadd.f32 %v1854_v10, %v705_v12  ;;  %v579_v15 = vpop.f32.mrb[1].mxu0  ;;  %v707_v16 = vpop.f32.mrb[1].mxu1 }
  0xfa   :  { %v580_v17 = vpop.f32.mrb[2].mxu0  ;;  %v708_v18 = vpop.f32.mrb[2].mxu1 }
  0xfb   :  { %v832_v19 = vmax.f32 %v578_v13, 0.0  ;;  %v864_v20 = vmax.f32 %v706_v14, 0.0  ;;  %v581_v21 = vadd.f32 %v1854_v10, %v580_v17  ;;  %v709_v22 = vadd.f32 %v1854_v10, %v708_v18  ;;  %v582_v23 = vpop.f32.mrb[3].mxu0  ;;  %v710_v24 = vpop.f32.mrb[3].mxu1 }
  0xfd   :  { %v1391_v25 = vpack.c.bf16 %v832_v19, %v832_v19  ;;  %v1423_v26 = vpack.c.bf16 %v864_v20, %v864_v20  ;;  %v833_v27 = vmax.f32 %v581_v21, 0.0  ;;  %v865_v28 = vmax.f32 %v709_v22, 0.0 }
  0xff   :  { %1153 = vst.msk [vmem:[%s2179_s3] sm:$0xf] %vm1152_vm1, %v1391_v25  ;;  %1185 = vst.msk [vmem:[%s2179_s3 + $0x80] sm:$0xf] %vm1152_vm1, %v1423_v26  ;;  %v1392_v29 = vpack.c.bf16 %v833_v27, %v833_v27  ;;  %v1424_v30 = vpack.c.bf16 %v865_v28, %v865_v28 }
 0x100   :  { %v585_v31 = vpop.f32.mrb[4].mxu0  ;;  %v713_v32 = vpop.f32.mrb[4].mxu1 }
 0x101   :  { %1154 = vst.msk [vmem:[%s2179_s3 + $0x4] sm:$0xf] %vm1152_vm1, %v1392_v29  ;;  %1186 = vst.msk [vmem:[%s2179_s3 + $0x84] sm:$0xf] %vm1152_vm1, %v1424_v30  ;;  %v586_v33 = vadd.f32 %v1854_v10, %v585_v31  ;;  %v714_v34 = vadd.f32 %v1854_v10, %v713_v32  ;;  %v587_v35 = vpop.f32.mrb[5].mxu0  ;;  %v715_v36 = vpop.f32.mrb[5].mxu1 }
 0x102   :  { %v588_v37 = vpop.f32.mrb[6].mxu0  ;;  %v716_v38 = vpop.f32.mrb[6].mxu1 }
 0x103   :  { %v834_v39 = vmax.f32 %v586_v33, 0.0  ;;  %v866_v40 = vmax.f32 %v714_v34, 0.0  ;;  %v589_v41 = vadd.f32 %v1854_v10, %v588_v37  ;;  %v717_v42 = vadd.f32 %v1854_v10, %v716_v38  ;;  %v590_v43 = vpop.f32.mrb[7].mxu0  ;;  %v718_v44 = vpop.f32.mrb[7].mxu1 }
 0x105   :  { %v1393_v45 = vpack.c.bf16 %v834_v39, %v834_v39  ;;  %v1425_v46 = vpack.c.bf16 %v866_v40, %v866_v40  ;;  %v835_v47 = vmax.f32 %v589_v41, 0.0  ;;  %v867_v48 = vmax.f32 %v717_v42, 0.0 }
 0x107   :  { %1155 = vst.msk [vmem:[%s2179_s3 + $0x8] sm:$0xf] %vm1152_vm1, %v1393_v45  ;;  %1187 = vst.msk [vmem:[%s2179_s3 + $0x88] sm:$0xf] %vm1152_vm1, %v1425_v46  ;;  %v1394_v49 = vpack.c.bf16 %v835_v47, %v835_v47  ;;  %v1426_v50 = vpack.c.bf16 %v867_v48, %v867_v48 }
 0x108   :  { %v593_v51 = vpop.f32.mrb[8].mxu0  ;;  %v721_v52 = vpop.f32.mrb[8].mxu1 }
 0x109   :  { %1156 = vst.msk [vmem:[%s2179_s3 + $0xc] sm:$0xf] %vm1152_vm1, %v1394_v49  ;;  %1188 = vst.msk [vmem:[%s2179_s3 + $0x8c] sm:$0xf] %vm1152_vm1, %v1426_v50  ;;  %v594_v53 = vadd.f32 %v1854_v10, %v593_v51  ;;  %v722_v54 = vadd.f32 %v1854_v10, %v721_v52  ;;  %v595_v55 = vpop.f32.mrb[9].mxu0  ;;  %v723_v56 = vpop.f32.mrb[9].mxu1 }
 0x10a   :  { %v596_v57 = vpop.f32.mrb[10].mxu0  ;;  %v724_v58 = vpop.f32.mrb[10].mxu1 }
 0x10b   :  { %v836_v59 = vmax.f32 %v594_v53, 0.0  ;;  %v868_v60 = vmax.f32 %v722_v54, 0.0  ;;  %v597_v61 = vadd.f32 %v1854_v10, %v596_v57  ;;  %v725_v62 = vadd.f32 %v1854_v10, %v724_v58  ;;  %v598_v63 = vpop.f32.mrb[11].mxu0  ;;  %v726_v0 = vpop.f32.mrb[11].mxu1 }
 0x10d   :  { %v1395_v1 = vpack.c.bf16 %v836_v59, %v836_v59  ;;  %v1427_v2 = vpack.c.bf16 %v868_v60, %v868_v60  ;;  %v837_v3 = vmax.f32 %v597_v61, 0.0  ;;  %v869_v4 = vmax.f32 %v725_v62, 0.0 }
 0x10f   :  { %1157 = vst.msk [vmem:[%s2179_s3 + $0x10] sm:$0xf] %vm1152_vm1, %v1395_v1  ;;  %1189 = vst.msk [vmem:[%s2179_s3 + $0x90] sm:$0xf] %vm1152_vm1, %v1427_v2  ;;  %v1396_v5 = vpack.c.bf16 %v837_v3, %v837_v3  ;;  %v1428_v6 = vpack.c.bf16 %v869_v4, %v869_v4 }
 0x110   :  { %v601_v7 = vpop.f32.mrb[12].mxu0  ;;  %v729_v8 = vpop.f32.mrb[12].mxu1 }
 0x111   :  { %1158 = vst.msk [vmem:[%s2179_s3 + $0x14] sm:$0xf] %vm1152_vm1, %v1396_v5  ;;  %1190 = vst.msk [vmem:[%s2179_s3 + $0x94] sm:$0xf] %vm1152_vm1, %v1428_v6  ;;  %v602_v9 = vadd.f32 %v1854_v10, %v601_v7  ;;  %v730_v11 = vadd.f32 %v1854_v10, %v729_v8  ;;  %v603_v12 = vpop.f32.mrb[13].mxu0  ;;  %v731_v13 = vpop.f32.mrb[13].mxu1 }
 0x112   :  { %v604_v14 = vpop.f32.mrb[14].mxu0  ;;  %v732_v15 = vpop.f32.mrb[14].mxu1 }
 0x113   :  { %v838_v16 = vmax.f32 %v602_v9, 0.0  ;;  %v870_v17 = vmax.f32 %v730_v11, 0.0  ;;  %v605_v18 = vadd.f32 %v1854_v10, %v604_v14  ;;  %v733_v19 = vadd.f32 %v1854_v10, %v732_v15  ;;  %v606_v20 = vpop.f32.mrb[15].mxu0  ;;  %v734_v21 = vpop.f32.mrb[15].mxu1 }
 0x115   :  { %v1397_v22 = vpack.c.bf16 %v838_v16, %v838_v16  ;;  %v1429_v23 = vpack.c.bf16 %v870_v17, %v870_v17  ;;  %v839_v24 = vmax.f32 %v605_v18, 0.0  ;;  %v871_v25 = vmax.f32 %v733_v19, 0.0 }
 0x117   :  { %1159 = vst.msk [vmem:[%s2179_s3 + $0x18] sm:$0xf] %vm1152_vm1, %v1397_v22  ;;  %1191 = vst.msk [vmem:[%s2179_s3 + $0x98] sm:$0xf] %vm1152_vm1, %v1429_v23  ;;  %v1398_v26 = vpack.c.bf16 %v839_v24, %v839_v24  ;;  %v1430_v27 = vpack.c.bf16 %v871_v25, %v871_v25 }
 0x118   :  { %v609_v28 = vpop.f32.mrb[16].mxu0  ;;  %v737_v29 = vpop.f32.mrb[16].mxu1 }
 0x119   :  { %1160 = vst.msk [vmem:[%s2179_s3 + $0x1c] sm:$0xf] %vm1152_vm1, %v1398_v26  ;;  %1192 = vst.msk [vmem:[%s2179_s3 + $0x9c] sm:$0xf] %vm1152_vm1, %v1430_v27  ;;  %v610_v30 = vadd.f32 %v1854_v10, %v609_v28  ;;  %v738_v31 = vadd.f32 %v1854_v10, %v737_v29  ;;  %v611_v32 = vpop.f32.mrb[17].mxu0  ;;  %v739_v33 = vpop.f32.mrb[17].mxu1 }
 0x11a   :  { %v612_v34 = vpop.f32.mrb[18].mxu0  ;;  %v740_v35 = vpop.f32.mrb[18].mxu1 }
 0x11b   :  { %v840_v36 = vmax.f32 %v610_v30, 0.0  ;;  %v872_v37 = vmax.f32 %v738_v31, 0.0  ;;  %v613_v38 = vadd.f32 %v1854_v10, %v612_v34  ;;  %v741_v39 = vadd.f32 %v1854_v10, %v740_v35  ;;  %v614_v40 = vpop.f32.mrb[19].mxu0  ;;  %v742_v41 = vpop.f32.mrb[19].mxu1 }
 0x11d   :  { %v1399_v42 = vpack.c.bf16 %v840_v36, %v840_v36  ;;  %v1431_v43 = vpack.c.bf16 %v872_v37, %v872_v37  ;;  %v841_v44 = vmax.f32 %v613_v38, 0.0  ;;  %v873_v45 = vmax.f32 %v741_v39, 0.0 }
 0x11f   :  { %1161 = vst.msk [vmem:[%s2179_s3 + $0x20] sm:$0xf] %vm1152_vm1, %v1399_v42  ;;  %1193 = vst.msk [vmem:[%s2179_s3 + $0xa0] sm:$0xf] %vm1152_vm1, %v1431_v43  ;;  %v1400_v46 = vpack.c.bf16 %v841_v44, %v841_v44  ;;  %v1432_v47 = vpack.c.bf16 %v873_v45, %v873_v45 }
 0x120   :  { %v617_v48 = vpop.f32.mrb[20].mxu0  ;;  %v745_v49 = vpop.f32.mrb[20].mxu1 }
 0x121   :  { %1162 = vst.msk [vmem:[%s2179_s3 + $0x24] sm:$0xf] %vm1152_vm1, %v1400_v46  ;;  %1194 = vst.msk [vmem:[%s2179_s3 + $0xa4] sm:$0xf] %vm1152_vm1, %v1432_v47  ;;  %v618_v50 = vadd.f32 %v1854_v10, %v617_v48  ;;  %v746_v51 = vadd.f32 %v1854_v10, %v745_v49  ;;  %v619_v52 = vpop.f32.mrb[21].mxu0  ;;  %v747_v53 = vpop.f32.mrb[21].mxu1 }
 0x122   :  { %v620_v54 = vpop.f32.mrb[22].mxu0  ;;  %v748_v55 = vpop.f32.mrb[22].mxu1 }
 0x123   :  { %v842_v56 = vmax.f32 %v618_v50, 0.0  ;;  %v874_v57 = vmax.f32 %v746_v51, 0.0  ;;  %v621_v58 = vadd.f32 %v1854_v10, %v620_v54  ;;  %v749_v59 = vadd.f32 %v1854_v10, %v748_v55  ;;  %v622_v60 = vpop.f32.mrb[23].mxu0  ;;  %v750_v61 = vpop.f32.mrb[23].mxu1 }
 0x125   :  { %v1401_v62 = vpack.c.bf16 %v842_v56, %v842_v56  ;;  %v1433_v63 = vpack.c.bf16 %v874_v57, %v874_v57  ;;  %v843_v0 = vmax.f32 %v621_v58, 0.0  ;;  %v875_v1 = vmax.f32 %v749_v59, 0.0 }
 0x127   :  { %1163 = vst.msk [vmem:[%s2179_s3 + $0x28] sm:$0xf] %vm1152_vm1, %v1401_v62  ;;  %1195 = vst.msk [vmem:[%s2179_s3 + $0xa8] sm:$0xf] %vm1152_vm1, %v1433_v63  ;;  %v1402_v2 = vpack.c.bf16 %v843_v0, %v843_v0  ;;  %v1434_v3 = vpack.c.bf16 %v875_v1, %v875_v1 }
 0x128   :  { %v625_v4 = vpop.f32.mrb[24].mxu0  ;;  %v753_v5 = vpop.f32.mrb[24].mxu1 }
 0x129   :  { %1164 = vst.msk [vmem:[%s2179_s3 + $0x2c] sm:$0xf] %vm1152_vm1, %v1402_v2  ;;  %1196 = vst.msk [vmem:[%s2179_s3 + $0xac] sm:$0xf] %vm1152_vm1, %v1434_v3  ;;  %v626_v6 = vadd.f32 %v1854_v10, %v625_v4  ;;  %v754_v7 = vadd.f32 %v1854_v10, %v753_v5  ;;  %v627_v8 = vpop.f32.mrb[25].mxu0  ;;  %v755_v9 = vpop.f32.mrb[25].mxu1 }
 0x12a   :  { %v628_v11 = vpop.f32.mrb[26].mxu0  ;;  %v756_v12 = vpop.f32.mrb[26].mxu1 }
 0x12b   :  { %v844_v13 = vmax.f32 %v626_v6, 0.0  ;;  %v876_v14 = vmax.f32 %v754_v7, 0.0  ;;  %v629_v15 = vadd.f32 %v1854_v10, %v628_v11  ;;  %v757_v16 = vadd.f32 %v1854_v10, %v756_v12  ;;  %v630_v17 = vpop.f32.mrb[27].mxu0  ;;  %v758_v18 = vpop.f32.mrb[27].mxu1 }
 0x12d   :  { %v1403_v19 = vpack.c.bf16 %v844_v13, %v844_v13  ;;  %v1435_v20 = vpack.c.bf16 %v876_v14, %v876_v14  ;;  %v845_v21 = vmax.f32 %v629_v15, 0.0  ;;  %v877_v22 = vmax.f32 %v757_v16, 0.0 }
 0x12f   :  { %1165 = vst.msk [vmem:[%s2179_s3 + $0x30] sm:$0xf] %vm1152_vm1, %v1403_v19  ;;  %1197 = vst.msk [vmem:[%s2179_s3 + $0xb0] sm:$0xf] %vm1152_vm1, %v1435_v20  ;;  %v1404_v23 = vpack.c.bf16 %v845_v21, %v845_v21  ;;  %v1436_v24 = vpack.c.bf16 %v877_v22, %v877_v22 }
 0x130   :  { %v633_v25 = vpop.f32.mrb[28].mxu0  ;;  %v761_v26 = vpop.f32.mrb[28].mxu1 }
 0x131   :  { %1166 = vst.msk [vmem:[%s2179_s3 + $0x34] sm:$0xf] %vm1152_vm1, %v1404_v23  ;;  %1198 = vst.msk [vmem:[%s2179_s3 + $0xb4] sm:$0xf] %vm1152_vm1, %v1436_v24  ;;  %v634_v27 = vadd.f32 %v1854_v10, %v633_v25  ;;  %v762_v28 = vadd.f32 %v1854_v10, %v761_v26  ;;  %v635_v29 = vpop.f32.mrb[29].mxu0  ;;  %v763_v30 = vpop.f32.mrb[29].mxu1 }
 0x132   :  { %v636_v31 = vpop.f32.mrb[30].mxu0  ;;  %v764_v32 = vpop.f32.mrb[30].mxu1 }
 0x133   :  { %v846_v33 = vmax.f32 %v634_v27, 0.0  ;;  %v878_v34 = vmax.f32 %v762_v28, 0.0  ;;  %v637_v35 = vadd.f32 %v1854_v10, %v636_v31  ;;  %v765_v36 = vadd.f32 %v1854_v10, %v764_v32  ;;  %v638_v37 = vpop.f32.mrb[31].mxu0  ;;  %v766_v38 = vpop.f32.mrb[31].mxu1 }
 0x135   :  { %v1405_v39 = vpack.c.bf16 %v846_v33, %v846_v33  ;;  %v1437_v40 = vpack.c.bf16 %v878_v34, %v878_v34  ;;  %v847_v41 = vmax.f32 %v637_v35, 0.0  ;;  %v879_v42 = vmax.f32 %v765_v36, 0.0 }
 0x137   :  { %1167 = vst.msk [vmem:[%s2179_s3 + $0x38] sm:$0xf] %vm1152_vm1, %v1405_v39  ;;  %1199 = vst.msk [vmem:[%s2179_s3 + $0xb8] sm:$0xf] %vm1152_vm1, %v1437_v40  ;;  %v1406_v43 = vpack.c.bf16 %v847_v41, %v847_v41  ;;  %v1438_v44 = vpack.c.bf16 %v879_v42, %v879_v42 }
 0x138   :  { %v641_v45 = vpop.f32.mrb[32].mxu0  ;;  %v769_v46 = vpop.f32.mrb[32].mxu1 }
 0x139   :  { %1168 = vst.msk [vmem:[%s2179_s3 + $0x3c] sm:$0xf] %vm1152_vm1, %v1406_v43  ;;  %1200 = vst.msk [vmem:[%s2179_s3 + $0xbc] sm:$0xf] %vm1152_vm1, %v1438_v44  ;;  %v642_v47 = vadd.f32 %v1854_v10, %v641_v45  ;;  %v770_v48 = vadd.f32 %v1854_v10, %v769_v46  ;;  %v643_v49 = vpop.f32.mrb[33].mxu0  ;;  %v771_v50 = vpop.f32.mrb[33].mxu1 }
 0x13a   :  { %v644_v51 = vpop.f32.mrb[34].mxu0  ;;  %v772_v52 = vpop.f32.mrb[34].mxu1 }
 0x13b   :  { %v848_v53 = vmax.f32 %v642_v47, 0.0  ;;  %v880_v54 = vmax.f32 %v770_v48, 0.0  ;;  %v645_v55 = vadd.f32 %v1854_v10, %v644_v51  ;;  %v773_v56 = vadd.f32 %v1854_v10, %v772_v52  ;;  %v646_v57 = vpop.f32.mrb[35].mxu0  ;;  %v774_v58 = vpop.f32.mrb[35].mxu1 }
 0x13d   :  { %v1407_v59 = vpack.c.bf16 %v848_v53, %v848_v53  ;;  %v1439_v60 = vpack.c.bf16 %v880_v54, %v880_v54  ;;  %v849_v61 = vmax.f32 %v645_v55, 0.0  ;;  %v881_v62 = vmax.f32 %v773_v56, 0.0 }
 0x13f   :  { %1169 = vst.msk [vmem:[%s2179_s3 + $0x40] sm:$0xf] %vm1152_vm1, %v1407_v59  ;;  %1201 = vst.msk [vmem:[%s2179_s3 + $0xc0] sm:$0xf] %vm1152_vm1, %v1439_v60  ;;  %v1408_v63 = vpack.c.bf16 %v849_v61, %v849_v61  ;;  %v1440_v0 = vpack.c.bf16 %v881_v62, %v881_v62 }
 0x140   :  { %v649_v1 = vpop.f32.mrb[36].mxu0  ;;  %v777_v2 = vpop.f32.mrb[36].mxu1 }
 0x141   :  { %1170 = vst.msk [vmem:[%s2179_s3 + $0x44] sm:$0xf] %vm1152_vm1, %v1408_v63  ;;  %1202 = vst.msk [vmem:[%s2179_s3 + $0xc4] sm:$0xf] %vm1152_vm1, %v1440_v0  ;;  %v650_v3 = vadd.f32 %v1854_v10, %v649_v1  ;;  %v778_v4 = vadd.f32 %v1854_v10, %v777_v2  ;;  %v651_v5 = vpop.f32.mrb[37].mxu0  ;;  %v779_v6 = vpop.f32.mrb[37].mxu1 }
 0x142   :  { %v652_v7 = vpop.f32.mrb[38].mxu0  ;;  %v780_v8 = vpop.f32.mrb[38].mxu1 }
 0x143   :  { %v850_v9 = vmax.f32 %v650_v3, 0.0  ;;  %v882_v11 = vmax.f32 %v778_v4, 0.0  ;;  %v653_v12 = vadd.f32 %v1854_v10, %v652_v7  ;;  %v781_v13 = vadd.f32 %v1854_v10, %v780_v8  ;;  %v654_v14 = vpop.f32.mrb[39].mxu0  ;;  %v782_v15 = vpop.f32.mrb[39].mxu1 }
 0x145   :  { %v1409_v16 = vpack.c.bf16 %v850_v9, %v850_v9  ;;  %v1441_v17 = vpack.c.bf16 %v882_v11, %v882_v11  ;;  %v851_v18 = vmax.f32 %v653_v12, 0.0  ;;  %v883_v19 = vmax.f32 %v781_v13, 0.0 }
 0x147   :  { %1171 = vst.msk [vmem:[%s2179_s3 + $0x48] sm:$0xf] %vm1152_vm1, %v1409_v16  ;;  %1203 = vst.msk [vmem:[%s2179_s3 + $0xc8] sm:$0xf] %vm1152_vm1, %v1441_v17  ;;  %v1410_v20 = vpack.c.bf16 %v851_v18, %v851_v18  ;;  %v1442_v21 = vpack.c.bf16 %v883_v19, %v883_v19 }
 0x148   :  { %v657_v22 = vpop.f32.mrb[40].mxu0  ;;  %v785_v23 = vpop.f32.mrb[40].mxu1 }
 0x149   :  { %1172 = vst.msk [vmem:[%s2179_s3 + $0x4c] sm:$0xf] %vm1152_vm1, %v1410_v20  ;;  %1204 = vst.msk [vmem:[%s2179_s3 + $0xcc] sm:$0xf] %vm1152_vm1, %v1442_v21  ;;  %v658_v24 = vadd.f32 %v1854_v10, %v657_v22  ;;  %v786_v25 = vadd.f32 %v1854_v10, %v785_v23  ;;  %v659_v26 = vpop.f32.mrb[41].mxu0  ;;  %v787_v27 = vpop.f32.mrb[41].mxu1 }
 0x14a   :  { %v660_v28 = vpop.f32.mrb[42].mxu0  ;;  %v788_v29 = vpop.f32.mrb[42].mxu1 }
 0x14b   :  { %v852_v30 = vmax.f32 %v658_v24, 0.0  ;;  %v884_v31 = vmax.f32 %v786_v25, 0.0  ;;  %v661_v32 = vadd.f32 %v1854_v10, %v660_v28  ;;  %v789_v33 = vadd.f32 %v1854_v10, %v788_v29  ;;  %v662_v34 = vpop.f32.mrb[43].mxu0  ;;  %v790_v35 = vpop.f32.mrb[43].mxu1 }
 0x14d   :  { %v1411_v36 = vpack.c.bf16 %v852_v30, %v852_v30  ;;  %v1443_v37 = vpack.c.bf16 %v884_v31, %v884_v31  ;;  %v853_v38 = vmax.f32 %v661_v32, 0.0  ;;  %v885_v39 = vmax.f32 %v789_v33, 0.0 }
 0x14f   :  { %1173 = vst.msk [vmem:[%s2179_s3 + $0x50] sm:$0xf] %vm1152_vm1, %v1411_v36  ;;  %1205 = vst.msk [vmem:[%s2179_s3 + $0xd0] sm:$0xf] %vm1152_vm1, %v1443_v37  ;;  %v1412_v40 = vpack.c.bf16 %v853_v38, %v853_v38  ;;  %v1444_v41 = vpack.c.bf16 %v885_v39, %v885_v39 }
 0x150   :  { %v665_v42 = vpop.f32.mrb[44].mxu0  ;;  %v793_v43 = vpop.f32.mrb[44].mxu1 }
 0x151   :  { %1174 = vst.msk [vmem:[%s2179_s3 + $0x54] sm:$0xf] %vm1152_vm1, %v1412_v40  ;;  %1206 = vst.msk [vmem:[%s2179_s3 + $0xd4] sm:$0xf] %vm1152_vm1, %v1444_v41  ;;  %v666_v44 = vadd.f32 %v1854_v10, %v665_v42  ;;  %v794_v45 = vadd.f32 %v1854_v10, %v793_v43  ;;  %v667_v46 = vpop.f32.mrb[45].mxu0  ;;  %v795_v47 = vpop.f32.mrb[45].mxu1 }
 0x152   :  { %v668_v48 = vpop.f32.mrb[46].mxu0  ;;  %v796_v49 = vpop.f32.mrb[46].mxu1 }
 0x153   :  { %v854_v50 = vmax.f32 %v666_v44, 0.0  ;;  %v886_v51 = vmax.f32 %v794_v45, 0.0  ;;  %v669_v52 = vadd.f32 %v1854_v10, %v668_v48  ;;  %v797_v53 = vadd.f32 %v1854_v10, %v796_v49  ;;  %v670_v54 = vpop.f32.mrb[47].mxu0  ;;  %v798_v55 = vpop.f32.mrb[47].mxu1 }
 0x155   :  { %v1413_v56 = vpack.c.bf16 %v854_v50, %v854_v50  ;;  %v1445_v57 = vpack.c.bf16 %v886_v51, %v886_v51  ;;  %v855_v58 = vmax.f32 %v669_v52, 0.0  ;;  %v887_v59 = vmax.f32 %v797_v53, 0.0 }
 0x157   :  { %1175 = vst.msk [vmem:[%s2179_s3 + $0x58] sm:$0xf] %vm1152_vm1, %v1413_v56  ;;  %1207 = vst.msk [vmem:[%s2179_s3 + $0xd8] sm:$0xf] %vm1152_vm1, %v1445_v57  ;;  %v1414_v60 = vpack.c.bf16 %v855_v58, %v855_v58  ;;  %v1446_v61 = vpack.c.bf16 %v887_v59, %v887_v59 }
 0x158   :  { %v673_v62 = vpop.f32.mrb[48].mxu0  ;;  %v801_v63 = vpop.f32.mrb[48].mxu1 }
 0x159   :  { %1176 = vst.msk [vmem:[%s2179_s3 + $0x5c] sm:$0xf] %vm1152_vm1, %v1414_v60  ;;  %1208 = vst.msk [vmem:[%s2179_s3 + $0xdc] sm:$0xf] %vm1152_vm1, %v1446_v61  ;;  %v674_v0 = vadd.f32 %v1854_v10, %v673_v62  ;;  %v802_v1 = vadd.f32 %v1854_v10, %v801_v63  ;;  %v675_v2 = vpop.f32.mrb[49].mxu0  ;;  %v803_v3 = vpop.f32.mrb[49].mxu1 }
 0x15a   :  { %v676_v4 = vpop.f32.mrb[50].mxu0  ;;  %v804_v5 = vpop.f32.mrb[50].mxu1 }
 0x15b   :  { %v856_v6 = vmax.f32 %v674_v0, 0.0  ;;  %v888_v7 = vmax.f32 %v802_v1, 0.0  ;;  %v677_v8 = vadd.f32 %v1854_v10, %v676_v4  ;;  %v805_v9 = vadd.f32 %v1854_v10, %v804_v5  ;;  %v678_v11 = vpop.f32.mrb[51].mxu0  ;;  %v806_v12 = vpop.f32.mrb[51].mxu1 }
 0x15d   :  { %v1415_v13 = vpack.c.bf16 %v856_v6, %v856_v6  ;;  %v1447_v14 = vpack.c.bf16 %v888_v7, %v888_v7  ;;  %v857_v15 = vmax.f32 %v677_v8, 0.0  ;;  %v889_v16 = vmax.f32 %v805_v9, 0.0 }
 0x15f   :  { %1177 = vst.msk [vmem:[%s2179_s3 + $0x60] sm:$0xf] %vm1152_vm1, %v1415_v13  ;;  %1209 = vst.msk [vmem:[%s2179_s3 + $0xe0] sm:$0xf] %vm1152_vm1, %v1447_v14  ;;  %v1416_v17 = vpack.c.bf16 %v857_v15, %v857_v15  ;;  %v1448_v18 = vpack.c.bf16 %v889_v16, %v889_v16 }
 0x160   :  { %v681_v19 = vpop.f32.mrb[52].mxu0  ;;  %v809_v20 = vpop.f32.mrb[52].mxu1 }
 0x161   :  { %1178 = vst.msk [vmem:[%s2179_s3 + $0x64] sm:$0xf] %vm1152_vm1, %v1416_v17  ;;  %1210 = vst.msk [vmem:[%s2179_s3 + $0xe4] sm:$0xf] %vm1152_vm1, %v1448_v18  ;;  %v682_v21 = vadd.f32 %v1854_v10, %v681_v19  ;;  %v810_v22 = vadd.f32 %v1854_v10, %v809_v20  ;;  %v683_v23 = vpop.f32.mrb[53].mxu0  ;;  %v811_v24 = vpop.f32.mrb[53].mxu1 }
 0x162   :  { %v684_v25 = vpop.f32.mrb[54].mxu0  ;;  %v812_v26 = vpop.f32.mrb[54].mxu1 }
 0x163   :  { %v858_v27 = vmax.f32 %v682_v21, 0.0  ;;  %v890_v28 = vmax.f32 %v810_v22, 0.0  ;;  %v685_v29 = vadd.f32 %v1854_v10, %v684_v25  ;;  %v813_v30 = vadd.f32 %v1854_v10, %v812_v26  ;;  %v686_v31 = vpop.f32.mrb[55].mxu0  ;;  %v814_v32 = vpop.f32.mrb[55].mxu1 }
 0x165   :  { %v1417_v33 = vpack.c.bf16 %v858_v27, %v858_v27  ;;  %v1449_v34 = vpack.c.bf16 %v890_v28, %v890_v28  ;;  %v859_v35 = vmax.f32 %v685_v29, 0.0  ;;  %v891_v36 = vmax.f32 %v813_v30, 0.0 }
 0x167   :  { %1179 = vst.msk [vmem:[%s2179_s3 + $0x68] sm:$0xf] %vm1152_vm1, %v1417_v33  ;;  %1211 = vst.msk [vmem:[%s2179_s3 + $0xe8] sm:$0xf] %vm1152_vm1, %v1449_v34  ;;  %v1418_v37 = vpack.c.bf16 %v859_v35, %v859_v35  ;;  %v1450_v38 = vpack.c.bf16 %v891_v36, %v891_v36 }
 0x168   :  { %v689_v39 = vpop.f32.mrb[56].mxu0  ;;  %v817_v40 = vpop.f32.mrb[56].mxu1 }
 0x169   :  { %1180 = vst.msk [vmem:[%s2179_s3 + $0x6c] sm:$0xf] %vm1152_vm1, %v1418_v37  ;;  %1212 = vst.msk [vmem:[%s2179_s3 + $0xec] sm:$0xf] %vm1152_vm1, %v1450_v38  ;;  %v690_v41 = vadd.f32 %v1854_v10, %v689_v39  ;;  %v818_v42 = vadd.f32 %v1854_v10, %v817_v40  ;;  %v691_v43 = vpop.f32.mrb[57].mxu0  ;;  %v819_v44 = vpop.f32.mrb[57].mxu1 }
 0x16a   :  { %v692_v45 = vpop.f32.mrb[58].mxu0  ;;  %v820_v46 = vpop.f32.mrb[58].mxu1 }
 0x16b   :  { %v860_v47 = vmax.f32 %v690_v41, 0.0  ;;  %v892_v48 = vmax.f32 %v818_v42, 0.0  ;;  %v693_v49 = vadd.f32 %v1854_v10, %v692_v45  ;;  %v821_v50 = vadd.f32 %v1854_v10, %v820_v46  ;;  %v694_v51 = vpop.f32.mrb[59].mxu0  ;;  %v822_v52 = vpop.f32.mrb[59].mxu1 }
 0x16d   :  { %v1419_v53 = vpack.c.bf16 %v860_v47, %v860_v47  ;;  %v1451_v54 = vpack.c.bf16 %v892_v48, %v892_v48  ;;  %v861_v55 = vmax.f32 %v693_v49, 0.0  ;;  %v893_v56 = vmax.f32 %v821_v50, 0.0 }
 0x16f   :  { %1181 = vst.msk [vmem:[%s2179_s3 + $0x70] sm:$0xf] %vm1152_vm1, %v1419_v53  ;;  %1213 = vst.msk [vmem:[%s2179_s3 + $0xf0] sm:$0xf] %vm1152_vm1, %v1451_v54  ;;  %v1420_v57 = vpack.c.bf16 %v861_v55, %v861_v55  ;;  %v1452_v58 = vpack.c.bf16 %v893_v56, %v893_v56 }
 0x170   :  { %v697_v59 = vpop.f32.mrb[60].mxu0  ;;  %v825_v60 = vpop.f32.mrb[60].mxu1 }
 0x171   :  { %1182 = vst.msk [vmem:[%s2179_s3 + $0x74] sm:$0xf] %vm1152_vm1, %v1420_v57  ;;  %1214 = vst.msk [vmem:[%s2179_s3 + $0xf4] sm:$0xf] %vm1152_vm1, %v1452_v58  ;;  %v698_v61 = vadd.f32 %v1854_v10, %v697_v59  ;;  %v826_v62 = vadd.f32 %v1854_v10, %v825_v60  ;;  %v699_v63 = vpop.f32.mrb[61].mxu0  ;;  %v827_v0 = vpop.f32.mrb[61].mxu1 }
 0x172   :  { %v700_v1 = vpop.f32.mrb[62].mxu0  ;;  %v828_v2 = vpop.f32.mrb[62].mxu1 }
 0x173   :  { %v862_v3 = vmax.f32 %v698_v61, 0.0  ;;  %v894_v4 = vmax.f32 %v826_v62, 0.0  ;;  %v701_v5 = vadd.f32 %v1854_v10, %v700_v1  ;;  %v829_v6 = vadd.f32 %v1854_v10, %v828_v2  ;;  %v702_v7 = vpop.f32.mrb[63].mxu0  ;;  %v830_v8 = vpop.f32.mrb[63].mxu1 }
 0x175   :  { %v1421_v9 = vpack.c.bf16 %v862_v3, %v862_v3  ;;  %v1453_v11 = vpack.c.bf16 %v894_v4, %v894_v4  ;;  %v863_v12 = vmax.f32 %v701_v5, 0.0  ;;  %v895_v13 = vmax.f32 %v829_v6, 0.0 }
 0x177   :  { %1183 = vst.msk [vmem:[%s2179_s3 + $0x78] sm:$0xf] %vm1152_vm1, %v1421_v9  ;;  %1215 = vst.msk [vmem:[%s2179_s3 + $0xf8] sm:$0xf] %vm1152_vm1, %v1453_v11  ;;  %v1422_v14 = vpack.c.bf16 %v863_v12, %v863_v12  ;;  %v1454_v15 = vpack.c.bf16 %v895_v13, %v895_v13 }
 0x179   :  { %1184 = vst.msk [vmem:[%s2179_s3 + $0x7c] sm:$0xf] %vm1152_vm1, %v1422_v14  ;;  %1216 = vst.msk [vmem:[%s2179_s3 + $0xfc] sm:$0xf] %vm1152_vm1, %v1454_v15 }

// kernel: generator_forward.14
= control target key start
LH: loop header
LB: loop body
LE: loop exit
PB: predicated region body
PF: predicated region fallthrough
CT: control target
= control target key end

     0   :  { %v1261_v0 = vmov 0   ;;  %vm449_vm0 = vcmask 130048   ;;  %s2055_s1 = inlined_call_operand.vmem [shape: bf16[144,16], index: 1, kind: input, shape index: {}]   ;;  %s2056_s0 = inlined_call_operand.vmem [shape: bf16[512,144], index: 0, kind: input, shape index: {}]   ;;  %s2057_s2 = inlined_call_operand.vmem [shape: f32[1,16], index: 2, kind: input, shape index: {}]   ;;  %s2058_s3 = inlined_call_operand.vmem [shape: f32[512,16], index: 3, kind: input, shape index: {}]   ;;  %s2059_s4 = inlined_call_operand.vmem [shape: f32[512,16], index: 4, kind: output, shape index: {}]  }
   0x1   :  { %546 = vmatprep.subr.bf16.mxu0 %v1261_v0  ;;  %1137 = vmatprep.subr.bf16.mxu1 %v1261_v0  ;;  %v1156_v1 = vld [vmem:[%s2055_s1] sm:$0xff]   ;;  %v1157_v2 = vld [vmem:[%s2055_s1 + $0x8] sm:$0xff]   ;;  %v1158_v3 = vld [vmem:[%s2055_s1 + $0x10] sm:$0xff]  }
   0x2   :  { %547 = vmatpush1.bf16.msra.mxu0 %v1156_v1  ;;  %1146 = vmatpush1.bf16.msra.mxu1 %v1156_v1  ;;  %v1159_v4 = vld [vmem:[%s2055_s1 + $0x18] sm:$0xff]   ;;  %v1167_v5 = vld [vmem:[%s2056_s0 + $0x4] ss:$8 sps:$4 sm:$0xff]   ;;  %v1162_v9 = vld [vmem:[%s2055_s1 + $0x30] sm:$0xff]  }
   0x3   :  { %548 = vmatprep.subr.bf16.mxu0 %v1261_v0  ;;  %1138 = vmatprep.subr.bf16.mxu1 %v1261_v0  ;;  %v1170_v6 = vld [vmem:[%s2056_s0 + $0x104] ss:$8 sps:$4 sm:$0xff]   ;;  %v1163_v10 = vld [vmem:[%s2055_s1 + $0x38] sm:$0xff]   ;;  %v1165_v12 = vld [vmem:[%s2056_s0] ss:$8 sps:$4 sm:$0xff]  }
   0x4   :  { %1105 = vmatprep.mubr.msk.bf16.mxu0 %vm449_vm0, %v1167_v5  ;;  %1121 = vmatprep.mubr.msk.bf16.mxu1 %vm449_vm0, %v1170_v6  ;;  %v1160_v7 = vld [vmem:[%s2055_s1 + $0x20] sm:$0xff]   ;;  %v1161_v8 = vld [vmem:[%s2055_s1 + $0x28] sm:$0xff]   ;;  %v1171_v14 = vld [vmem:[%s2056_s0 + $0x14] ss:$8 sps:$4 sm:$0xff]  }
   0x5   :  { %v1164_v11 = vld [vmem:[%s2055_s1 + $0x40] sm:$0xff]   ;;  %v1173_v15 = vld [vmem:[%s2056_s0 + $0x114] ss:$8 sps:$4 sm:$0xff]   ;;  %v1175_v16 = vld [vmem:[%s2056_s0 + $0x10] ss:$8 sps:$4 sm:$0xff]  }
   0x6   :  { %549 = vmatpush1.bf16.msra.mxu0 %v1157_v2  ;;  %1147 = vmatpush1.bf16.msra.mxu1 %v1157_v2  ;;  %v1168_v13 = vld [vmem:[%s2056_s0 + $0x100] ss:$8 sps:$4 sm:$0xff]   ;;  %v1176_v17 = vld [vmem:[%s2056_s0 + $0x110] ss:$8 sps:$4 sm:$0xff]   ;;  %v1177_v18 = vld [vmem:[%s2056_s0 + $0x24] ss:$8 sps:$4 sm:$0xff]  }
   0x7   :  { %550 = vmatprep.subr.bf16.mxu0 %v1261_v0  ;;  %1139 = vmatprep.subr.bf16.mxu1 %v1261_v0  ;;  %v1179_v19 = vld [vmem:[%s2056_s0 + $0x124] ss:$8 sps:$4 sm:$0xff]   ;;  %v1181_v20 = vld [vmem:[%s2056_s0 + $0x20] ss:$8 sps:$4 sm:$0xff]   ;;  %v1183_v22 = vld [vmem:[%s2056_s0 + $0x34] ss:$8 sps:$4 sm:$0xff]  }
   0x8   :  { %v1182_v21 = vld [vmem:[%s2056_s0 + $0x120] ss:$8 sps:$4 sm:$0xff]   ;;  %v1185_v23 = vld [vmem:[%s2056_s0 + $0x134] ss:$8 sps:$4 sm:$0xff]   ;;  %v1187_v24 = vld [vmem:[%s2056_s0 + $0x30] ss:$8 sps:$4 sm:$0xff]  }
   0x9   :  { %v1188_v25 = vld [vmem:[%s2056_s0 + $0x130] ss:$8 sps:$4 sm:$0xff]   ;;  %v1189_v26 = vld [vmem:[%s2056_s0 + $0x44] ss:$8 sps:$4 sm:$0xff]   ;;  %v1193_v28 = vld [vmem:[%s2056_s0 + $0x40] ss:$8 sps:$4 sm:$0xff]  }
   0xa   :  { %551 = vmatpush1.bf16.msra.mxu0 %v1158_v3  ;;  %1148 = vmatpush1.bf16.msra.mxu1 %v1158_v3  ;;  %v1191_v27 = vld [vmem:[%s2056_s0 + $0x144] ss:$8 sps:$4 sm:$0xff]   ;;  %v1194_v29 = vld [vmem:[%s2056_s0 + $0x140] ss:$8 sps:$4 sm:$0xff]   ;;  %v1195_v30 = vld [vmem:[%s2056_s0 + $0x54] ss:$8 sps:$4 sm:$0xff]  }
   0xb   :  { %552 = vmatprep.subr.bf16.mxu0 %v1261_v0  ;;  %1140 = vmatprep.subr.bf16.mxu1 %v1261_v0  ;;  %v1197_v31 = vld [vmem:[%s2056_s0 + $0x154] ss:$8 sps:$4 sm:$0xff]   ;;  %v1199_v32 = vld [vmem:[%s2056_s0 + $0x50] ss:$8 sps:$4 sm:$0xff]   ;;  %v1201_v34 = vld [vmem:[%s2056_s0 + $0x64] ss:$8 sps:$4 sm:$0xff]  }
   0xc   :  { %v1200_v33 = vld [vmem:[%s2056_s0 + $0x150] ss:$8 sps:$4 sm:$0xff]   ;;  %v1203_v35 = vld [vmem:[%s2056_s0 + $0x164] ss:$8 sps:$4 sm:$0xff]   ;;  %v1205_v36 = vld [vmem:[%s2056_s0 + $0x60] ss:$8 sps:$4 sm:$0xff]  }
   0xd   :  { %v1206_v37 = vld [vmem:[%s2056_s0 + $0x160] ss:$8 sps:$4 sm:$0xff]   ;;  %v1207_v38 = vld [vmem:[%s2056_s0 + $0x74] ss:$8 sps:$4 sm:$0xff]   ;;  %v1211_v40 = vld [vmem:[%s2056_s0 + $0x70] ss:$8 sps:$4 sm:$0xff]  }
   0xe   :  { %553 = vmatpush1.bf16.msra.mxu0 %v1159_v4  ;;  %1149 = vmatpush1.bf16.msra.mxu1 %v1159_v4  ;;  %v1209_v39 = vld [vmem:[%s2056_s0 + $0x174] ss:$8 sps:$4 sm:$0xff]   ;;  %v1212_v41 = vld [vmem:[%s2056_s0 + $0x170] ss:$8 sps:$4 sm:$0xff]   ;;  %v1213_v42 = vld [vmem:[%s2056_s0 + $0x84] ss:$8 sps:$4 sm:$0xff]  }
   0xf   :  { %554 = vmatprep.subr.bf16.mxu0 %v1261_v0  ;;  %1141 = vmatprep.subr.bf16.mxu1 %v1261_v0  ;;  %v1215_v43 = vld [vmem:[%s2056_s0 + $0x184] ss:$8 sps:$4 sm:$0xff]   ;;  %v1217_v44 = vld [vmem:[%s2056_s0 + $0x80] ss:$8 sps:$4 sm:$0xff]   ;;  %v1219_v46 = vld [vmem:[%s2056_s0 + $0x94] ss:$8 sps:$4 sm:$0xff]  }
  0x10   :  { %v1218_v45 = vld [vmem:[%s2056_s0 + $0x180] ss:$8 sps:$4 sm:$0xff]   ;;  %v1221_v47 = vld [vmem:[%s2056_s0 + $0x194] ss:$8 sps:$4 sm:$0xff]   ;;  %v1223_v48 = vld [vmem:[%s2056_s0 + $0x90] ss:$8 sps:$4 sm:$0xff]  }
  0x11   :  { %v1224_v49 = vld [vmem:[%s2056_s0 + $0x190] ss:$8 sps:$4 sm:$0xff]   ;;  %v1225_v50 = vld [vmem:[%s2056_s0 + $0xa4] ss:$8 sps:$4 sm:$0xff]   ;;  %v1229_v52 = vld [vmem:[%s2056_s0 + $0xa0] ss:$8 sps:$4 sm:$0xff]  }
  0x12   :  { %555 = vmatpush1.bf16.msra.mxu0 %v1160_v7  ;;  %1150 = vmatpush1.bf16.msra.mxu1 %v1160_v7  ;;  %v1227_v51 = vld [vmem:[%s2056_s0 + $0x1a4] ss:$8 sps:$4 sm:$0xff]   ;;  %v1230_v53 = vld [vmem:[%s2056_s0 + $0x1a0] ss:$8 sps:$4 sm:$0xff]   ;;  %v1231_v54 = vld [vmem:[%s2056_s0 + $0xb4] ss:$8 sps:$4 sm:$0xff]  }
  0x13   :  { %556 = vmatprep.subr.bf16.mxu0 %v1261_v0  ;;  %1142 = vmatprep.subr.bf16.mxu1 %v1261_v0  ;;  %v1233_v55 = vld [vmem:[%s2056_s0 + $0x1b4] ss:$8 sps:$4 sm:$0xff]   ;;  %v1235_v56 = vld [vmem:[%s2056_s0 + $0xb0] ss:$8 sps:$4 sm:$0xff]   ;;  %v1237_v58 = vld [vmem:[%s2056_s0 + $0xc4] ss:$8 sps:$4 sm:$0xff]  }
  0x14   :  { %v1236_v57 = vld [vmem:[%s2056_s0 + $0x1b0] ss:$8 sps:$4 sm:$0xff]   ;;  %v1239_v59 = vld [vmem:[%s2056_s0 + $0x1c4] ss:$8 sps:$4 sm:$0xff]   ;;  %v1241_v60 = vld [vmem:[%s2056_s0 + $0xc0] ss:$8 sps:$4 sm:$0xff]  }
  0x15   :  { %v1242_v61 = vld [vmem:[%s2056_s0 + $0x1c0] ss:$8 sps:$4 sm:$0xff]   ;;  %v1243_v62 = vld [vmem:[%s2056_s0 + $0xd4] ss:$8 sps:$4 sm:$0xff]   ;;  %v1248_v1 = vld [vmem:[%s2056_s0 + $0x1d0] ss:$8 sps:$4 sm:$0xff]  }
  0x16   :  { %557 = vmatpush1.bf16.msra.mxu0 %v1161_v8  ;;  %1151 = vmatpush1.bf16.msra.mxu1 %v1161_v8  ;;  %v1245_v63 = vld [vmem:[%s2056_s0 + $0x1d4] ss:$8 sps:$4 sm:$0xff]   ;;  %v1249_v2 = vld [vmem:[%s2056_s0 + $0xe4] ss:$8 sps:$4 sm:$0xff]   ;;  %v1253_v4 = vld [vmem:[%s2056_s0 + $0xe0] ss:$8 sps:$4 sm:$0xff]  }
  0x17   :  { %558 = vmatprep.subr.bf16.mxu0 %v1261_v0  ;;  %1143 = vmatprep.subr.bf16.mxu1 %v1261_v0  ;;  %v1251_v3 = vld [vmem:[%s2056_s0 + $0x1e4] ss:$8 sps:$4 sm:$0xff]   ;;  %v1254_v5 = vld [vmem:[%s2056_s0 + $0x1e0] ss:$8 sps:$4 sm:$0xff]   ;;  %v1255_v6 = vld [vmem:[%s2056_s0 + $0xf4] ss:$8 sps:$4 sm:$0xff]  }
  0x18   :  { %v1257_v7 = vld [vmem:[%s2056_s0 + $0x1f4] ss:$8 sps:$4 sm:$0xff]   ;;  %v1259_v8 = vld [vmem:[%s2056_s0 + $0xf0] ss:$8 sps:$4 sm:$0xff]  }
  0x1a   :  { %559 = vmatpush1.bf16.msra.mxu0 %v1162_v9  ;;  %1152 = vmatpush1.bf16.msra.mxu1 %v1162_v9  ;;  %v1260_v9 = vld [vmem:[%s2056_s0 + $0x1f0] ss:$8 sps:$4 sm:$0xff]  }
  0x1b   :  { %560 = vmatprep.subr.bf16.mxu0 %v1261_v0  ;;  %1144 = vmatprep.subr.bf16.mxu1 %v1261_v0 }
  0x1e   :  { %561 = vmatpush1.bf16.msra.mxu0 %v1163_v10  ;;  %1153 = vmatpush1.bf16.msra.mxu1 %v1163_v10  ;;  %v1541_v10 = vld [vmem:[%s2057_s2] ss:$0 sm:$0xff] }
  0x1f   :  { %562 = vmatprep.subr.bf16.mxu0 %v1261_v0  ;;  %1145 = vmatprep.subr.bf16.mxu1 %v1261_v0  ;;  %v1247_v0 = vld [vmem:[%s2056_s0 + $0xd0] ss:$8 sps:$4 sm:$0xff]  }
  0x22   :  { %563 = vmatpush1.bf16.msra.mxu0 %v1164_v11  ;;  %1154 = vmatpush1.bf16.msra.mxu1 %v1164_v11 }
  0x25   :  { %579 = vmatmul.mubr.bf16.vlgmr.msra.gmra.mrb[0].mxu0 %v1165_v12  ;;  %707 = vmatmul.mubr.bf16.vlgmr.msra.gmra.mrb[0].mxu1 %v1168_v13  ;;  %v835_v12 = vld [vmem:[%s2058_s3] sm:$0xff] }
  0x26   :  { %1106 = vmatprep.mubr.msk.bf16.mxu0 %vm449_vm0, %v1171_v14  ;;  %1122 = vmatprep.mubr.msk.bf16.mxu1 %vm449_vm0, %v1173_v15  ;;  %v867_v14 = vld [vmem:[%s2058_s3 + $0x100] sm:$0xff] }
  0x2d   :  { %587 = vmatmul.mubr.bf16.gmra.mrb[4].mxu0 %v1175_v16  ;;  %715 = vmatmul.mubr.bf16.gmra.mrb[4].mxu1 %v1176_v17 }
  0x2e   :  { %1107 = vmatprep.mubr.msk.bf16.mxu0 %vm449_vm0, %v1177_v18  ;;  %1123 = vmatprep.mubr.msk.bf16.mxu1 %vm449_vm0, %v1179_v19 }
  0x35   :  { %595 = vmatmul.mubr.bf16.gmra.mrb[8].mxu0 %v1181_v20  ;;  %723 = vmatmul.mubr.bf16.gmra.mrb[8].mxu1 %v1182_v21  ;;  %v836_v20 = vld [vmem:[%s2058_s3 + $0x8] sm:$0xff] }
  0x36   :  { %1108 = vmatprep.mubr.msk.bf16.mxu0 %vm449_vm0, %v1183_v22  ;;  %1124 = vmatprep.mubr.msk.bf16.mxu1 %vm449_vm0, %v1185_v23  ;;  %v868_v22 = vld [vmem:[%s2058_s3 + $0x108] sm:$0xff] }
  0x3d   :  { %603 = vmatmul.mubr.bf16.gmra.mrb[12].mxu0 %v1187_v24  ;;  %731 = vmatmul.mubr.bf16.gmra.mrb[12].mxu1 %v1188_v25 }
  0x3e   :  { %1109 = vmatprep.mubr.msk.bf16.mxu0 %vm449_vm0, %v1189_v26  ;;  %1125 = vmatprep.mubr.msk.bf16.mxu1 %vm449_vm0, %v1191_v27 }
  0x45   :  { %611 = vmatmul.mubr.bf16.gmra.mrb[16].mxu0 %v1193_v28  ;;  %739 = vmatmul.mubr.bf16.gmra.mrb[16].mxu1 %v1194_v29 }
  0x46   :  { %1110 = vmatprep.mubr.msk.bf16.mxu0 %vm449_vm0, %v1195_v30  ;;  %1126 = vmatprep.mubr.msk.bf16.mxu1 %vm449_vm0, %v1197_v31 }
  0x4d   :  { %619 = vmatmul.mubr.bf16.gmra.mrb[20].mxu0 %v1199_v32  ;;  %747 = vmatmul.mubr.bf16.gmra.mrb[20].mxu1 %v1200_v33  ;;  %v837_v32 = vld [vmem:[%s2058_s3 + $0x10] sm:$0xff] }
  0x4e   :  { %1111 = vmatprep.mubr.msk.bf16.mxu0 %vm449_vm0, %v1201_v34  ;;  %1127 = vmatprep.mubr.msk.bf16.mxu1 %vm449_vm0, %v1203_v35  ;;  %v869_v34 = vld [vmem:[%s2058_s3 + $0x110] sm:$0xff] }
  0x55   :  { %627 = vmatmul.mubr.bf16.gmra.mrb[24].mxu0 %v1205_v36  ;;  %755 = vmatmul.mubr.bf16.gmra.mrb[24].mxu1 %v1206_v37 }
  0x56   :  { %1112 = vmatprep.mubr.msk.bf16.mxu0 %vm449_vm0, %v1207_v38  ;;  %1128 = vmatprep.mubr.msk.bf16.mxu1 %vm449_vm0, %v1209_v39 }
  0x5d   :  { %635 = vmatmul.mubr.bf16.gmra.mrb[28].mxu0 %v1211_v40  ;;  %763 = vmatmul.mubr.bf16.gmra.mrb[28].mxu1 %v1212_v41  ;;  %v838_v40 = vld [vmem:[%s2058_s3 + $0x18] sm:$0xff] }
  0x5e   :  { %1113 = vmatprep.mubr.msk.bf16.mxu0 %vm449_vm0, %v1213_v42  ;;  %1129 = vmatprep.mubr.msk.bf16.mxu1 %vm449_vm0, %v1215_v43  ;;  %v870_v42 = vld [vmem:[%s2058_s3 + $0x118] sm:$0xff] }
  0x65   :  { %643 = vmatmul.mubr.bf16.gmra.mrb[32].mxu0 %v1217_v44  ;;  %771 = vmatmul.mubr.bf16.gmra.mrb[32].mxu1 %v1218_v45 }
  0x66   :  { %1114 = vmatprep.mubr.msk.bf16.mxu0 %vm449_vm0, %v1219_v46  ;;  %1130 = vmatprep.mubr.msk.bf16.mxu1 %vm449_vm0, %v1221_v47 }
  0x6d   :  { %651 = vmatmul.mubr.bf16.gmra.mrb[36].mxu0 %v1223_v48  ;;  %779 = vmatmul.mubr.bf16.gmra.mrb[36].mxu1 %v1224_v49 }
  0x6e   :  { %1115 = vmatprep.mubr.msk.bf16.mxu0 %vm449_vm0, %v1225_v50  ;;  %1131 = vmatprep.mubr.msk.bf16.mxu1 %vm449_vm0, %v1227_v51 }
  0x75   :  { %659 = vmatmul.mubr.bf16.gmra.mrb[40].mxu0 %v1229_v52  ;;  %787 = vmatmul.mubr.bf16.gmra.mrb[40].mxu1 %v1230_v53  ;;  %v839_v52 = vld [vmem:[%s2058_s3 + $0x20] sm:$0xff] }
  0x76   :  { %1116 = vmatprep.mubr.msk.bf16.mxu0 %vm449_vm0, %v1231_v54  ;;  %1132 = vmatprep.mubr.msk.bf16.mxu1 %vm449_vm0, %v1233_v55  ;;  %v871_v54 = vld [vmem:[%s2058_s3 + $0x120] sm:$0xff] }
  0x7d   :  { %667 = vmatmul.mubr.bf16.gmra.mrb[44].mxu0 %v1235_v56  ;;  %795 = vmatmul.mubr.bf16.gmra.mrb[44].mxu1 %v1236_v57 }
  0x7e   :  { %1117 = vmatprep.mubr.msk.bf16.mxu0 %vm449_vm0, %v1237_v58  ;;  %1133 = vmatprep.mubr.msk.bf16.mxu1 %vm449_vm0, %v1239_v59 }
  0x85   :  { %675 = vmatmul.mubr.bf16.gmra.mrb[48].mxu0 %v1241_v60  ;;  %803 = vmatmul.mubr.bf16.gmra.mrb[48].mxu1 %v1242_v61  ;;  %v840_v60 = vld [vmem:[%s2058_s3 + $0x28] sm:$0xff] }
  0x86   :  { %1118 = vmatprep.mubr.msk.bf16.mxu0 %vm449_vm0, %v1243_v62  ;;  %1134 = vmatprep.mubr.msk.bf16.mxu1 %vm449_vm0, %v1245_v63  ;;  %v872_v62 = vld [vmem:[%s2058_s3 + $0x128] sm:$0xff] }
  0x8d   :  { %683 = vmatmul.mubr.bf16.gmra.mrb[52].mxu0 %v1247_v0  ;;  %811 = vmatmul.mubr.bf16.gmra.mrb[52].mxu1 %v1248_v1 }
  0x8e   :  { %1119 = vmatprep.mubr.msk.bf16.mxu0 %vm449_vm0, %v1249_v2  ;;  %1135 = vmatprep.mubr.msk.bf16.mxu1 %vm449_vm0, %v1251_v3 }
  0x95   :  { %691 = vmatmul.mubr.bf16.gmra.mrb[56].mxu0 %v1253_v4  ;;  %819 = vmatmul.mubr.bf16.gmra.mrb[56].mxu1 %v1254_v5 }
  0x96   :  { %1120 = vmatprep.mubr.msk.bf16.mxu0 %vm449_vm0, %v1255_v6  ;;  %1136 = vmatprep.mubr.msk.bf16.mxu1 %vm449_vm0, %v1257_v7 }
  0x9d   :  { %699 = vmatmul.mubr.bf16.gmra.mrb[60].mxu0 %v1259_v8  ;;  %827 = vmatmul.mubr.bf16.gmra.mrb[60].mxu1 %v1260_v9  ;;  %v841_v8 = vld [vmem:[%s2058_s3 + $0x30] sm:$0xff] }
  0xf8   :  { %v580_v11 = vpop.f32.mrb[0].mxu0  ;;  %v708_v13 = vpop.f32.mrb[0].mxu1 }
  0xf9   :  { %v581_v15 = vadd.f32 %v1541_v10, %v580_v11  ;;  %v709_v16 = vadd.f32 %v1541_v10, %v708_v13  ;;  %v582_v17 = vpop.f32.mrb[1].mxu0  ;;  %v710_v18 = vpop.f32.mrb[1].mxu1  ;;  %v873_v11 = vld [vmem:[%s2058_s3 + $0x130] sm:$0xff] }
  0xfa   :  { %v583_v19 = vpop.f32.mrb[2].mxu0  ;;  %v711_v21 = vpop.f32.mrb[2].mxu1  ;;  %v842_v17 = vld [vmem:[%s2058_s3 + $0x38] sm:$0xff] }
  0xfb   :  { %v899_v23 = vadd.f32 %v835_v12, %v581_v15  ;;  %v931_v24 = vadd.f32 %v867_v14, %v709_v16  ;;  %v584_v25 = vadd.f32 %v1541_v10, %v583_v19  ;;  %v712_v26 = vadd.f32 %v1541_v10, %v711_v21  ;;  %v585_v27 = vpop.f32.mrb[3].mxu0  ;;  %v713_v28 = vpop.f32.mrb[3].mxu1  ;;  %v874_v19 = vld [vmem:[%s2058_s3 + $0x138] sm:$0xff] }
  0xfd   :  { %963 = vst.msk [vmem:[%s2059_s4] sm:$0xff] %vm449_vm0, %v899_v23  ;;  %995 = vst.msk [vmem:[%s2059_s4 + $0x100] sm:$0xff] %vm449_vm0, %v931_v24  ;;  %v900_v29 = vadd.f32 %v836_v20, %v584_v25  ;;  %v932_v30 = vadd.f32 %v868_v22, %v712_v26 }
  0xff   :  { %964 = vst.msk [vmem:[%s2059_s4 + $0x8] sm:$0xff] %vm449_vm0, %v900_v29  ;;  %996 = vst.msk [vmem:[%s2059_s4 + $0x108] sm:$0xff] %vm449_vm0, %v932_v30  ;;  %v843_v29 = vld [vmem:[%s2058_s3 + $0x40] sm:$0xff] }
 0x100   :  { %v588_v31 = vpop.f32.mrb[4].mxu0  ;;  %v716_v33 = vpop.f32.mrb[4].mxu1 }
 0x101   :  { %v589_v35 = vadd.f32 %v1541_v10, %v588_v31  ;;  %v717_v36 = vadd.f32 %v1541_v10, %v716_v33  ;;  %v590_v37 = vpop.f32.mrb[5].mxu0  ;;  %v718_v38 = vpop.f32.mrb[5].mxu1  ;;  %v875_v31 = vld [vmem:[%s2058_s3 + $0x140] sm:$0xff] }
 0x102   :  { %v591_v39 = vpop.f32.mrb[6].mxu0  ;;  %v719_v41 = vpop.f32.mrb[6].mxu1  ;;  %v844_v37 = vld [vmem:[%s2058_s3 + $0x48] sm:$0xff] }
 0x103   :  { %v901_v43 = vadd.f32 %v837_v32, %v589_v35  ;;  %v933_v44 = vadd.f32 %v869_v34, %v717_v36  ;;  %v592_v45 = vadd.f32 %v1541_v10, %v591_v39  ;;  %v720_v46 = vadd.f32 %v1541_v10, %v719_v41  ;;  %v593_v47 = vpop.f32.mrb[7].mxu0  ;;  %v721_v48 = vpop.f32.mrb[7].mxu1  ;;  %v876_v39 = vld [vmem:[%s2058_s3 + $0x148] sm:$0xff] }
 0x105   :  { %965 = vst.msk [vmem:[%s2059_s4 + $0x10] sm:$0xff] %vm449_vm0, %v901_v43  ;;  %997 = vst.msk [vmem:[%s2059_s4 + $0x110] sm:$0xff] %vm449_vm0, %v933_v44  ;;  %v902_v49 = vadd.f32 %v838_v40, %v592_v45  ;;  %v934_v50 = vadd.f32 %v870_v42, %v720_v46 }
 0x107   :  { %966 = vst.msk [vmem:[%s2059_s4 + $0x18] sm:$0xff] %vm449_vm0, %v902_v49  ;;  %998 = vst.msk [vmem:[%s2059_s4 + $0x118] sm:$0xff] %vm449_vm0, %v934_v50  ;;  %v845_v49 = vld [vmem:[%s2058_s3 + $0x50] sm:$0xff] }
 0x108   :  { %v596_v51 = vpop.f32.mrb[8].mxu0  ;;  %v724_v53 = vpop.f32.mrb[8].mxu1 }
 0x109   :  { %v597_v55 = vadd.f32 %v1541_v10, %v596_v51  ;;  %v725_v56 = vadd.f32 %v1541_v10, %v724_v53  ;;  %v598_v57 = vpop.f32.mrb[9].mxu0  ;;  %v726_v58 = vpop.f32.mrb[9].mxu1  ;;  %v877_v51 = vld [vmem:[%s2058_s3 + $0x150] sm:$0xff] }
 0x10a   :  { %v599_v59 = vpop.f32.mrb[10].mxu0  ;;  %v727_v61 = vpop.f32.mrb[10].mxu1  ;;  %v846_v57 = vld [vmem:[%s2058_s3 + $0x58] sm:$0xff] }
 0x10b   :  { %v903_v63 = vadd.f32 %v839_v52, %v597_v55  ;;  %v935_v0 = vadd.f32 %v871_v54, %v725_v56  ;;  %v600_v1 = vadd.f32 %v1541_v10, %v599_v59  ;;  %v728_v2 = vadd.f32 %v1541_v10, %v727_v61  ;;  %v601_v3 = vpop.f32.mrb[11].mxu0  ;;  %v729_v4 = vpop.f32.mrb[11].mxu1  ;;  %v878_v59 = vld [vmem:[%s2058_s3 + $0x158] sm:$0xff] }
 0x10d   :  { %967 = vst.msk [vmem:[%s2059_s4 + $0x20] sm:$0xff] %vm449_vm0, %v903_v63  ;;  %999 = vst.msk [vmem:[%s2059_s4 + $0x120] sm:$0xff] %vm449_vm0, %v935_v0  ;;  %v904_v5 = vadd.f32 %v840_v60, %v600_v1  ;;  %v936_v6 = vadd.f32 %v872_v62, %v728_v2 }
 0x10f   :  { %968 = vst.msk [vmem:[%s2059_s4 + $0x28] sm:$0xff] %vm449_vm0, %v904_v5  ;;  %1000 = vst.msk [vmem:[%s2059_s4 + $0x128] sm:$0xff] %vm449_vm0, %v936_v6  ;;  %v847_v5 = vld [vmem:[%s2058_s3 + $0x60] sm:$0xff] }
 0x110   :  { %v604_v7 = vpop.f32.mrb[12].mxu0  ;;  %v732_v9 = vpop.f32.mrb[12].mxu1 }
 0x111   :  { %v605_v12 = vadd.f32 %v1541_v10, %v604_v7  ;;  %v733_v13 = vadd.f32 %v1541_v10, %v732_v9  ;;  %v606_v14 = vpop.f32.mrb[13].mxu0  ;;  %v734_v15 = vpop.f32.mrb[13].mxu1  ;;  %v879_v7 = vld [vmem:[%s2058_s3 + $0x160] sm:$0xff] }
 0x112   :  { %v607_v16 = vpop.f32.mrb[14].mxu0  ;;  %v735_v18 = vpop.f32.mrb[14].mxu1  ;;  %v848_v14 = vld [vmem:[%s2058_s3 + $0x68] sm:$0xff] }
 0x113   :  { %v905_v20 = vadd.f32 %v841_v8, %v605_v12  ;;  %v937_v21 = vadd.f32 %v873_v11, %v733_v13  ;;  %v608_v22 = vadd.f32 %v1541_v10, %v607_v16  ;;  %v736_v23 = vadd.f32 %v1541_v10, %v735_v18  ;;  %v609_v24 = vpop.f32.mrb[15].mxu0  ;;  %v737_v25 = vpop.f32.mrb[15].mxu1  ;;  %v880_v16 = vld [vmem:[%s2058_s3 + $0x168] sm:$0xff] }
 0x115   :  { %969 = vst.msk [vmem:[%s2059_s4 + $0x30] sm:$0xff] %vm449_vm0, %v905_v20  ;;  %1001 = vst.msk [vmem:[%s2059_s4 + $0x130] sm:$0xff] %vm449_vm0, %v937_v21  ;;  %v906_v26 = vadd.f32 %v842_v17, %v608_v22  ;;  %v938_v27 = vadd.f32 %v874_v19, %v736_v23 }
 0x117   :  { %970 = vst.msk [vmem:[%s2059_s4 + $0x38] sm:$0xff] %vm449_vm0, %v906_v26  ;;  %1002 = vst.msk [vmem:[%s2059_s4 + $0x138] sm:$0xff] %vm449_vm0, %v938_v27  ;;  %v849_v26 = vld [vmem:[%s2058_s3 + $0x70] sm:$0xff] }
 0x118   :  { %v612_v28 = vpop.f32.mrb[16].mxu0  ;;  %v740_v30 = vpop.f32.mrb[16].mxu1 }
 0x119   :  { %v613_v32 = vadd.f32 %v1541_v10, %v612_v28  ;;  %v741_v33 = vadd.f32 %v1541_v10, %v740_v30  ;;  %v614_v34 = vpop.f32.mrb[17].mxu0  ;;  %v742_v35 = vpop.f32.mrb[17].mxu1  ;;  %v881_v28 = vld [vmem:[%s2058_s3 + $0x170] sm:$0xff] }
 0x11a   :  { %v615_v36 = vpop.f32.mrb[18].mxu0  ;;  %v743_v38 = vpop.f32.mrb[18].mxu1  ;;  %v850_v34 = vld [vmem:[%s2058_s3 + $0x78] sm:$0xff] }
 0x11b   :  { %v907_v40 = vadd.f32 %v843_v29, %v613_v32  ;;  %v939_v41 = vadd.f32 %v875_v31, %v741_v33  ;;  %v616_v42 = vadd.f32 %v1541_v10, %v615_v36  ;;  %v744_v43 = vadd.f32 %v1541_v10, %v743_v38  ;;  %v617_v44 = vpop.f32.mrb[19].mxu0  ;;  %v745_v45 = vpop.f32.mrb[19].mxu1  ;;  %v882_v36 = vld [vmem:[%s2058_s3 + $0x178] sm:$0xff] }
 0x11d   :  { %971 = vst.msk [vmem:[%s2059_s4 + $0x40] sm:$0xff] %vm449_vm0, %v907_v40  ;;  %1003 = vst.msk [vmem:[%s2059_s4 + $0x140] sm:$0xff] %vm449_vm0, %v939_v41  ;;  %v908_v46 = vadd.f32 %v844_v37, %v616_v42  ;;  %v940_v47 = vadd.f32 %v876_v39, %v744_v43 }
 0x11f   :  { %972 = vst.msk [vmem:[%s2059_s4 + $0x48] sm:$0xff] %vm449_vm0, %v908_v46  ;;  %1004 = vst.msk [vmem:[%s2059_s4 + $0x148] sm:$0xff] %vm449_vm0, %v940_v47  ;;  %v851_v46 = vld [vmem:[%s2058_s3 + $0x80] sm:$0xff] }
 0x120   :  { %v620_v48 = vpop.f32.mrb[20].mxu0  ;;  %v748_v50 = vpop.f32.mrb[20].mxu1 }
 0x121   :  { %v621_v52 = vadd.f32 %v1541_v10, %v620_v48  ;;  %v749_v53 = vadd.f32 %v1541_v10, %v748_v50  ;;  %v622_v54 = vpop.f32.mrb[21].mxu0  ;;  %v750_v55 = vpop.f32.mrb[21].mxu1  ;;  %v883_v48 = vld [vmem:[%s2058_s3 + $0x180] sm:$0xff] }
 0x122   :  { %v623_v56 = vpop.f32.mrb[22].mxu0  ;;  %v751_v58 = vpop.f32.mrb[22].mxu1  ;;  %v852_v54 = vld [vmem:[%s2058_s3 + $0x88] sm:$0xff] }
 0x123   :  { %v909_v60 = vadd.f32 %v845_v49, %v621_v52  ;;  %v941_v61 = vadd.f32 %v877_v51, %v749_v53  ;;  %v624_v62 = vadd.f32 %v1541_v10, %v623_v56  ;;  %v752_v63 = vadd.f32 %v1541_v10, %v751_v58  ;;  %v625_v0 = vpop.f32.mrb[23].mxu0  ;;  %v753_v1 = vpop.f32.mrb[23].mxu1  ;;  %v884_v56 = vld [vmem:[%s2058_s3 + $0x188] sm:$0xff] }
 0x125   :  { %973 = vst.msk [vmem:[%s2059_s4 + $0x50] sm:$0xff] %vm449_vm0, %v909_v60  ;;  %1005 = vst.msk [vmem:[%s2059_s4 + $0x150] sm:$0xff] %vm449_vm0, %v941_v61  ;;  %v910_v2 = vadd.f32 %v846_v57, %v624_v62  ;;  %v942_v3 = vadd.f32 %v878_v59, %v752_v63 }
 0x127   :  { %974 = vst.msk [vmem:[%s2059_s4 + $0x58] sm:$0xff] %vm449_vm0, %v910_v2  ;;  %1006 = vst.msk [vmem:[%s2059_s4 + $0x158] sm:$0xff] %vm449_vm0, %v942_v3  ;;  %v853_v2 = vld [vmem:[%s2058_s3 + $0x90] sm:$0xff] }
 0x128   :  { %v628_v4 = vpop.f32.mrb[24].mxu0  ;;  %v756_v6 = vpop.f32.mrb[24].mxu1 }
 0x129   :  { %v629_v8 = vadd.f32 %v1541_v10, %v628_v4  ;;  %v757_v9 = vadd.f32 %v1541_v10, %v756_v6  ;;  %v630_v11 = vpop.f32.mrb[25].mxu0  ;;  %v758_v12 = vpop.f32.mrb[25].mxu1  ;;  %v885_v4 = vld [vmem:[%s2058_s3 + $0x190] sm:$0xff] }
 0x12a   :  { %v631_v13 = vpop.f32.mrb[26].mxu0  ;;  %v759_v15 = vpop.f32.mrb[26].mxu1  ;;  %v854_v11 = vld [vmem:[%s2058_s3 + $0x98] sm:$0xff] }
 0x12b   :  { %v911_v17 = vadd.f32 %v847_v5, %v629_v8  ;;  %v943_v18 = vadd.f32 %v879_v7, %v757_v9  ;;  %v632_v19 = vadd.f32 %v1541_v10, %v631_v13  ;;  %v760_v20 = vadd.f32 %v1541_v10, %v759_v15  ;;  %v633_v21 = vpop.f32.mrb[27].mxu0  ;;  %v761_v22 = vpop.f32.mrb[27].mxu1  ;;  %v886_v13 = vld [vmem:[%s2058_s3 + $0x198] sm:$0xff] }
 0x12d   :  { %975 = vst.msk [vmem:[%s2059_s4 + $0x60] sm:$0xff] %vm449_vm0, %v911_v17  ;;  %1007 = vst.msk [vmem:[%s2059_s4 + $0x160] sm:$0xff] %vm449_vm0, %v943_v18  ;;  %v912_v23 = vadd.f32 %v848_v14, %v632_v19  ;;  %v944_v24 = vadd.f32 %v880_v16, %v760_v20 }
 0x12f   :  { %976 = vst.msk [vmem:[%s2059_s4 + $0x68] sm:$0xff] %vm449_vm0, %v912_v23  ;;  %1008 = vst.msk [vmem:[%s2059_s4 + $0x168] sm:$0xff] %vm449_vm0, %v944_v24  ;;  %v855_v23 = vld [vmem:[%s2058_s3 + $0xa0] sm:$0xff] }
 0x130   :  { %v636_v25 = vpop.f32.mrb[28].mxu0  ;;  %v764_v27 = vpop.f32.mrb[28].mxu1 }
 0x131   :  { %v637_v29 = vadd.f32 %v1541_v10, %v636_v25  ;;  %v765_v30 = vadd.f32 %v1541_v10, %v764_v27  ;;  %v638_v31 = vpop.f32.mrb[29].mxu0  ;;  %v766_v32 = vpop.f32.mrb[29].mxu1  ;;  %v887_v25 = vld [vmem:[%s2058_s3 + $0x1a0] sm:$0xff] }
 0x132   :  { %v639_v33 = vpop.f32.mrb[30].mxu0  ;;  %v767_v35 = vpop.f32.mrb[30].mxu1  ;;  %v856_v31 = vld [vmem:[%s2058_s3 + $0xa8] sm:$0xff] }
 0x133   :  { %v913_v37 = vadd.f32 %v849_v26, %v637_v29  ;;  %v945_v38 = vadd.f32 %v881_v28, %v765_v30  ;;  %v640_v39 = vadd.f32 %v1541_v10, %v639_v33  ;;  %v768_v40 = vadd.f32 %v1541_v10, %v767_v35  ;;  %v641_v41 = vpop.f32.mrb[31].mxu0  ;;  %v769_v42 = vpop.f32.mrb[31].mxu1  ;;  %v888_v33 = vld [vmem:[%s2058_s3 + $0x1a8] sm:$0xff] }
 0x135   :  { %977 = vst.msk [vmem:[%s2059_s4 + $0x70] sm:$0xff] %vm449_vm0, %v913_v37  ;;  %1009 = vst.msk [vmem:[%s2059_s4 + $0x170] sm:$0xff] %vm449_vm0, %v945_v38  ;;  %v914_v43 = vadd.f32 %v850_v34, %v640_v39  ;;  %v946_v44 = vadd.f32 %v882_v36, %v768_v40 }
 0x137   :  { %978 = vst.msk [vmem:[%s2059_s4 + $0x78] sm:$0xff] %vm449_vm0, %v914_v43  ;;  %1010 = vst.msk [vmem:[%s2059_s4 + $0x178] sm:$0xff] %vm449_vm0, %v946_v44  ;;  %v857_v43 = vld [vmem:[%s2058_s3 + $0xb0] sm:$0xff] }
 0x138   :  { %v644_v45 = vpop.f32.mrb[32].mxu0  ;;  %v772_v47 = vpop.f32.mrb[32].mxu1 }
 0x139   :  { %v645_v49 = vadd.f32 %v1541_v10, %v644_v45  ;;  %v773_v50 = vadd.f32 %v1541_v10, %v772_v47  ;;  %v646_v51 = vpop.f32.mrb[33].mxu0  ;;  %v774_v52 = vpop.f32.mrb[33].mxu1  ;;  %v889_v45 = vld [vmem:[%s2058_s3 + $0x1b0] sm:$0xff] }
 0x13a   :  { %v647_v53 = vpop.f32.mrb[34].mxu0  ;;  %v775_v55 = vpop.f32.mrb[34].mxu1  ;;  %v858_v51 = vld [vmem:[%s2058_s3 + $0xb8] sm:$0xff] }
 0x13b   :  { %v915_v57 = vadd.f32 %v851_v46, %v645_v49  ;;  %v947_v58 = vadd.f32 %v883_v48, %v773_v50  ;;  %v648_v59 = vadd.f32 %v1541_v10, %v647_v53  ;;  %v776_v60 = vadd.f32 %v1541_v10, %v775_v55  ;;  %v649_v61 = vpop.f32.mrb[35].mxu0  ;;  %v777_v62 = vpop.f32.mrb[35].mxu1  ;;  %v890_v53 = vld [vmem:[%s2058_s3 + $0x1b8] sm:$0xff] }
 0x13d   :  { %979 = vst.msk [vmem:[%s2059_s4 + $0x80] sm:$0xff] %vm449_vm0, %v915_v57  ;;  %1011 = vst.msk [vmem:[%s2059_s4 + $0x180] sm:$0xff] %vm449_vm0, %v947_v58  ;;  %v916_v63 = vadd.f32 %v852_v54, %v648_v59  ;;  %v948_v0 = vadd.f32 %v884_v56, %v776_v60 }
 0x13f   :  { %980 = vst.msk [vmem:[%s2059_s4 + $0x88] sm:$0xff] %vm449_vm0, %v916_v63  ;;  %1012 = vst.msk [vmem:[%s2059_s4 + $0x188] sm:$0xff] %vm449_vm0, %v948_v0  ;;  %v859_v63 = vld [vmem:[%s2058_s3 + $0xc0] sm:$0xff] }
 0x140   :  { %v652_v1 = vpop.f32.mrb[36].mxu0  ;;  %v780_v3 = vpop.f32.mrb[36].mxu1 }
 0x141   :  { %v653_v5 = vadd.f32 %v1541_v10, %v652_v1  ;;  %v781_v6 = vadd.f32 %v1541_v10, %v780_v3  ;;  %v654_v7 = vpop.f32.mrb[37].mxu0  ;;  %v782_v8 = vpop.f32.mrb[37].mxu1  ;;  %v891_v1 = vld [vmem:[%s2058_s3 + $0x1c0] sm:$0xff] }
 0x142   :  { %v655_v9 = vpop.f32.mrb[38].mxu0  ;;  %v783_v12 = vpop.f32.mrb[38].mxu1  ;;  %v860_v7 = vld [vmem:[%s2058_s3 + $0xc8] sm:$0xff] }
 0x143   :  { %v917_v14 = vadd.f32 %v853_v2, %v653_v5  ;;  %v949_v15 = vadd.f32 %v885_v4, %v781_v6  ;;  %v656_v16 = vadd.f32 %v1541_v10, %v655_v9  ;;  %v784_v17 = vadd.f32 %v1541_v10, %v783_v12  ;;  %v657_v18 = vpop.f32.mrb[39].mxu0  ;;  %v785_v19 = vpop.f32.mrb[39].mxu1  ;;  %v892_v9 = vld [vmem:[%s2058_s3 + $0x1c8] sm:$0xff] }
 0x145   :  { %981 = vst.msk [vmem:[%s2059_s4 + $0x90] sm:$0xff] %vm449_vm0, %v917_v14  ;;  %1013 = vst.msk [vmem:[%s2059_s4 + $0x190] sm:$0xff] %vm449_vm0, %v949_v15  ;;  %v918_v20 = vadd.f32 %v854_v11, %v656_v16  ;;  %v950_v21 = vadd.f32 %v886_v13, %v784_v17 }
 0x147   :  { %982 = vst.msk [vmem:[%s2059_s4 + $0x98] sm:$0xff] %vm449_vm0, %v918_v20  ;;  %1014 = vst.msk [vmem:[%s2059_s4 + $0x198] sm:$0xff] %vm449_vm0, %v950_v21  ;;  %v861_v20 = vld [vmem:[%s2058_s3 + $0xd0] sm:$0xff] }
 0x148   :  { %v660_v22 = vpop.f32.mrb[40].mxu0  ;;  %v788_v24 = vpop.f32.mrb[40].mxu1 }
 0x149   :  { %v661_v26 = vadd.f32 %v1541_v10, %v660_v22  ;;  %v789_v27 = vadd.f32 %v1541_v10, %v788_v24  ;;  %v662_v28 = vpop.f32.mrb[41].mxu0  ;;  %v790_v29 = vpop.f32.mrb[41].mxu1  ;;  %v893_v22 = vld [vmem:[%s2058_s3 + $0x1d0] sm:$0xff] }
 0x14a   :  { %v663_v30 = vpop.f32.mrb[42].mxu0  ;;  %v791_v32 = vpop.f32.mrb[42].mxu1  ;;  %v862_v28 = vld [vmem:[%s2058_s3 + $0xd8] sm:$0xff] }
 0x14b   :  { %v919_v34 = vadd.f32 %v855_v23, %v661_v26  ;;  %v951_v35 = vadd.f32 %v887_v25, %v789_v27  ;;  %v664_v36 = vadd.f32 %v1541_v10, %v663_v30  ;;  %v792_v37 = vadd.f32 %v1541_v10, %v791_v32  ;;  %v665_v38 = vpop.f32.mrb[43].mxu0  ;;  %v793_v39 = vpop.f32.mrb[43].mxu1  ;;  %v894_v30 = vld [vmem:[%s2058_s3 + $0x1d8] sm:$0xff] }
 0x14d   :  { %983 = vst.msk [vmem:[%s2059_s4 + $0xa0] sm:$0xff] %vm449_vm0, %v919_v34  ;;  %1015 = vst.msk [vmem:[%s2059_s4 + $0x1a0] sm:$0xff] %vm449_vm0, %v951_v35  ;;  %v920_v40 = vadd.f32 %v856_v31, %v664_v36  ;;  %v952_v41 = vadd.f32 %v888_v33, %v792_v37 }
 0x14f   :  { %984 = vst.msk [vmem:[%s2059_s4 + $0xa8] sm:$0xff] %vm449_vm0, %v920_v40  ;;  %1016 = vst.msk [vmem:[%s2059_s4 + $0x1a8] sm:$0xff] %vm449_vm0, %v952_v41  ;;  %v863_v40 = vld [vmem:[%s2058_s3 + $0xe0] sm:$0xff] }
 0x150   :  { %v668_v42 = vpop.f32.mrb[44].mxu0  ;;  %v796_v44 = vpop.f32.mrb[44].mxu1 }
 0x151   :  { %v669_v46 = vadd.f32 %v1541_v10, %v668_v42  ;;  %v797_v47 = vadd.f32 %v1541_v10, %v796_v44  ;;  %v670_v48 = vpop.f32.mrb[45].mxu0  ;;  %v798_v49 = vpop.f32.mrb[45].mxu1  ;;  %v895_v42 = vld [vmem:[%s2058_s3 + $0x1e0] sm:$0xff] }
 0x152   :  { %v671_v50 = vpop.f32.mrb[46].mxu0  ;;  %v799_v52 = vpop.f32.mrb[46].mxu1  ;;  %v864_v48 = vld [vmem:[%s2058_s3 + $0xe8] sm:$0xff] }
 0x153   :  { %v921_v54 = vadd.f32 %v857_v43, %v669_v46  ;;  %v953_v55 = vadd.f32 %v889_v45, %v797_v47  ;;  %v672_v56 = vadd.f32 %v1541_v10, %v671_v50  ;;  %v800_v57 = vadd.f32 %v1541_v10, %v799_v52  ;;  %v673_v58 = vpop.f32.mrb[47].mxu0  ;;  %v801_v59 = vpop.f32.mrb[47].mxu1  ;;  %v896_v50 = vld [vmem:[%s2058_s3 + $0x1e8] sm:$0xff] }
 0x155   :  { %985 = vst.msk [vmem:[%s2059_s4 + $0xb0] sm:$0xff] %vm449_vm0, %v921_v54  ;;  %1017 = vst.msk [vmem:[%s2059_s4 + $0x1b0] sm:$0xff] %vm449_vm0, %v953_v55  ;;  %v922_v60 = vadd.f32 %v858_v51, %v672_v56  ;;  %v954_v61 = vadd.f32 %v890_v53, %v800_v57 }
 0x157   :  { %986 = vst.msk [vmem:[%s2059_s4 + $0xb8] sm:$0xff] %vm449_vm0, %v922_v60  ;;  %1018 = vst.msk [vmem:[%s2059_s4 + $0x1b8] sm:$0xff] %vm449_vm0, %v954_v61  ;;  %v865_v60 = vld [vmem:[%s2058_s3 + $0xf0] sm:$0xff] }
 0x158   :  { %v676_v62 = vpop.f32.mrb[48].mxu0  ;;  %v804_v0 = vpop.f32.mrb[48].mxu1 }
 0x159   :  { %v677_v2 = vadd.f32 %v1541_v10, %v676_v62  ;;  %v805_v3 = vadd.f32 %v1541_v10, %v804_v0  ;;  %v678_v4 = vpop.f32.mrb[49].mxu0  ;;  %v806_v5 = vpop.f32.mrb[49].mxu1  ;;  %v897_v62 = vld [vmem:[%s2058_s3 + $0x1f0] sm:$0xff] }
 0x15a   :  { %v679_v6 = vpop.f32.mrb[50].mxu0  ;;  %v807_v8 = vpop.f32.mrb[50].mxu1  ;;  %v866_v4 = vld [vmem:[%s2058_s3 + $0xf8] sm:$0xff] }
 0x15b   :  { %v923_v11 = vadd.f32 %v859_v63, %v677_v2  ;;  %v955_v12 = vadd.f32 %v891_v1, %v805_v3  ;;  %v680_v13 = vadd.f32 %v1541_v10, %v679_v6  ;;  %v808_v14 = vadd.f32 %v1541_v10, %v807_v8  ;;  %v681_v15 = vpop.f32.mrb[51].mxu0  ;;  %v809_v16 = vpop.f32.mrb[51].mxu1  ;;  %v898_v6 = vld [vmem:[%s2058_s3 + $0x1f8] sm:$0xff] }
 0x15d   :  { %987 = vst.msk [vmem:[%s2059_s4 + $0xc0] sm:$0xff] %vm449_vm0, %v923_v11  ;;  %1019 = vst.msk [vmem:[%s2059_s4 + $0x1c0] sm:$0xff] %vm449_vm0, %v955_v12  ;;  %v924_v17 = vadd.f32 %v860_v7, %v680_v13  ;;  %v956_v18 = vadd.f32 %v892_v9, %v808_v14 }
 0x15f   :  { %988 = vst.msk [vmem:[%s2059_s4 + $0xc8] sm:$0xff] %vm449_vm0, %v924_v17  ;;  %1020 = vst.msk [vmem:[%s2059_s4 + $0x1c8] sm:$0xff] %vm449_vm0, %v956_v18 }
 0x160   :  { %v684_v19 = vpop.f32.mrb[52].mxu0  ;;  %v812_v21 = vpop.f32.mrb[52].mxu1 }
 0x161   :  { %v685_v23 = vadd.f32 %v1541_v10, %v684_v19  ;;  %v813_v24 = vadd.f32 %v1541_v10, %v812_v21  ;;  %v686_v25 = vpop.f32.mrb[53].mxu0  ;;  %v814_v26 = vpop.f32.mrb[53].mxu1 }
 0x162   :  { %v687_v27 = vpop.f32.mrb[54].mxu0  ;;  %v815_v29 = vpop.f32.mrb[54].mxu1 }
 0x163   :  { %v925_v31 = vadd.f32 %v861_v20, %v685_v23  ;;  %v957_v32 = vadd.f32 %v893_v22, %v813_v24  ;;  %v688_v33 = vadd.f32 %v1541_v10, %v687_v27  ;;  %v816_v34 = vadd.f32 %v1541_v10, %v815_v29  ;;  %v689_v35 = vpop.f32.mrb[55].mxu0  ;;  %v817_v36 = vpop.f32.mrb[55].mxu1 }
 0x165   :  { %989 = vst.msk [vmem:[%s2059_s4 + $0xd0] sm:$0xff] %vm449_vm0, %v925_v31  ;;  %1021 = vst.msk [vmem:[%s2059_s4 + $0x1d0] sm:$0xff] %vm449_vm0, %v957_v32  ;;  %v926_v37 = vadd.f32 %v862_v28, %v688_v33  ;;  %v958_v38 = vadd.f32 %v894_v30, %v816_v34 }
 0x167   :  { %990 = vst.msk [vmem:[%s2059_s4 + $0xd8] sm:$0xff] %vm449_vm0, %v926_v37  ;;  %1022 = vst.msk [vmem:[%s2059_s4 + $0x1d8] sm:$0xff] %vm449_vm0, %v958_v38 }
 0x168   :  { %v692_v39 = vpop.f32.mrb[56].mxu0  ;;  %v820_v41 = vpop.f32.mrb[56].mxu1 }
 0x169   :  { %v693_v43 = vadd.f32 %v1541_v10, %v692_v39  ;;  %v821_v44 = vadd.f32 %v1541_v10, %v820_v41  ;;  %v694_v45 = vpop.f32.mrb[57].mxu0  ;;  %v822_v46 = vpop.f32.mrb[57].mxu1 }
 0x16a   :  { %v695_v47 = vpop.f32.mrb[58].mxu0  ;;  %v823_v49 = vpop.f32.mrb[58].mxu1 }
 0x16b   :  { %v927_v51 = vadd.f32 %v863_v40, %v693_v43  ;;  %v959_v52 = vadd.f32 %v895_v42, %v821_v44  ;;  %v696_v53 = vadd.f32 %v1541_v10, %v695_v47  ;;  %v824_v54 = vadd.f32 %v1541_v10, %v823_v49  ;;  %v697_v55 = vpop.f32.mrb[59].mxu0  ;;  %v825_v56 = vpop.f32.mrb[59].mxu1 }
 0x16d   :  { %991 = vst.msk [vmem:[%s2059_s4 + $0xe0] sm:$0xff] %vm449_vm0, %v927_v51  ;;  %1023 = vst.msk [vmem:[%s2059_s4 + $0x1e0] sm:$0xff] %vm449_vm0, %v959_v52  ;;  %v928_v57 = vadd.f32 %v864_v48, %v696_v53  ;;  %v960_v58 = vadd.f32 %v896_v50, %v824_v54 }
 0x16f   :  { %992 = vst.msk [vmem:[%s2059_s4 + $0xe8] sm:$0xff] %vm449_vm0, %v928_v57  ;;  %1024 = vst.msk [vmem:[%s2059_s4 + $0x1e8] sm:$0xff] %vm449_vm0, %v960_v58 }
 0x170   :  { %v700_v59 = vpop.f32.mrb[60].mxu0  ;;  %v828_v61 = vpop.f32.mrb[60].mxu1 }
 0x171   :  { %v701_v63 = vadd.f32 %v1541_v10, %v700_v59  ;;  %v829_v0 = vadd.f32 %v1541_v10, %v828_v61  ;;  %v702_v1 = vpop.f32.mrb[61].mxu0  ;;  %v830_v2 = vpop.f32.mrb[61].mxu1 }
 0x172   :  { %v703_v3 = vpop.f32.mrb[62].mxu0  ;;  %v831_v5 = vpop.f32.mrb[62].mxu1 }
 0x173   :  { %v929_v7 = vadd.f32 %v865_v60, %v701_v63  ;;  %v961_v8 = vadd.f32 %v897_v62, %v829_v0  ;;  %v704_v9 = vadd.f32 %v1541_v10, %v703_v3  ;;  %v832_v11 = vadd.f32 %v1541_v10, %v831_v5  ;;  %v705_v12 = vpop.f32.mrb[63].mxu0  ;;  %v833_v13 = vpop.f32.mrb[63].mxu1 }
 0x175   :  { %993 = vst.msk [vmem:[%s2059_s4 + $0xf0] sm:$0xff] %vm449_vm0, %v929_v7  ;;  %1025 = vst.msk [vmem:[%s2059_s4 + $0x1f0] sm:$0xff] %vm449_vm0, %v961_v8  ;;  %v930_v14 = vadd.f32 %v866_v4, %v704_v9  ;;  %v962_v15 = vadd.f32 %v898_v6, %v832_v11 }
 0x177   :  { %994 = vst.msk [vmem:[%s2059_s4 + $0xf8] sm:$0xff] %vm449_vm0, %v930_v14  ;;  %1026 = vst.msk [vmem:[%s2059_s4 + $0x1f8] sm:$0xff] %vm449_vm0, %v962_v15 }

// kernel: generator_forward.15
= control target key start
LH: loop header
LB: loop body
LE: loop exit
PB: predicated region body
PF: predicated region fallthrough
CT: control target
= control target key end

     0   :  { %v1322_v0 = vmov 0   ;;  %vm446_vm0 = vcmask 130048   ;;  %s1855_s1 = inlined_call_operand.vmem [shape: bf16[144,128], index: 1, kind: input, shape index: {}]   ;;  %s1856_s0 = inlined_call_operand.vmem [shape: bf16[512,144], index: 0, kind: input, shape index: {}]   ;;  %s1857_s2 = inlined_call_operand.vmem [shape: f32[1,128], index: 2, kind: input, shape index: {}]   ;;  %s1858_s3 = inlined_call_operand.vmem [shape: f32[512,128], index: 3, kind: output, shape index: {}]  }
   0x1   :  { %543 = vmatprep.subr.bf16.mxu0 %v1322_v0  ;;  %1070 = vmatprep.subr.bf16.mxu1 %v1322_v0  ;;  %v1089_v1 = vld [vmem:[%s1855_s1] sm:$0xff]   ;;  %v1090_v2 = vld [vmem:[%s1855_s1 + $0x8] sm:$0xff]   ;;  %v1091_v3 = vld [vmem:[%s1855_s1 + $0x10] sm:$0xff]  }
   0x2   :  { %544 = vmatpush1.bf16.msra.mxu0 %v1089_v1  ;;  %1079 = vmatpush1.bf16.msra.mxu1 %v1089_v1  ;;  %v1092_v4 = vld [vmem:[%s1855_s1 + $0x18] sm:$0xff]   ;;  %v1100_v5 = vld [vmem:[%s1856_s0 + $0x4] ss:$8 sps:$4 sm:$0xff]   ;;  %v1095_v9 = vld [vmem:[%s1855_s1 + $0x30] sm:$0xff]  }
   0x3   :  { %545 = vmatprep.subr.bf16.mxu0 %v1322_v0  ;;  %1071 = vmatprep.subr.bf16.mxu1 %v1322_v0  ;;  %v1103_v6 = vld [vmem:[%s1856_s0 + $0x104] ss:$8 sps:$4 sm:$0xff]   ;;  %v1096_v10 = vld [vmem:[%s1855_s1 + $0x38] sm:$0xff]   ;;  %v1098_v12 = vld [vmem:[%s1856_s0] ss:$8 sps:$4 sm:$0xff]  }
   0x4   :  { %1038 = vmatprep.mubr.msk.bf16.mxu0 %vm446_vm0, %v1100_v5  ;;  %1054 = vmatprep.mubr.msk.bf16.mxu1 %vm446_vm0, %v1103_v6  ;;  %v1093_v7 = vld [vmem:[%s1855_s1 + $0x20] sm:$0xff]   ;;  %v1094_v8 = vld [vmem:[%s1855_s1 + $0x28] sm:$0xff]   ;;  %v1104_v14 = vld [vmem:[%s1856_s0 + $0x14] ss:$8 sps:$4 sm:$0xff]  }
   0x5   :  { %v1097_v11 = vld [vmem:[%s1855_s1 + $0x40] sm:$0xff]   ;;  %v1106_v15 = vld [vmem:[%s1856_s0 + $0x114] ss:$8 sps:$4 sm:$0xff]   ;;  %v1108_v16 = vld [vmem:[%s1856_s0 + $0x10] ss:$8 sps:$4 sm:$0xff]  }
   0x6   :  { %546 = vmatpush1.bf16.msra.mxu0 %v1090_v2  ;;  %1080 = vmatpush1.bf16.msra.mxu1 %v1090_v2  ;;  %v1101_v13 = vld [vmem:[%s1856_s0 + $0x100] ss:$8 sps:$4 sm:$0xff]   ;;  %v1109_v17 = vld [vmem:[%s1856_s0 + $0x110] ss:$8 sps:$4 sm:$0xff]   ;;  %v1110_v18 = vld [vmem:[%s1856_s0 + $0x24] ss:$8 sps:$4 sm:$0xff]  }
   0x7   :  { %547 = vmatprep.subr.bf16.mxu0 %v1322_v0  ;;  %1072 = vmatprep.subr.bf16.mxu1 %v1322_v0  ;;  %v1112_v19 = vld [vmem:[%s1856_s0 + $0x124] ss:$8 sps:$4 sm:$0xff]   ;;  %v1114_v20 = vld [vmem:[%s1856_s0 + $0x20] ss:$8 sps:$4 sm:$0xff]   ;;  %v1116_v22 = vld [vmem:[%s1856_s0 + $0x34] ss:$8 sps:$4 sm:$0xff]  }
   0x8   :  { %v1115_v21 = vld [vmem:[%s1856_s0 + $0x120] ss:$8 sps:$4 sm:$0xff]   ;;  %v1118_v23 = vld [vmem:[%s1856_s0 + $0x134] ss:$8 sps:$4 sm:$0xff]   ;;  %v1120_v24 = vld [vmem:[%s1856_s0 + $0x30] ss:$8 sps:$4 sm:$0xff]  }
   0x9   :  { %v1121_v25 = vld [vmem:[%s1856_s0 + $0x130] ss:$8 sps:$4 sm:$0xff]   ;;  %v1122_v26 = vld [vmem:[%s1856_s0 + $0x44] ss:$8 sps:$4 sm:$0xff]   ;;  %v1126_v28 = vld [vmem:[%s1856_s0 + $0x40] ss:$8 sps:$4 sm:$0xff]  }
   0xa   :  { %548 = vmatpush1.bf16.msra.mxu0 %v1091_v3  ;;  %1081 = vmatpush1.bf16.msra.mxu1 %v1091_v3  ;;  %v1124_v27 = vld [vmem:[%s1856_s0 + $0x144] ss:$8 sps:$4 sm:$0xff]   ;;  %v1127_v29 = vld [vmem:[%s1856_s0 + $0x140] ss:$8 sps:$4 sm:$0xff]   ;;  %v1128_v30 = vld [vmem:[%s1856_s0 + $0x54] ss:$8 sps:$4 sm:$0xff]  }
   0xb   :  { %549 = vmatprep.subr.bf16.mxu0 %v1322_v0  ;;  %1073 = vmatprep.subr.bf16.mxu1 %v1322_v0  ;;  %v1130_v31 = vld [vmem:[%s1856_s0 + $0x154] ss:$8 sps:$4 sm:$0xff]   ;;  %v1132_v32 = vld [vmem:[%s1856_s0 + $0x50] ss:$8 sps:$4 sm:$0xff]   ;;  %v1134_v34 = vld [vmem:[%s1856_s0 + $0x64] ss:$8 sps:$4 sm:$0xff]  }
   0xc   :  { %v1133_v33 = vld [vmem:[%s1856_s0 + $0x150] ss:$8 sps:$4 sm:$0xff]   ;;  %v1136_v35 = vld [vmem:[%s1856_s0 + $0x164] ss:$8 sps:$4 sm:$0xff]   ;;  %v1138_v36 = vld [vmem:[%s1856_s0 + $0x60] ss:$8 sps:$4 sm:$0xff]  }
   0xd   :  { %v1139_v37 = vld [vmem:[%s1856_s0 + $0x160] ss:$8 sps:$4 sm:$0xff]   ;;  %v1140_v38 = vld [vmem:[%s1856_s0 + $0x74] ss:$8 sps:$4 sm:$0xff]   ;;  %v1144_v40 = vld [vmem:[%s1856_s0 + $0x70] ss:$8 sps:$4 sm:$0xff]  }
   0xe   :  { %550 = vmatpush1.bf16.msra.mxu0 %v1092_v4  ;;  %1082 = vmatpush1.bf16.msra.mxu1 %v1092_v4  ;;  %v1142_v39 = vld [vmem:[%s1856_s0 + $0x174] ss:$8 sps:$4 sm:$0xff]   ;;  %v1145_v41 = vld [vmem:[%s1856_s0 + $0x170] ss:$8 sps:$4 sm:$0xff]   ;;  %v1146_v42 = vld [vmem:[%s1856_s0 + $0x84] ss:$8 sps:$4 sm:$0xff]  }
   0xf   :  { %551 = vmatprep.subr.bf16.mxu0 %v1322_v0  ;;  %1074 = vmatprep.subr.bf16.mxu1 %v1322_v0  ;;  %v1148_v43 = vld [vmem:[%s1856_s0 + $0x184] ss:$8 sps:$4 sm:$0xff]   ;;  %v1150_v44 = vld [vmem:[%s1856_s0 + $0x80] ss:$8 sps:$4 sm:$0xff]   ;;  %v1152_v46 = vld [vmem:[%s1856_s0 + $0x94] ss:$8 sps:$4 sm:$0xff]  }
  0x10   :  { %v1151_v45 = vld [vmem:[%s1856_s0 + $0x180] ss:$8 sps:$4 sm:$0xff]   ;;  %v1154_v47 = vld [vmem:[%s1856_s0 + $0x194] ss:$8 sps:$4 sm:$0xff]   ;;  %v1156_v48 = vld [vmem:[%s1856_s0 + $0x90] ss:$8 sps:$4 sm:$0xff]  }
  0x11   :  { %v1157_v49 = vld [vmem:[%s1856_s0 + $0x190] ss:$8 sps:$4 sm:$0xff]   ;;  %v1158_v50 = vld [vmem:[%s1856_s0 + $0xa4] ss:$8 sps:$4 sm:$0xff]   ;;  %v1162_v52 = vld [vmem:[%s1856_s0 + $0xa0] ss:$8 sps:$4 sm:$0xff]  }
  0x12   :  { %552 = vmatpush1.bf16.msra.mxu0 %v1093_v7  ;;  %1083 = vmatpush1.bf16.msra.mxu1 %v1093_v7  ;;  %v1160_v51 = vld [vmem:[%s1856_s0 + $0x1a4] ss:$8 sps:$4 sm:$0xff]   ;;  %v1163_v53 = vld [vmem:[%s1856_s0 + $0x1a0] ss:$8 sps:$4 sm:$0xff]   ;;  %v1164_v54 = vld [vmem:[%s1856_s0 + $0xb4] ss:$8 sps:$4 sm:$0xff]  }
  0x13   :  { %553 = vmatprep.subr.bf16.mxu0 %v1322_v0  ;;  %1075 = vmatprep.subr.bf16.mxu1 %v1322_v0  ;;  %v1166_v55 = vld [vmem:[%s1856_s0 + $0x1b4] ss:$8 sps:$4 sm:$0xff]   ;;  %v1168_v56 = vld [vmem:[%s1856_s0 + $0xb0] ss:$8 sps:$4 sm:$0xff]   ;;  %v1170_v58 = vld [vmem:[%s1856_s0 + $0xc4] ss:$8 sps:$4 sm:$0xff]  }
  0x14   :  { %v1169_v57 = vld [vmem:[%s1856_s0 + $0x1b0] ss:$8 sps:$4 sm:$0xff]   ;;  %v1172_v59 = vld [vmem:[%s1856_s0 + $0x1c4] ss:$8 sps:$4 sm:$0xff]   ;;  %v1174_v60 = vld [vmem:[%s1856_s0 + $0xc0] ss:$8 sps:$4 sm:$0xff]  }
  0x15   :  { %v1175_v61 = vld [vmem:[%s1856_s0 + $0x1c0] ss:$8 sps:$4 sm:$0xff]   ;;  %v1176_v62 = vld [vmem:[%s1856_s0 + $0xd4] ss:$8 sps:$4 sm:$0xff]   ;;  %v1181_v1 = vld [vmem:[%s1856_s0 + $0x1d0] ss:$8 sps:$4 sm:$0xff]  }
  0x16   :  { %554 = vmatpush1.bf16.msra.mxu0 %v1094_v8  ;;  %1084 = vmatpush1.bf16.msra.mxu1 %v1094_v8  ;;  %v1178_v63 = vld [vmem:[%s1856_s0 + $0x1d4] ss:$8 sps:$4 sm:$0xff]   ;;  %v1182_v2 = vld [vmem:[%s1856_s0 + $0xe4] ss:$8 sps:$4 sm:$0xff]   ;;  %v1186_v4 = vld [vmem:[%s1856_s0 + $0xe0] ss:$8 sps:$4 sm:$0xff]  }
  0x17   :  { %555 = vmatprep.subr.bf16.mxu0 %v1322_v0  ;;  %1076 = vmatprep.subr.bf16.mxu1 %v1322_v0  ;;  %v1184_v3 = vld [vmem:[%s1856_s0 + $0x1e4] ss:$8 sps:$4 sm:$0xff]   ;;  %v1187_v5 = vld [vmem:[%s1856_s0 + $0x1e0] ss:$8 sps:$4 sm:$0xff]   ;;  %v1188_v6 = vld [vmem:[%s1856_s0 + $0xf4] ss:$8 sps:$4 sm:$0xff]  }
  0x18   :  { %v1190_v7 = vld [vmem:[%s1856_s0 + $0x1f4] ss:$8 sps:$4 sm:$0xff]   ;;  %v1192_v8 = vld [vmem:[%s1856_s0 + $0xf0] ss:$8 sps:$4 sm:$0xff]  }
  0x1a   :  { %556 = vmatpush1.bf16.msra.mxu0 %v1095_v9  ;;  %1085 = vmatpush1.bf16.msra.mxu1 %v1095_v9  ;;  %v1193_v9 = vld [vmem:[%s1856_s0 + $0x1f0] ss:$8 sps:$4 sm:$0xff]  }
  0x1b   :  { %557 = vmatprep.subr.bf16.mxu0 %v1322_v0  ;;  %1077 = vmatprep.subr.bf16.mxu1 %v1322_v0 }
  0x1e   :  { %558 = vmatpush1.bf16.msra.mxu0 %v1096_v10  ;;  %1086 = vmatpush1.bf16.msra.mxu1 %v1096_v10  ;;  %v1597_v10 = vld [vmem:[%s1857_s2] ss:$0 sm:$0xff] }
  0x1f   :  { %559 = vmatprep.subr.bf16.mxu0 %v1322_v0  ;;  %1078 = vmatprep.subr.bf16.mxu1 %v1322_v0  ;;  %v1180_v0 = vld [vmem:[%s1856_s0 + $0xd0] ss:$8 sps:$4 sm:$0xff]  }
  0x22   :  { %560 = vmatpush1.bf16.msra.mxu0 %v1097_v11  ;;  %1087 = vmatpush1.bf16.msra.mxu1 %v1097_v11 }
  0x25   :  { %576 = vmatmul.mubr.bf16.vlgmr.msra.gmra.mrb[0].mxu0 %v1098_v12  ;;  %704 = vmatmul.mubr.bf16.vlgmr.msra.gmra.mrb[0].mxu1 %v1101_v13 }
  0x26   :  { %1039 = vmatprep.mubr.msk.bf16.mxu0 %vm446_vm0, %v1104_v14  ;;  %1055 = vmatprep.mubr.msk.bf16.mxu1 %vm446_vm0, %v1106_v15 }
  0x2d   :  { %584 = vmatmul.mubr.bf16.gmra.mrb[4].mxu0 %v1108_v16  ;;  %712 = vmatmul.mubr.bf16.gmra.mrb[4].mxu1 %v1109_v17 }
  0x2e   :  { %1040 = vmatprep.mubr.msk.bf16.mxu0 %vm446_vm0, %v1110_v18  ;;  %1056 = vmatprep.mubr.msk.bf16.mxu1 %vm446_vm0, %v1112_v19 }
  0x35   :  { %592 = vmatmul.mubr.bf16.gmra.mrb[8].mxu0 %v1114_v20  ;;  %720 = vmatmul.mubr.bf16.gmra.mrb[8].mxu1 %v1115_v21 }
  0x36   :  { %1041 = vmatprep.mubr.msk.bf16.mxu0 %vm446_vm0, %v1116_v22  ;;  %1057 = vmatprep.mubr.msk.bf16.mxu1 %vm446_vm0, %v1118_v23 }
  0x3d   :  { %600 = vmatmul.mubr.bf16.gmra.mrb[12].mxu0 %v1120_v24  ;;  %728 = vmatmul.mubr.bf16.gmra.mrb[12].mxu1 %v1121_v25 }
  0x3e   :  { %1042 = vmatprep.mubr.msk.bf16.mxu0 %vm446_vm0, %v1122_v26  ;;  %1058 = vmatprep.mubr.msk.bf16.mxu1 %vm446_vm0, %v1124_v27 }
  0x45   :  { %608 = vmatmul.mubr.bf16.gmra.mrb[16].mxu0 %v1126_v28  ;;  %736 = vmatmul.mubr.bf16.gmra.mrb[16].mxu1 %v1127_v29 }
  0x46   :  { %1043 = vmatprep.mubr.msk.bf16.mxu0 %vm446_vm0, %v1128_v30  ;;  %1059 = vmatprep.mubr.msk.bf16.mxu1 %vm446_vm0, %v1130_v31 }
  0x4d   :  { %616 = vmatmul.mubr.bf16.gmra.mrb[20].mxu0 %v1132_v32  ;;  %744 = vmatmul.mubr.bf16.gmra.mrb[20].mxu1 %v1133_v33 }
  0x4e   :  { %1044 = vmatprep.mubr.msk.bf16.mxu0 %vm446_vm0, %v1134_v34  ;;  %1060 = vmatprep.mubr.msk.bf16.mxu1 %vm446_vm0, %v1136_v35 }
  0x55   :  { %624 = vmatmul.mubr.bf16.gmra.mrb[24].mxu0 %v1138_v36  ;;  %752 = vmatmul.mubr.bf16.gmra.mrb[24].mxu1 %v1139_v37 }
  0x56   :  { %1045 = vmatprep.mubr.msk.bf16.mxu0 %vm446_vm0, %v1140_v38  ;;  %1061 = vmatprep.mubr.msk.bf16.mxu1 %vm446_vm0, %v1142_v39 }
  0x5d   :  { %632 = vmatmul.mubr.bf16.gmra.mrb[28].mxu0 %v1144_v40  ;;  %760 = vmatmul.mubr.bf16.gmra.mrb[28].mxu1 %v1145_v41 }
  0x5e   :  { %1046 = vmatprep.mubr.msk.bf16.mxu0 %vm446_vm0, %v1146_v42  ;;  %1062 = vmatprep.mubr.msk.bf16.mxu1 %vm446_vm0, %v1148_v43 }
  0x65   :  { %640 = vmatmul.mubr.bf16.gmra.mrb[32].mxu0 %v1150_v44  ;;  %768 = vmatmul.mubr.bf16.gmra.mrb[32].mxu1 %v1151_v45 }
  0x66   :  { %1047 = vmatprep.mubr.msk.bf16.mxu0 %vm446_vm0, %v1152_v46  ;;  %1063 = vmatprep.mubr.msk.bf16.mxu1 %vm446_vm0, %v1154_v47 }
  0x6d   :  { %648 = vmatmul.mubr.bf16.gmra.mrb[36].mxu0 %v1156_v48  ;;  %776 = vmatmul.mubr.bf16.gmra.mrb[36].mxu1 %v1157_v49 }
  0x6e   :  { %1048 = vmatprep.mubr.msk.bf16.mxu0 %vm446_vm0, %v1158_v50  ;;  %1064 = vmatprep.mubr.msk.bf16.mxu1 %vm446_vm0, %v1160_v51 }
  0x75   :  { %656 = vmatmul.mubr.bf16.gmra.mrb[40].mxu0 %v1162_v52  ;;  %784 = vmatmul.mubr.bf16.gmra.mrb[40].mxu1 %v1163_v53 }
  0x76   :  { %1049 = vmatprep.mubr.msk.bf16.mxu0 %vm446_vm0, %v1164_v54  ;;  %1065 = vmatprep.mubr.msk.bf16.mxu1 %vm446_vm0, %v1166_v55 }
  0x7d   :  { %664 = vmatmul.mubr.bf16.gmra.mrb[44].mxu0 %v1168_v56  ;;  %792 = vmatmul.mubr.bf16.gmra.mrb[44].mxu1 %v1169_v57 }
  0x7e   :  { %1050 = vmatprep.mubr.msk.bf16.mxu0 %vm446_vm0, %v1170_v58  ;;  %1066 = vmatprep.mubr.msk.bf16.mxu1 %vm446_vm0, %v1172_v59 }
  0x85   :  { %672 = vmatmul.mubr.bf16.gmra.mrb[48].mxu0 %v1174_v60  ;;  %800 = vmatmul.mubr.bf16.gmra.mrb[48].mxu1 %v1175_v61 }
  0x86   :  { %1051 = vmatprep.mubr.msk.bf16.mxu0 %vm446_vm0, %v1176_v62  ;;  %1067 = vmatprep.mubr.msk.bf16.mxu1 %vm446_vm0, %v1178_v63 }
  0x8d   :  { %680 = vmatmul.mubr.bf16.gmra.mrb[52].mxu0 %v1180_v0  ;;  %808 = vmatmul.mubr.bf16.gmra.mrb[52].mxu1 %v1181_v1 }
  0x8e   :  { %1052 = vmatprep.mubr.msk.bf16.mxu0 %vm446_vm0, %v1182_v2  ;;  %1068 = vmatprep.mubr.msk.bf16.mxu1 %vm446_vm0, %v1184_v3 }
  0x95   :  { %688 = vmatmul.mubr.bf16.gmra.mrb[56].mxu0 %v1186_v4  ;;  %816 = vmatmul.mubr.bf16.gmra.mrb[56].mxu1 %v1187_v5 }
  0x96   :  { %1053 = vmatprep.mubr.msk.bf16.mxu0 %vm446_vm0, %v1188_v6  ;;  %1069 = vmatprep.mubr.msk.bf16.mxu1 %vm446_vm0, %v1190_v7 }
  0x9d   :  { %696 = vmatmul.mubr.bf16.gmra.mrb[60].mxu0 %v1192_v8  ;;  %824 = vmatmul.mubr.bf16.gmra.mrb[60].mxu1 %v1193_v9 }
  0xf8   :  { %v577_v11 = vpop.f32.mrb[0].mxu0  ;;  %v705_v12 = vpop.f32.mrb[0].mxu1 }
  0xf9   :  { %v578_v13 = vadd.f32 %v1597_v10, %v577_v11  ;;  %v706_v14 = vadd.f32 %v1597_v10, %v705_v12  ;;  %v579_v15 = vpop.f32.mrb[1].mxu0  ;;  %v707_v16 = vpop.f32.mrb[1].mxu1 }
  0xfa   :  { %v580_v17 = vpop.f32.mrb[2].mxu0  ;;  %v708_v18 = vpop.f32.mrb[2].mxu1 }
  0xfb   :  { %1194 = vtanh.f32 %v578_v13  ;;  %v581_v19 = vadd.f32 %v1597_v10, %v580_v17  ;;  %v709_v20 = vadd.f32 %v1597_v10, %v708_v18  ;;  %v582_v21 = vpop.f32.mrb[3].mxu0  ;;  %v710_v22 = vpop.f32.mrb[3].mxu1 }
  0xfc   :  { %1196 = vtanh.f32 %v706_v14 }
  0xfd   :  { %1198 = vtanh.f32 %v581_v19 }
  0xfe   :  { %1200 = vtanh.f32 %v709_v20 }
 0x100   :  { %v585_v23 = vpop.f32.mrb[4].mxu0  ;;  %v713_v24 = vpop.f32.mrb[4].mxu1 }
 0x101   :  { %v586_v25 = vadd.f32 %v1597_v10, %v585_v23  ;;  %v714_v26 = vadd.f32 %v1597_v10, %v713_v24  ;;  %v587_v27 = vpop.f32.mrb[5].mxu0  ;;  %v715_v28 = vpop.f32.mrb[5].mxu1 }
 0x102   :  { %v588_v29 = vpop.f32.mrb[6].mxu0  ;;  %v716_v30 = vpop.f32.mrb[6].mxu1 }
 0x103   :  { %1202 = vtanh.f32 %v586_v25  ;;  %v589_v31 = vadd.f32 %v1597_v10, %v588_v29  ;;  %v717_v32 = vadd.f32 %v1597_v10, %v716_v30  ;;  %v590_v33 = vpop.f32.mrb[7].mxu0  ;;  %v718_v34 = vpop.f32.mrb[7].mxu1 }
 0x104   :  { %1204 = vtanh.f32 %v714_v26 }
 0x105   :  { %v1195_v35 = vpop.eup %1194  ;;  %1206 = vtanh.f32 %v589_v31 }
 0x106   :  { %v1197_v36 = vpop.eup %1196  ;;  %896 = vst [vmem:[%s1858_s3] sm:$0xff] %v1195_v35  ;;  %1208 = vtanh.f32 %v717_v32 }
 0x107   :  { %v1199_v37 = vpop.eup %1198  ;;  %928 = vst [vmem:[%s1858_s3 + $0x100] sm:$0xff] %v1197_v36 }
 0x108   :  { %v1201_v38 = vpop.eup %1200  ;;  %897 = vst [vmem:[%s1858_s3 + $0x8] sm:$0xff] %v1199_v37  ;;  %v593_v39 = vpop.f32.mrb[8].mxu0 }
 0x109   :  { %v721_v40 = vpop.f32.mrb[8].mxu1  ;;  %929 = vst [vmem:[%s1858_s3 + $0x108] sm:$0xff] %v1201_v38  ;;  %v594_v41 = vadd.f32 %v1597_v10, %v593_v39  ;;  %v595_v43 = vpop.f32.mrb[9].mxu0 }
 0x10a   :  { %v722_v42 = vadd.f32 %v1597_v10, %v721_v40  ;;  %v723_v44 = vpop.f32.mrb[9].mxu1  ;;  %v596_v45 = vpop.f32.mrb[10].mxu0 }
 0x10b   :  { %v724_v46 = vpop.f32.mrb[10].mxu1  ;;  %1210 = vtanh.f32 %v594_v41  ;;  %v597_v47 = vadd.f32 %v1597_v10, %v596_v45  ;;  %v598_v49 = vpop.f32.mrb[11].mxu0 }
 0x10c   :  { %v725_v48 = vadd.f32 %v1597_v10, %v724_v46  ;;  %v726_v50 = vpop.f32.mrb[11].mxu1  ;;  %1212 = vtanh.f32 %v722_v42 }
 0x10d   :  { %v1203_v51 = vpop.eup %1202  ;;  %1214 = vtanh.f32 %v597_v47 }
 0x10e   :  { %v1205_v52 = vpop.eup %1204  ;;  %898 = vst [vmem:[%s1858_s3 + $0x10] sm:$0xff] %v1203_v51  ;;  %1216 = vtanh.f32 %v725_v48 }
 0x10f   :  { %v1207_v53 = vpop.eup %1206  ;;  %930 = vst [vmem:[%s1858_s3 + $0x110] sm:$0xff] %v1205_v52 }
 0x110   :  { %v1209_v54 = vpop.eup %1208  ;;  %899 = vst [vmem:[%s1858_s3 + $0x18] sm:$0xff] %v1207_v53  ;;  %v601_v55 = vpop.f32.mrb[12].mxu0 }
 0x111   :  { %v729_v56 = vpop.f32.mrb[12].mxu1  ;;  %931 = vst [vmem:[%s1858_s3 + $0x118] sm:$0xff] %v1209_v54  ;;  %v602_v57 = vadd.f32 %v1597_v10, %v601_v55  ;;  %v603_v59 = vpop.f32.mrb[13].mxu0 }
 0x112   :  { %v730_v58 = vadd.f32 %v1597_v10, %v729_v56  ;;  %v731_v60 = vpop.f32.mrb[13].mxu1  ;;  %v604_v61 = vpop.f32.mrb[14].mxu0 }
 0x113   :  { %v732_v62 = vpop.f32.mrb[14].mxu1  ;;  %1218 = vtanh.f32 %v602_v57  ;;  %v605_v63 = vadd.f32 %v1597_v10, %v604_v61  ;;  %v606_v1 = vpop.f32.mrb[15].mxu0 }
 0x114   :  { %v733_v0 = vadd.f32 %v1597_v10, %v732_v62  ;;  %v734_v2 = vpop.f32.mrb[15].mxu1  ;;  %1220 = vtanh.f32 %v730_v58 }
 0x115   :  { %v1211_v3 = vpop.eup %1210  ;;  %1222 = vtanh.f32 %v605_v63 }
 0x116   :  { %v1213_v4 = vpop.eup %1212  ;;  %900 = vst [vmem:[%s1858_s3 + $0x20] sm:$0xff] %v1211_v3  ;;  %1224 = vtanh.f32 %v733_v0 }
 0x117   :  { %v1215_v5 = vpop.eup %1214  ;;  %932 = vst [vmem:[%s1858_s3 + $0x120] sm:$0xff] %v1213_v4 }
 0x118   :  { %v1217_v6 = vpop.eup %1216  ;;  %901 = vst [vmem:[%s1858_s3 + $0x28] sm:$0xff] %v1215_v5  ;;  %v609_v7 = vpop.f32.mrb[16].mxu0 }
 0x119   :  { %v737_v8 = vpop.f32.mrb[16].mxu1  ;;  %933 = vst [vmem:[%s1858_s3 + $0x128] sm:$0xff] %v1217_v6  ;;  %v610_v9 = vadd.f32 %v1597_v10, %v609_v7  ;;  %v611_v12 = vpop.f32.mrb[17].mxu0 }
 0x11a   :  { %v738_v11 = vadd.f32 %v1597_v10, %v737_v8  ;;  %v739_v13 = vpop.f32.mrb[17].mxu1  ;;  %v612_v14 = vpop.f32.mrb[18].mxu0 }
 0x11b   :  { %v740_v15 = vpop.f32.mrb[18].mxu1  ;;  %1226 = vtanh.f32 %v610_v9  ;;  %v613_v16 = vadd.f32 %v1597_v10, %v612_v14  ;;  %v614_v18 = vpop.f32.mrb[19].mxu0 }
 0x11c   :  { %v741_v17 = vadd.f32 %v1597_v10, %v740_v15  ;;  %v742_v19 = vpop.f32.mrb[19].mxu1  ;;  %1228 = vtanh.f32 %v738_v11 }
 0x11d   :  { %v1219_v20 = vpop.eup %1218  ;;  %1230 = vtanh.f32 %v613_v16 }
 0x11e   :  { %v1221_v21 = vpop.eup %1220  ;;  %902 = vst [vmem:[%s1858_s3 + $0x30] sm:$0xff] %v1219_v20  ;;  %1232 = vtanh.f32 %v741_v17 }
 0x11f   :  { %v1223_v22 = vpop.eup %1222  ;;  %934 = vst [vmem:[%s1858_s3 + $0x130] sm:$0xff] %v1221_v21 }
 0x120   :  { %v1225_v23 = vpop.eup %1224  ;;  %903 = vst [vmem:[%s1858_s3 + $0x38] sm:$0xff] %v1223_v22  ;;  %v617_v24 = vpop.f32.mrb[20].mxu0 }
 0x121   :  { %v745_v25 = vpop.f32.mrb[20].mxu1  ;;  %935 = vst [vmem:[%s1858_s3 + $0x138] sm:$0xff] %v1225_v23  ;;  %v618_v26 = vadd.f32 %v1597_v10, %v617_v24  ;;  %v619_v28 = vpop.f32.mrb[21].mxu0 }
 0x122   :  { %v746_v27 = vadd.f32 %v1597_v10, %v745_v25  ;;  %v747_v29 = vpop.f32.mrb[21].mxu1  ;;  %v620_v30 = vpop.f32.mrb[22].mxu0 }
 0x123   :  { %v748_v31 = vpop.f32.mrb[22].mxu1  ;;  %1234 = vtanh.f32 %v618_v26  ;;  %v621_v32 = vadd.f32 %v1597_v10, %v620_v30  ;;  %v622_v34 = vpop.f32.mrb[23].mxu0 }
 0x124   :  { %v749_v33 = vadd.f32 %v1597_v10, %v748_v31  ;;  %v750_v35 = vpop.f32.mrb[23].mxu1  ;;  %1236 = vtanh.f32 %v746_v27 }
 0x125   :  { %v1227_v36 = vpop.eup %1226  ;;  %1238 = vtanh.f32 %v621_v32 }
 0x126   :  { %v1229_v37 = vpop.eup %1228  ;;  %904 = vst [vmem:[%s1858_s3 + $0x40] sm:$0xff] %v1227_v36  ;;  %1240 = vtanh.f32 %v749_v33 }
 0x127   :  { %v1231_v38 = vpop.eup %1230  ;;  %936 = vst [vmem:[%s1858_s3 + $0x140] sm:$0xff] %v1229_v37 }
 0x128   :  { %v1233_v39 = vpop.eup %1232  ;;  %905 = vst [vmem:[%s1858_s3 + $0x48] sm:$0xff] %v1231_v38  ;;  %v625_v40 = vpop.f32.mrb[24].mxu0 }
 0x129   :  { %v753_v41 = vpop.f32.mrb[24].mxu1  ;;  %937 = vst [vmem:[%s1858_s3 + $0x148] sm:$0xff] %v1233_v39  ;;  %v626_v42 = vadd.f32 %v1597_v10, %v625_v40  ;;  %v627_v44 = vpop.f32.mrb[25].mxu0 }
 0x12a   :  { %v754_v43 = vadd.f32 %v1597_v10, %v753_v41  ;;  %v755_v45 = vpop.f32.mrb[25].mxu1  ;;  %v628_v46 = vpop.f32.mrb[26].mxu0 }
 0x12b   :  { %v756_v47 = vpop.f32.mrb[26].mxu1  ;;  %1242 = vtanh.f32 %v626_v42  ;;  %v629_v48 = vadd.f32 %v1597_v10, %v628_v46  ;;  %v630_v50 = vpop.f32.mrb[27].mxu0 }
 0x12c   :  { %v757_v49 = vadd.f32 %v1597_v10, %v756_v47  ;;  %v758_v51 = vpop.f32.mrb[27].mxu1  ;;  %1244 = vtanh.f32 %v754_v43 }
 0x12d   :  { %v1235_v52 = vpop.eup %1234  ;;  %1246 = vtanh.f32 %v629_v48 }
 0x12e   :  { %v1237_v53 = vpop.eup %1236  ;;  %906 = vst [vmem:[%s1858_s3 + $0x50] sm:$0xff] %v1235_v52  ;;  %1248 = vtanh.f32 %v757_v49 }
 0x12f   :  { %v1239_v54 = vpop.eup %1238  ;;  %938 = vst [vmem:[%s1858_s3 + $0x150] sm:$0xff] %v1237_v53 }
 0x130   :  { %v1241_v55 = vpop.eup %1240  ;;  %907 = vst [vmem:[%s1858_s3 + $0x58] sm:$0xff] %v1239_v54  ;;  %v633_v56 = vpop.f32.mrb[28].mxu0 }
 0x131   :  { %v761_v57 = vpop.f32.mrb[28].mxu1  ;;  %939 = vst [vmem:[%s1858_s3 + $0x158] sm:$0xff] %v1241_v55  ;;  %v634_v58 = vadd.f32 %v1597_v10, %v633_v56  ;;  %v635_v60 = vpop.f32.mrb[29].mxu0 }
 0x132   :  { %v762_v59 = vadd.f32 %v1597_v10, %v761_v57  ;;  %v763_v61 = vpop.f32.mrb[29].mxu1  ;;  %v636_v62 = vpop.f32.mrb[30].mxu0 }
 0x133   :  { %v764_v63 = vpop.f32.mrb[30].mxu1  ;;  %1250 = vtanh.f32 %v634_v58  ;;  %v637_v0 = vadd.f32 %v1597_v10, %v636_v62  ;;  %v638_v2 = vpop.f32.mrb[31].mxu0 }
 0x134   :  { %v765_v1 = vadd.f32 %v1597_v10, %v764_v63  ;;  %v766_v3 = vpop.f32.mrb[31].mxu1  ;;  %1252 = vtanh.f32 %v762_v59 }
 0x135   :  { %v1243_v4 = vpop.eup %1242  ;;  %1254 = vtanh.f32 %v637_v0 }
 0x136   :  { %v1245_v5 = vpop.eup %1244  ;;  %908 = vst [vmem:[%s1858_s3 + $0x60] sm:$0xff] %v1243_v4  ;;  %1256 = vtanh.f32 %v765_v1 }
 0x137   :  { %v1247_v6 = vpop.eup %1246  ;;  %940 = vst [vmem:[%s1858_s3 + $0x160] sm:$0xff] %v1245_v5 }
 0x138   :  { %v1249_v7 = vpop.eup %1248  ;;  %909 = vst [vmem:[%s1858_s3 + $0x68] sm:$0xff] %v1247_v6  ;;  %v641_v8 = vpop.f32.mrb[32].mxu0 }
 0x139   :  { %v769_v9 = vpop.f32.mrb[32].mxu1  ;;  %941 = vst [vmem:[%s1858_s3 + $0x168] sm:$0xff] %v1249_v7  ;;  %v642_v11 = vadd.f32 %v1597_v10, %v641_v8  ;;  %v643_v13 = vpop.f32.mrb[33].mxu0 }
 0x13a   :  { %v770_v12 = vadd.f32 %v1597_v10, %v769_v9  ;;  %v771_v14 = vpop.f32.mrb[33].mxu1  ;;  %v644_v15 = vpop.f32.mrb[34].mxu0 }
 0x13b   :  { %v772_v16 = vpop.f32.mrb[34].mxu1  ;;  %1258 = vtanh.f32 %v642_v11  ;;  %v645_v17 = vadd.f32 %v1597_v10, %v644_v15  ;;  %v646_v19 = vpop.f32.mrb[35].mxu0 }
 0x13c   :  { %v773_v18 = vadd.f32 %v1597_v10, %v772_v16  ;;  %v774_v20 = vpop.f32.mrb[35].mxu1  ;;  %1260 = vtanh.f32 %v770_v12 }
 0x13d   :  { %v1251_v21 = vpop.eup %1250  ;;  %1262 = vtanh.f32 %v645_v17 }
 0x13e   :  { %v1253_v22 = vpop.eup %1252  ;;  %910 = vst [vmem:[%s1858_s3 + $0x70] sm:$0xff] %v1251_v21  ;;  %1264 = vtanh.f32 %v773_v18 }
 0x13f   :  { %v1255_v23 = vpop.eup %1254  ;;  %942 = vst [vmem:[%s1858_s3 + $0x170] sm:$0xff] %v1253_v22 }
 0x140   :  { %v1257_v24 = vpop.eup %1256  ;;  %911 = vst [vmem:[%s1858_s3 + $0x78] sm:$0xff] %v1255_v23  ;;  %v649_v25 = vpop.f32.mrb[36].mxu0 }
 0x141   :  { %v777_v26 = vpop.f32.mrb[36].mxu1  ;;  %943 = vst [vmem:[%s1858_s3 + $0x178] sm:$0xff] %v1257_v24  ;;  %v650_v27 = vadd.f32 %v1597_v10, %v649_v25  ;;  %v651_v29 = vpop.f32.mrb[37].mxu0 }
 0x142   :  { %v778_v28 = vadd.f32 %v1597_v10, %v777_v26  ;;  %v779_v30 = vpop.f32.mrb[37].mxu1  ;;  %v652_v31 = vpop.f32.mrb[38].mxu0 }
 0x143   :  { %v780_v32 = vpop.f32.mrb[38].mxu1  ;;  %1266 = vtanh.f32 %v650_v27  ;;  %v653_v33 = vadd.f32 %v1597_v10, %v652_v31  ;;  %v654_v35 = vpop.f32.mrb[39].mxu0 }
 0x144   :  { %v781_v34 = vadd.f32 %v1597_v10, %v780_v32  ;;  %v782_v36 = vpop.f32.mrb[39].mxu1  ;;  %1268 = vtanh.f32 %v778_v28 }
 0x145   :  { %v1259_v37 = vpop.eup %1258  ;;  %1270 = vtanh.f32 %v653_v33 }
 0x146   :  { %v1261_v38 = vpop.eup %1260  ;;  %912 = vst [vmem:[%s1858_s3 + $0x80] sm:$0xff] %v1259_v37  ;;  %1272 = vtanh.f32 %v781_v34 }
 0x147   :  { %v1263_v39 = vpop.eup %1262  ;;  %944 = vst [vmem:[%s1858_s3 + $0x180] sm:$0xff] %v1261_v38 }
 0x148   :  { %v1265_v40 = vpop.eup %1264  ;;  %913 = vst [vmem:[%s1858_s3 + $0x88] sm:$0xff] %v1263_v39  ;;  %v657_v41 = vpop.f32.mrb[40].mxu0 }
 0x149   :  { %v785_v42 = vpop.f32.mrb[40].mxu1  ;;  %945 = vst [vmem:[%s1858_s3 + $0x188] sm:$0xff] %v1265_v40  ;;  %v658_v43 = vadd.f32 %v1597_v10, %v657_v41  ;;  %v659_v45 = vpop.f32.mrb[41].mxu0 }
 0x14a   :  { %v786_v44 = vadd.f32 %v1597_v10, %v785_v42  ;;  %v787_v46 = vpop.f32.mrb[41].mxu1  ;;  %v660_v47 = vpop.f32.mrb[42].mxu0 }
 0x14b   :  { %v788_v48 = vpop.f32.mrb[42].mxu1  ;;  %1274 = vtanh.f32 %v658_v43  ;;  %v661_v49 = vadd.f32 %v1597_v10, %v660_v47  ;;  %v662_v51 = vpop.f32.mrb[43].mxu0 }
 0x14c   :  { %v789_v50 = vadd.f32 %v1597_v10, %v788_v48  ;;  %v790_v52 = vpop.f32.mrb[43].mxu1  ;;  %1276 = vtanh.f32 %v786_v44 }
 0x14d   :  { %v1267_v53 = vpop.eup %1266  ;;  %1278 = vtanh.f32 %v661_v49 }
 0x14e   :  { %v1269_v54 = vpop.eup %1268  ;;  %914 = vst [vmem:[%s1858_s3 + $0x90] sm:$0xff] %v1267_v53  ;;  %1280 = vtanh.f32 %v789_v50 }
 0x14f   :  { %v1271_v55 = vpop.eup %1270  ;;  %946 = vst [vmem:[%s1858_s3 + $0x190] sm:$0xff] %v1269_v54 }
 0x150   :  { %v1273_v56 = vpop.eup %1272  ;;  %915 = vst [vmem:[%s1858_s3 + $0x98] sm:$0xff] %v1271_v55  ;;  %v665_v57 = vpop.f32.mrb[44].mxu0 }
 0x151   :  { %v793_v58 = vpop.f32.mrb[44].mxu1  ;;  %947 = vst [vmem:[%s1858_s3 + $0x198] sm:$0xff] %v1273_v56  ;;  %v666_v59 = vadd.f32 %v1597_v10, %v665_v57  ;;  %v667_v61 = vpop.f32.mrb[45].mxu0 }
 0x152   :  { %v794_v60 = vadd.f32 %v1597_v10, %v793_v58  ;;  %v795_v62 = vpop.f32.mrb[45].mxu1  ;;  %v668_v63 = vpop.f32.mrb[46].mxu0 }
 0x153   :  { %v796_v0 = vpop.f32.mrb[46].mxu1  ;;  %1282 = vtanh.f32 %v666_v59  ;;  %v669_v1 = vadd.f32 %v1597_v10, %v668_v63  ;;  %v670_v3 = vpop.f32.mrb[47].mxu0 }
 0x154   :  { %v797_v2 = vadd.f32 %v1597_v10, %v796_v0  ;;  %v798_v4 = vpop.f32.mrb[47].mxu1  ;;  %1284 = vtanh.f32 %v794_v60 }
 0x155   :  { %v1275_v5 = vpop.eup %1274  ;;  %1286 = vtanh.f32 %v669_v1 }
 0x156   :  { %v1277_v6 = vpop.eup %1276  ;;  %916 = vst [vmem:[%s1858_s3 + $0xa0] sm:$0xff] %v1275_v5  ;;  %1288 = vtanh.f32 %v797_v2 }
 0x157   :  { %v1279_v7 = vpop.eup %1278  ;;  %948 = vst [vmem:[%s1858_s3 + $0x1a0] sm:$0xff] %v1277_v6 }
 0x158   :  { %v1281_v8 = vpop.eup %1280  ;;  %917 = vst [vmem:[%s1858_s3 + $0xa8] sm:$0xff] %v1279_v7  ;;  %v673_v9 = vpop.f32.mrb[48].mxu0 }
 0x159   :  { %v801_v11 = vpop.f32.mrb[48].mxu1  ;;  %949 = vst [vmem:[%s1858_s3 + $0x1a8] sm:$0xff] %v1281_v8  ;;  %v674_v12 = vadd.f32 %v1597_v10, %v673_v9  ;;  %v675_v14 = vpop.f32.mrb[49].mxu0 }
 0x15a   :  { %v802_v13 = vadd.f32 %v1597_v10, %v801_v11  ;;  %v803_v15 = vpop.f32.mrb[49].mxu1  ;;  %v676_v16 = vpop.f32.mrb[50].mxu0 }
 0x15b   :  { %v804_v17 = vpop.f32.mrb[50].mxu1  ;;  %1290 = vtanh.f32 %v674_v12  ;;  %v677_v18 = vadd.f32 %v1597_v10, %v676_v16  ;;  %v678_v20 = vpop.f32.mrb[51].mxu0 }
 0x15c   :  { %v805_v19 = vadd.f32 %v1597_v10, %v804_v17  ;;  %v806_v21 = vpop.f32.mrb[51].mxu1  ;;  %1292 = vtanh.f32 %v802_v13 }
 0x15d   :  { %v1283_v22 = vpop.eup %1282  ;;  %1294 = vtanh.f32 %v677_v18 }
 0x15e   :  { %v1285_v23 = vpop.eup %1284  ;;  %918 = vst [vmem:[%s1858_s3 + $0xb0] sm:$0xff] %v1283_v22  ;;  %1296 = vtanh.f32 %v805_v19 }
 0x15f   :  { %v1287_v24 = vpop.eup %1286  ;;  %950 = vst [vmem:[%s1858_s3 + $0x1b0] sm:$0xff] %v1285_v23 }
 0x160   :  { %v1289_v25 = vpop.eup %1288  ;;  %919 = vst [vmem:[%s1858_s3 + $0xb8] sm:$0xff] %v1287_v24  ;;  %v681_v26 = vpop.f32.mrb[52].mxu0 }
 0x161   :  { %v809_v27 = vpop.f32.mrb[52].mxu1  ;;  %951 = vst [vmem:[%s1858_s3 + $0x1b8] sm:$0xff] %v1289_v25  ;;  %v682_v28 = vadd.f32 %v1597_v10, %v681_v26  ;;  %v683_v30 = vpop.f32.mrb[53].mxu0 }
 0x162   :  { %v810_v29 = vadd.f32 %v1597_v10, %v809_v27  ;;  %v811_v31 = vpop.f32.mrb[53].mxu1  ;;  %v684_v32 = vpop.f32.mrb[54].mxu0 }
 0x163   :  { %v812_v33 = vpop.f32.mrb[54].mxu1  ;;  %1298 = vtanh.f32 %v682_v28  ;;  %v685_v34 = vadd.f32 %v1597_v10, %v684_v32  ;;  %v686_v36 = vpop.f32.mrb[55].mxu0 }
 0x164   :  { %v813_v35 = vadd.f32 %v1597_v10, %v812_v33  ;;  %v814_v37 = vpop.f32.mrb[55].mxu1  ;;  %1300 = vtanh.f32 %v810_v29 }
 0x165   :  { %v1291_v38 = vpop.eup %1290  ;;  %1302 = vtanh.f32 %v685_v34 }
 0x166   :  { %v1293_v39 = vpop.eup %1292  ;;  %920 = vst [vmem:[%s1858_s3 + $0xc0] sm:$0xff] %v1291_v38  ;;  %1304 = vtanh.f32 %v813_v35 }
 0x167   :  { %v1295_v40 = vpop.eup %1294  ;;  %952 = vst [vmem:[%s1858_s3 + $0x1c0] sm:$0xff] %v1293_v39 }
 0x168   :  { %v1297_v41 = vpop.eup %1296  ;;  %921 = vst [vmem:[%s1858_s3 + $0xc8] sm:$0xff] %v1295_v40  ;;  %v689_v42 = vpop.f32.mrb[56].mxu0 }
 0x169   :  { %v817_v43 = vpop.f32.mrb[56].mxu1  ;;  %953 = vst [vmem:[%s1858_s3 + $0x1c8] sm:$0xff] %v1297_v41  ;;  %v690_v44 = vadd.f32 %v1597_v10, %v689_v42  ;;  %v691_v46 = vpop.f32.mrb[57].mxu0 }
 0x16a   :  { %v818_v45 = vadd.f32 %v1597_v10, %v817_v43  ;;  %v819_v47 = vpop.f32.mrb[57].mxu1  ;;  %v692_v48 = vpop.f32.mrb[58].mxu0 }
 0x16b   :  { %v820_v49 = vpop.f32.mrb[58].mxu1  ;;  %1306 = vtanh.f32 %v690_v44  ;;  %v693_v50 = vadd.f32 %v1597_v10, %v692_v48  ;;  %v694_v52 = vpop.f32.mrb[59].mxu0 }
 0x16c   :  { %v821_v51 = vadd.f32 %v1597_v10, %v820_v49  ;;  %v822_v53 = vpop.f32.mrb[59].mxu1  ;;  %1308 = vtanh.f32 %v818_v45 }
 0x16d   :  { %v1299_v54 = vpop.eup %1298  ;;  %1310 = vtanh.f32 %v693_v50 }
 0x16e   :  { %v1301_v55 = vpop.eup %1300  ;;  %922 = vst [vmem:[%s1858_s3 + $0xd0] sm:$0xff] %v1299_v54  ;;  %1312 = vtanh.f32 %v821_v51 }
 0x16f   :  { %v1303_v56 = vpop.eup %1302  ;;  %954 = vst [vmem:[%s1858_s3 + $0x1d0] sm:$0xff] %v1301_v55 }
 0x170   :  { %v1305_v57 = vpop.eup %1304  ;;  %923 = vst [vmem:[%s1858_s3 + $0xd8] sm:$0xff] %v1303_v56  ;;  %v697_v58 = vpop.f32.mrb[60].mxu0 }
 0x171   :  { %v825_v59 = vpop.f32.mrb[60].mxu1  ;;  %955 = vst [vmem:[%s1858_s3 + $0x1d8] sm:$0xff] %v1305_v57  ;;  %v698_v60 = vadd.f32 %v1597_v10, %v697_v58  ;;  %v699_v62 = vpop.f32.mrb[61].mxu0 }
 0x172   :  { %v826_v61 = vadd.f32 %v1597_v10, %v825_v59  ;;  %v827_v63 = vpop.f32.mrb[61].mxu1  ;;  %v700_v0 = vpop.f32.mrb[62].mxu0 }
 0x173   :  { %v828_v1 = vpop.f32.mrb[62].mxu1  ;;  %1314 = vtanh.f32 %v698_v60  ;;  %v701_v2 = vadd.f32 %v1597_v10, %v700_v0  ;;  %v702_v4 = vpop.f32.mrb[63].mxu0 }
 0x174   :  { %v829_v3 = vadd.f32 %v1597_v10, %v828_v1  ;;  %v830_v5 = vpop.f32.mrb[63].mxu1  ;;  %1316 = vtanh.f32 %v826_v61 }
 0x175   :  { %v1307_v6 = vpop.eup %1306  ;;  %1318 = vtanh.f32 %v701_v2 }
 0x176   :  { %v1309_v7 = vpop.eup %1308  ;;  %924 = vst [vmem:[%s1858_s3 + $0xe0] sm:$0xff] %v1307_v6  ;;  %1320 = vtanh.f32 %v829_v3 }
 0x177   :  { %v1311_v8 = vpop.eup %1310  ;;  %956 = vst [vmem:[%s1858_s3 + $0x1e0] sm:$0xff] %v1309_v7 }
 0x178   :  { %v1313_v9 = vpop.eup %1312  ;;  %925 = vst [vmem:[%s1858_s3 + $0xe8] sm:$0xff] %v1311_v8 }
 0x179   :  { %957 = vst [vmem:[%s1858_s3 + $0x1e8] sm:$0xff] %v1313_v9 }
 0x17d   :  { %v1315_v10 = vpop.eup %1314 }
 0x17e   :  { %v1317_v11 = vpop.eup %1316  ;;  %926 = vst [vmem:[%s1858_s3 + $0xf0] sm:$0xff] %v1315_v10 }
 0x17f   :  { %v1319_v12 = vpop.eup %1318  ;;  %958 = vst [vmem:[%s1858_s3 + $0x1f0] sm:$0xff] %v1317_v11 }
 0x180   :  { %v1321_v13 = vpop.eup %1320  ;;  %927 = vst [vmem:[%s1858_s3 + $0xf8] sm:$0xff] %v1319_v12 }
 0x181   :  { %959 = vst [vmem:[%s1858_s3 + $0x1f8] sm:$0xff] %v1321_v13 }

</bundles_post_ra>
